<compile_context>
chip_gen: v5e
topology: v5e:2x2
jax: 0.10.0
libtpu: 0.0.40
codegen_flags: <defaults>
</compile_context>

<pallas_src>
import functools

import jax
import jax.numpy as jnp
from jax.experimental import pallas as pl
from jax.experimental.pallas import tpu as pltpu


_VMEM_LIMIT = 32 * 1024 * 1024  # explicit scoped-VMEM cap (raises v5e's 16 MiB default)


def _row_tile(h, target):
    t = min(h, target)
    while h % t:
        t -= 1
    return t


# ----------------------------- Pallas kernels --------------------------------

def _tap_conv_bn_relu_kernel(x_ref, w_ref, scale_ref, bias_ref, o_ref, *,
                             taps, W, TR, n_rpar, n_cpar):
    """Shifted-window GEMM conv + folded BN + ReLU for one (batch, row-tile).

    x_ref:  (1, Hp, Wp, Cin)  bf16 zero-padded input, resident per batch elem.
    w_ref:  (T, Cin, Cout)    bf16 per-tap weight matrices, resident.
    scale_ref, bias_ref: (1, Cout) f32 folded BatchNorm affine.
    o_ref:  (1, TR, n_rpar, W, n_cpar*Cout) output row tile.  For a stride-2
            deconv the (row-parity, col-parity) sub-pixel outputs are written
            so a plain row-major reshape interleaves them (no XLA transpose).
    """
    i = pl.program_id(1)
    row0 = i * TR
    scale = scale_ref[...]                    # (1, Cout) f32
    bias = bias_ref[...]
    cout = scale.shape[-1]
    cin = x_ref.shape[-1]
    for m in range(TR):                       # static unroll over rows in tile
        for r in range(n_rpar):
            for c in range(n_cpar):
                acc = None
                for (dh, dw, widx) in taps[(r, c)]:
                    patch = x_ref[0, pl.ds(row0 + m + dh, 1), dw:dw + W, :]
                    patch = patch.reshape(W, cin)                    # (W, Cin) bf16
                    part = jnp.dot(patch, w_ref[widx],
                                   preferred_element_type=jnp.float32)
                    acc = part if acc is None else acc + part        # init with 1st tap
                y = jnp.maximum(acc * scale + bias, 0.0)             # fused BN + ReLU (f32)
                o_ref[0, m, r, :, c * cout:(c + 1) * cout] = y.astype(o_ref.dtype)


def _upsample2x_kernel(x_ref, o_ref, *, TR, W):
    """Bilinear x2 (align_corners=False) for one (batch, row-tile).

    x_ref: (1, H+2, W+2, C) edge-replicated padded input (resident per batch).
    o_ref: (1, TR, 2, W, 2*C) row-parity on dim 2, col-parity interleaved with
           channels on the last dim -> output interleave is a free reshape.
    """
    i = pl.program_id(1)
    row0 = i * TR
    C = x_ref.shape[-1]
    x = x_ref[0, pl.ds(row0, TR + 2), :, :].astype(jnp.float32)      # (TR+2, W+2, C)
    r_ev = 0.25 * x[0:TR, :, :] + 0.75 * x[1:TR + 1, :, :]
    r_od = 0.75 * x[1:TR + 1, :, :] + 0.25 * x[2:TR + 2, :, :]
    for p, rows in ((0, r_ev), (1, r_od)):
        c_ev = 0.25 * rows[:, 0:W, :] + 0.75 * rows[:, 1:W + 1, :]
        c_od = 0.75 * rows[:, 1:W + 1, :] + 0.25 * rows[:, 2:W + 2, :]
        o_ref[0, :, p, :, 0:C] = c_ev.astype(o_ref.dtype)
        o_ref[0, :, p, :, C:2 * C] = c_od.astype(o_ref.dtype)


# ------------------------------- wrappers -------------------------------------

def tap_conv_bn_relu(xp, w_stack, scale, bias, taps, H, W, n_rpar, n_cpar):
    """Generic tap-GEMM conv + BN + ReLU; output parity-interleaved layout."""
    B, Hp, Wp, Cin = xp.shape
    T, _, Cout = w_stack.shape
    TR = _row_tile(H, 4)
    kernel = functools.partial(_tap_conv_bn_relu_kernel, taps=taps, W=W, TR=TR,
                               n_rpar=n_rpar, n_cpar=n_cpar)
    out = pl.pallas_call(
        kernel,
        out_shape=jax.ShapeDtypeStruct((B, H, n_rpar, W, n_cpar * Cout), jnp.float32),
        grid=(B, H // TR),
        in_specs=[
            pl.BlockSpec((1, Hp, Wp, Cin), lambda b, i: (b, 0, 0, 0)),   # resident input
            pl.BlockSpec((T, Cin, Cout), lambda b, i: (0, 0, 0)),        # resident weights
            pl.BlockSpec((1, Cout), lambda b, i: (0, 0)),
            pl.BlockSpec((1, Cout), lambda b, i: (0, 0)),
        ],
        out_specs=pl.BlockSpec((1, TR, n_rpar, W, n_cpar * Cout),
                               lambda b, i: (b, i, 0, 0, 0)),
        compiler_params=pltpu.CompilerParams(
            dimension_semantics=("parallel", "parallel"),
            vmem_limit_bytes=_VMEM_LIMIT),
    )(xp, w_stack, scale.reshape(1, Cout), bias.reshape(1, Cout))
    return out


def deconv_bn_relu(x, layer):
    """ConvTranspose2d(stride=2, bias=False) + BN + ReLU via parity decomposition."""
    B, H, W, _ = x.shape
    lo, hi = layer['pad_hw']
    xp = jnp.pad(x, ((0, 0), (lo, hi), (lo, hi), (0, 0))).astype(jnp.bfloat16)
    out = tap_conv_bn_relu(xp, layer['w_stack'], layer['scale'], layer['bias'],
                           layer['taps'], H, W, 2, 2)
    Cout = layer['scale'].shape[0]
    return out.reshape(B, 2 * H, 2 * W, Cout)          # free row-major interleave


def conv3x3_bn_relu(x, layer):
    B, H, W, _ = x.shape
    xp = jnp.pad(x, ((0, 0), (1, 1), (1, 1), (0, 0))).astype(jnp.bfloat16)
    out = tap_conv_bn_relu(xp, layer['w_stack'], layer['scale'], layer['bias'],
                           layer['taps'], H, W, 1, 1)
    Cout = layer['scale'].shape[0]
    return out.reshape(B, H, W, Cout)


def upsample2x(x):
    """nn.Upsample(scale_factor=2, mode='bilinear', align_corners=False)."""
    B, H, W, C = x.shape
    xp = jnp.pad(x, ((0, 0), (1, 1), (1, 1), (0, 0)), mode='edge')
    TR = _row_tile(H, 8)
    kernel = functools.partial(_upsample2x_kernel, TR=TR, W=W)
    out = pl.pallas_call(
        kernel,
        out_shape=jax.ShapeDtypeStruct((B, H, 2, W, 2 * C), x.dtype),
        grid=(B, H // TR),
        in_specs=[pl.BlockSpec((1, H + 2, W + 2, C), lambda b, i: (b, 0, 0, 0))],
        out_specs=pl.BlockSpec((1, TR, 2, W, 2 * C), lambda b, i: (b, i, 0, 0, 0)),
        compiler_params=pltpu.CompilerParams(
            dimension_semantics=("parallel", "parallel"),
            vmem_limit_bytes=_VMEM_LIMIT),
    )(xp)
    return out.reshape(B, 2 * H, 2 * W, C)             # free row-major interleave


# ------------------------- taps / parameters / forward ------------------------

def _get_deconv_cfg(k):
    if k == 4:
        return k, 1, 0
    if k == 3:
        return k, 1, 1
    if k == 2:
        return k, 0, 0
    raise ValueError(f"Not supported num_kernels ({k}).")


def _build_deconv_taps(w_t, K, pad):
    """stride-2 ConvTranspose2d -> 4 parity correlations on the *undilated* input."""
    lo = K - 1 - pad
    par, all_d = {}, []
    for r in range(2):
        entries = []
        for kh in range(K):
            if (r + kh - lo) % 2 == 0:
                d = (r + kh - lo) // 2
                entries.append((kh, d))
                all_d.append(d)
        par[r] = entries
    pad_lo = max(0, -min(all_d))
    pad_hi = max(0, max(all_d))
    taps, w_list, idx = {}, [], 0
    for r in range(2):
        for c in range(2):
            lst = []
            for (kh, dh) in par[r]:
                for (kw, dw) in par[c]:
                    # flipped-kernel tap of the equivalent correlation
                    w_list.append(w_t[:, :, K - 1 - kh, K - 1 - kw])   # (Cin, Cout)
                    lst.append((dh + pad_lo, dw + pad_lo, idx))
                    idx += 1
            taps[(r, c)] = lst
    w_stack = jnp.stack(w_list, axis=0).astype(jnp.bfloat16)
    return taps, w_stack, (pad_lo, pad_hi)


def _build_conv3x3_taps(w_oihw):
    lst, w_list, idx = [], [], 0
    for dh in range(3):
        for dw in range(3):
            w_list.append(jnp.transpose(w_oihw[:, :, dh, dw]))         # (Cin, Cout)
            lst.append((dh, dw, idx))
            idx += 1
    return {(0, 0): lst}, jnp.stack(w_list, axis=0).astype(jnp.bfloat16)


def init_decoder_params(key, in_channels, out_channels, num_deconv,
                        num_filters, deconv_kernels):
    eps = 1e-5
    keys = iter(jax.random.split(key, 5 * (num_deconv + 1)))
    params = {'deconv': [], 'conv': None}
    in_planes = in_channels
    for i in range(num_deconv):
        K, pad, op = _get_deconv_cfg(deconv_kernels[i])
        assert K - 2 * pad + op == 2          # stride-2 deconv exactly doubles H, W
        planes = num_filters[i]
        w_t = 0.05 * jax.random.normal(next(keys), (in_planes, planes, K, K), jnp.float32)
        gamma = 1.0 + 0.1 * jax.random.normal(next(keys), (planes,), jnp.float32)
        beta = 0.1 * jax.random.normal(next(keys), (planes,), jnp.float32)
        mean = 0.1 * jax.random.normal(next(keys), (planes,), jnp.float32)
        var = jnp.ones((planes,), jnp.float32)
        scale = gamma / jnp.sqrt(var + eps)
        bias = beta - mean * scale
        taps, w_stack, pad_hw = _build_deconv_taps(w_t, K, pad)
        params['deconv'].append(dict(w_t=w_t, K=K, pad=pad, op=op,
                                     scale=scale, bias=bias,
                                     taps=taps, w_stack=w_stack, pad_hw=pad_hw))
        in_planes = planes
    w = 0.05 * jax.random.normal(next(keys), (out_channels, in_planes, 3, 3), jnp.float32)
    gamma = 1.0 + 0.1 * jax.random.normal(next(keys), (out_channels,), jnp.float32)
    beta = 0.1 * jax.random.normal(next(keys), (out_channels,), jnp.float32)
    mean = 0.1 * jax.random.normal(next(keys), (out_channels,), jnp.float32)
    var = jnp.ones((out_channels,), jnp.float32)
    scale = gamma / jnp.sqrt(var + eps)
    bias = beta - mean * scale
    taps, w_stack = _build_conv3x3_taps(w)
    params['conv'] = dict(w=w, scale=scale, bias=bias, taps=taps, w_stack=w_stack)
    return params


def decoder_forward(conv_feats, params):
    # conv_feats: list of NCHW arrays; only conv_feats[0] is used (as in PyTorch).
    x = jnp.transpose(conv_feats[0], (0, 2, 3, 1)).astype(jnp.float32)   # -> NHWC
    for layer in params['deconv']:
        x = deconv_bn_relu(x, layer)
    x = conv3x3_bn_relu(x, params['conv'])
    x = upsample2x(x)
    x = upsample2x(x)
    return jnp.transpose(x, (0, 3, 1, 2))                                # -> NCHW


# ------------------------ pure-JAX reference (check) ---------------------------

def _ref_conv(x, w_hwio, padding, lhs_dilation=(1, 1)):
    # matches the kernel's precision: bf16 operands, f32 accumulation
    return jax.lax.conv_general_dilated(
        x.astype(jnp.bfloat16), w_hwio.astype(jnp.bfloat16),
        window_strides=(1, 1), padding=padding, lhs_dilation=lhs_dilation,
        dimension_numbers=('NHWC', 'HWIO', 'NHWC'),
        preferred_element_type=jnp.float32)


def _ref_upsample2x(x):
    B, H, W, C = x.shape
    xp = jnp.pad(x, ((0, 0), (1, 1), (1, 1), (0, 0)), mode='edge')
    re = 0.25 * xp[:, 0:H] + 0.75 * xp[:, 1:H + 1]
    ro = 0.75 * xp[:, 1:H + 1] + 0.25 * xp[:, 2:H + 2]
    rows = jnp.stack([re, ro], axis=2).reshape(B, 2 * H, W + 2, C)
    ce = 0.25 * rows[:, :, 0:W] + 0.75 * rows[:, :, 1:W + 1]
    co = 0.75 * rows[:, :, 1:W + 1] + 0.25 * rows[:, :, 2:W + 2]
    return jnp.stack([ce, co], axis=3).reshape(B, 2 * H, 2 * W, C)


def decoder_forward_ref(conv_feats, params):
    x = jnp.transpose(conv_feats[0], (0, 2, 3, 1)).astype(jnp.float32)
    for p in params['deconv']:
        K, pad, op = p['K'], p['pad'], p['op']
        lo, hi = K - 1 - pad, K - 1 - pad + op
        w_hwio = jnp.flip(p['w_t'], axis=(2, 3)).transpose(2, 3, 0, 1)
        y = _ref_conv(x, w_hwio, padding=((lo, hi), (lo, hi)), lhs_dilation=(2, 2))
        x = jnp.maximum(y * p['scale'] + p['bias'], 0.0)
    c = params['conv']
    w_hwio = jnp.transpose(c['w'], (2, 3, 1, 0))
    y = _ref_conv(x, w_hwio, padding=((1, 1), (1, 1)))
    x = jnp.maximum(y * c['scale'] + c['bias'], 0.0)
    x = _ref_upsample2x(x)
    x = _ref_upsample2x(x)
    return jnp.transpose(x, (0, 3, 1, 2))


# ----------------------------------- main --------------------------------------

def _run_case(key, B, in_channels, out_channels, H, W, num_deconv,
              num_filters, deconv_kernels):
    k_x, k_p = jax.random.split(key)
    x = jax.random.normal(k_x, (B, in_channels, H, W), jnp.float32)      # NCHW
    params = init_decoder_params(k_p, in_channels, out_channels,
                                 num_deconv, num_filters, deconv_kernels)
    out = jax.block_until_ready(decoder_forward([x], params))
    hw_h = H * (2 ** num_deconv) * 4
    hw_w = W * (2 ** num_deconv) * 4
    assert out.shape == (B, out_channels, hw_h, hw_w), out.shape
    ref = jax.block_until_ready(decoder_forward_ref([x], params))
    err = float(jnp.max(jnp.abs(out - ref)))
    assert err < 1e-3, f"max abs err vs reference: {err}"
    return err


if __name__ == "__main__":
    key = jax.random.PRNGKey(0)
    k1, k2 = jax.random.split(key)
    # deconv kernel 4 (padding=1, output_padding=0) path
    _run_case(k1, B=2, in_channels=16, out_channels=4, H=4, W=4,
              num_deconv=2, num_filters=[8, 8], deconv_kernels=[4, 4])
    # deconv kernel 3 (padding=1, output_padding=1) and 2 (padding=0) paths
    _run_case(k2, B=1, in_channels=8, out_channels=4, H=4, W=4,
              num_deconv=2, num_filters=[8, 8], deconv_kernels=[3, 2])
    print("KERNEL_OK")
</pallas_src>

<mosaic_0001>
module attributes {stable_mosaic.version = 11 : i64} {
  func.func @_tap_conv_bn_relu_kernel(%arg0: i32, %arg1: i32, %arg2: memref<1x6x6x16xbf16, #tpu.memory_space<vmem>>, %arg3: memref<16x16x8xbf16, #tpu.memory_space<vmem>>, %arg4: memref<1x8xf32, #tpu.memory_space<vmem>>, %arg5: memref<1x8xf32, #tpu.memory_space<vmem>>, %arg6: memref<1x4x2x4x16xf32, #tpu.memory_space<vmem>>) attributes {dimension_semantics = [#tpu.dimension_semantics<parallel>, #tpu.dimension_semantics<parallel>], iteration_bounds = array<i64: 2, 1>, scalar_prefetch = 0 : i64, scratch_operands = 0 : i64, tpu.core_type = #tpu.core_type<tc>, window_params = [{transform_indices = @transform_0, window_bounds = array<i64: 1, 6, 6, 16>}, {pipeline_mode = #tpu.pipeline_mode<synchronous>, transform_indices = @transform_1, window_bounds = array<i64: 16, 16, 8>}, {pipeline_mode = #tpu.pipeline_mode<synchronous>, transform_indices = @transform_2, window_bounds = array<i64: 1, 8>}, {pipeline_mode = #tpu.pipeline_mode<synchronous>, transform_indices = @transform_3, window_bounds = array<i64: 1, 8>}, {transform_indices = @transform_4, window_bounds = array<i64: 1, 4, 2, 4, 16>}]} {
    %c4_i32 = arith.constant 4 : i32
    %0 = arith.muli %arg1, %c4_i32 : i32
    %c0 = arith.constant 0 : index
    %c0_0 = arith.constant 0 : index
    %1 = vector.load %arg4[%c0, %c0_0] : memref<1x8xf32, #tpu.memory_space<vmem>>, vector<1x8xf32>
    %c0_1 = arith.constant 0 : index
    %c0_2 = arith.constant 0 : index
    %2 = vector.load %arg5[%c0_1, %c0_2] : memref<1x8xf32, #tpu.memory_space<vmem>>, vector<1x8xf32>
    %c0_i32 = arith.constant 0 : i32
    %3 = arith.addi %0, %c0_i32 : i32
    %c0_i32_3 = arith.constant 0 : i32
    %4 = arith.addi %3, %c0_i32_3 : i32
    %c0_4 = arith.constant 0 : index
    %5 = arith.index_cast %4 : i32 to index
    %c0_5 = arith.constant 0 : index
    %c0_6 = arith.constant 0 : index
    %6 = vector.load %arg2[%c0_4, %5, %c0_5, %c0_6] : memref<1x6x6x16xbf16, #tpu.memory_space<vmem>>, vector<1x1x4x16xbf16>
    %7 = vector.shape_cast %6 : vector<1x1x4x16xbf16> to vector<1x4x16xbf16>
    %8 = vector.shape_cast %7 : vector<1x4x16xbf16> to vector<4x16xbf16>
    %c0_7 = arith.constant 0 : index
    %c0_8 = arith.constant 0 : index
    %c0_9 = arith.constant 0 : index
    %9 = vector.load %arg3[%c0_7, %c0_8, %c0_9] : memref<16x16x8xbf16, #tpu.memory_space<vmem>>, vector<1x16x8xbf16>
    %10 = vector.shape_cast %9 : vector<1x16x8xbf16> to vector<16x8xbf16>
    %cst = arith.constant dense<0.000000e+00> : vector<4x8xf32>
    %11 = tpu.matmul %8, %10, %cst {dimension_numbers = #tpu.dot_dimension_numbers<[1], [0], [0], [1], [0, 0, 1, 1], [], []>} : vector<4x16xbf16>, vector<16x8xbf16>, vector<4x8xf32> -> vector<4x8xf32>
    %c0_i32_10 = arith.constant 0 : i32
    %12 = arith.addi %0, %c0_i32_10 : i32
    %c0_i32_11 = arith.constant 0 : i32
    %13 = arith.addi %12, %c0_i32_11 : i32
    %c0_12 = arith.constant 0 : index
    %14 = arith.index_cast %13 : i32 to index
    %c1 = arith.constant 1 : index
    %c0_13 = arith.constant 0 : index
    %15 = vector.load %arg2[%c0_12, %14, %c1, %c0_13] : memref<1x6x6x16xbf16, #tpu.memory_space<vmem>>, vector<1x1x4x16xbf16>
    %16 = vector.shape_cast %15 : vector<1x1x4x16xbf16> to vector<1x4x16xbf16>
    %17 = vector.shape_cast %16 : vector<1x4x16xbf16> to vector<4x16xbf16>
    %c1_14 = arith.constant 1 : index
    %c0_15 = arith.constant 0 : index
    %c0_16 = arith.constant 0 : index
    %18 = vector.load %arg3[%c1_14, %c0_15, %c0_16] : memref<16x16x8xbf16, #tpu.memory_space<vmem>>, vector<1x16x8xbf16>
    %19 = vector.shape_cast %18 : vector<1x16x8xbf16> to vector<16x8xbf16>
    %cst_17 = arith.constant dense<0.000000e+00> : vector<4x8xf32>
    %20 = tpu.matmul %17, %19, %cst_17 {dimension_numbers = #tpu.dot_dimension_numbers<[1], [0], [0], [1], [0, 0, 1, 1], [], []>} : vector<4x16xbf16>, vector<16x8xbf16>, vector<4x8xf32> -> vector<4x8xf32>
    %21 = arith.addf %11, %20 : vector<4x8xf32>
    %c0_i32_18 = arith.constant 0 : i32
    %22 = arith.addi %0, %c0_i32_18 : i32
    %c1_i32 = arith.constant 1 : i32
    %23 = arith.addi %22, %c1_i32 : i32
    %c0_19 = arith.constant 0 : index
    %24 = arith.index_cast %23 : i32 to index
    %c0_20 = arith.constant 0 : index
    %c0_21 = arith.constant 0 : index
    %25 = vector.load %arg2[%c0_19, %24, %c0_20, %c0_21] : memref<1x6x6x16xbf16, #tpu.memory_space<vmem>>, vector<1x1x4x16xbf16>
    %26 = vector.shape_cast %25 : vector<1x1x4x16xbf16> to vector<1x4x16xbf16>
    %27 = vector.shape_cast %26 : vector<1x4x16xbf16> to vector<4x16xbf16>
    %c2 = arith.constant 2 : index
    %c0_22 = arith.constant 0 : index
    %c0_23 = arith.constant 0 : index
    %28 = vector.load %arg3[%c2, %c0_22, %c0_23] : memref<16x16x8xbf16, #tpu.memory_space<vmem>>, vector<1x16x8xbf16>
    %29 = vector.shape_cast %28 : vector<1x16x8xbf16> to vector<16x8xbf16>
    %cst_24 = arith.constant dense<0.000000e+00> : vector<4x8xf32>
    %30 = tpu.matmul %27, %29, %cst_24 {dimension_numbers = #tpu.dot_dimension_numbers<[1], [0], [0], [1], [0, 0, 1, 1], [], []>} : vector<4x16xbf16>, vector<16x8xbf16>, vector<4x8xf32> -> vector<4x8xf32>
    %31 = arith.addf %21, %30 : vector<4x8xf32>
    %c0_i32_25 = arith.constant 0 : i32
    %32 = arith.addi %0, %c0_i32_25 : i32
    %c1_i32_26 = arith.constant 1 : i32
    %33 = arith.addi %32, %c1_i32_26 : i32
    %c0_27 = arith.constant 0 : index
    %34 = arith.index_cast %33 : i32 to index
    %c1_28 = arith.constant 1 : index
    %c0_29 = arith.constant 0 : index
    %35 = vector.load %arg2[%c0_27, %34, %c1_28, %c0_29] : memref<1x6x6x16xbf16, #tpu.memory_space<vmem>>, vector<1x1x4x16xbf16>
    %36 = vector.shape_cast %35 : vector<1x1x4x16xbf16> to vector<1x4x16xbf16>
    %37 = vector.shape_cast %36 : vector<1x4x16xbf16> to vector<4x16xbf16>
    %c3 = arith.constant 3 : index
    %c0_30 = arith.constant 0 : index
    %c0_31 = arith.constant 0 : index
    %38 = vector.load %arg3[%c3, %c0_30, %c0_31] : memref<16x16x8xbf16, #tpu.memory_space<vmem>>, vector<1x16x8xbf16>
    %39 = vector.shape_cast %38 : vector<1x16x8xbf16> to vector<16x8xbf16>
    %cst_32 = arith.constant dense<0.000000e+00> : vector<4x8xf32>
    %40 = tpu.matmul %37, %39, %cst_32 {dimension_numbers = #tpu.dot_dimension_numbers<[1], [0], [0], [1], [0, 0, 1, 1], [], []>} : vector<4x16xbf16>, vector<16x8xbf16>, vector<4x8xf32> -> vector<4x8xf32>
    %41 = arith.addf %31, %40 : vector<4x8xf32>
    %42 = vector.broadcast %1 : vector<1x8xf32> to vector<4x8xf32>
    %43 = arith.mulf %41, %42 : vector<4x8xf32>
    %44 = vector.broadcast %2 : vector<1x8xf32> to vector<4x8xf32>
    %45 = arith.addf %43, %44 : vector<4x8xf32>
    %cst_33 = arith.constant 0.000000e+00 : f32
    %46 = vector.broadcast %cst_33 : f32 to vector<4x8xf32>
    %47 = arith.maximumf %45, %46 : vector<4x8xf32>
    %c0_34 = arith.constant 0 : index
    %c0_35 = arith.constant 0 : index
    %c0_36 = arith.constant 0 : index
    %c0_37 = arith.constant 0 : index
    %c0_38 = arith.constant 0 : index
    %48 = vector.load %arg6[%c0_34, %c0_35, %c0_36, %c0_37, %c0_38] : memref<1x4x2x4x16xf32, #tpu.memory_space<vmem>>, vector<1x1x1x4x8xf32>
    %49 = vector.shape_cast %48 : vector<1x1x1x4x8xf32> to vector<4x8xf32>
    %50 = vector.shape_cast %47 : vector<4x8xf32> to vector<1x1x1x4x8xf32>
    tpu.vector_store %arg6[%c0_34, %c0_35, %c0_36, %c0_37, %c0_38], %50 {strides = array<i32>} : memref<1x4x2x4x16xf32, #tpu.memory_space<vmem>>, vector<1x1x1x4x8xf32>,
    %c0_i32_39 = arith.constant 0 : i32
    %51 = arith.addi %0, %c0_i32_39 : i32
    %c0_i32_40 = arith.constant 0 : i32
    %52 = arith.addi %51, %c0_i32_40 : i32
    %c0_41 = arith.constant 0 : index
    %53 = arith.index_cast %52 : i32 to index
    %c1_42 = arith.constant 1 : index
    %c0_43 = arith.constant 0 : index
    %54 = vector.load %arg2[%c0_41, %53, %c1_42, %c0_43] : memref<1x6x6x16xbf16, #tpu.memory_space<vmem>>, vector<1x1x4x16xbf16>
    %55 = vector.shape_cast %54 : vector<1x1x4x16xbf16> to vector<1x4x16xbf16>
    %56 = vector.shape_cast %55 : vector<1x4x16xbf16> to vector<4x16xbf16>
    %c4 = arith.constant 4 : index
    %c0_44 = arith.constant 0 : index
    %c0_45 = arith.constant 0 : index
    %57 = vector.load %arg3[%c4, %c0_44, %c0_45] : memref<16x16x8xbf16, #tpu.memory_space<vmem>>, vector<1x16x8xbf16>
    %58 = vector.shape_cast %57 : vector<1x16x8xbf16> to vector<16x8xbf16>
    %cst_46 = arith.constant dense<0.000000e+00> : vector<4x8xf32>
    %59 = tpu.matmul %56, %58, %cst_46 {dimension_numbers = #tpu.dot_dimension_numbers<[1], [0], [0], [1], [0, 0, 1, 1], [], []>} : vector<4x16xbf16>, vector<16x8xbf16>, vector<4x8xf32> -> vector<4x8xf32>
    %c0_i32_47 = arith.constant 0 : i32
    %60 = arith.addi %0, %c0_i32_47 : i32
    %c0_i32_48 = arith.constant 0 : i32
    %61 = arith.addi %60, %c0_i32_48 : i32
    %c0_49 = arith.constant 0 : index
    %62 = arith.index_cast %61 : i32 to index
    %c2_50 = arith.constant 2 : index
    %c0_51 = arith.constant 0 : index
    %63 = vector.load %arg2[%c0_49, %62, %c2_50, %c0_51] : memref<1x6x6x16xbf16, #tpu.memory_space<vmem>>, vector<1x1x4x16xbf16>
    %64 = vector.shape_cast %63 : vector<1x1x4x16xbf16> to vector<1x4x16xbf16>
    %65 = vector.shape_cast %64 : vector<1x4x16xbf16> to vector<4x16xbf16>
    %c5 = arith.constant 5 : index
    %c0_52 = arith.constant 0 : index
    %c0_53 = arith.constant 0 : index
    %66 = vector.load %arg3[%c5, %c0_52, %c0_53] : memref<16x16x8xbf16, #tpu.memory_space<vmem>>, vector<1x16x8xbf16>
    %67 = vector.shape_cast %66 : vector<1x16x8xbf16> to vector<16x8xbf16>
    %cst_54 = arith.constant dense<0.000000e+00> : vector<4x8xf32>
    %68 = tpu.matmul %65, %67, %cst_54 {dimension_numbers = #tpu.dot_dimension_numbers<[1], [0], [0], [1], [0, 0, 1, 1], [], []>} : vector<4x16xbf16>, vector<16x8xbf16>, vector<4x8xf32> -> vector<4x8xf32>
    %69 = arith.addf %59, %68 : vector<4x8xf32>
    %c0_i32_55 = arith.constant 0 : i32
    %70 = arith.addi %0, %c0_i32_55 : i32
    %c1_i32_56 = arith.constant 1 : i32
    %71 = arith.addi %70, %c1_i32_56 : i32
    %c0_57 = arith.constant 0 : index
    %72 = arith.index_cast %71 : i32 to index
    %c1_58 = arith.constant 1 : index
    %c0_59 = arith.constant 0 : index
    %73 = vector.load %arg2[%c0_57, %72, %c1_58, %c0_59] : memref<1x6x6x16xbf16, #tpu.memory_space<vmem>>, vector<1x1x4x16xbf16>
    %74 = vector.shape_cast %73 : vector<1x1x4x16xbf16> to vector<1x4x16xbf16>
    %75 = vector.shape_cast %74 : vector<1x4x16xbf16> to vector<4x16xbf16>
    %c6 = arith.constant 6 : index
    %c0_60 = arith.constant 0 : index
    %c0_61 = arith.constant 0 : index
    %76 = vector.load %arg3[%c6, %c0_60, %c0_61] : memref<16x16x8xbf16, #tpu.memory_space<vmem>>, vector<1x16x8xbf16>
    %77 = vector.shape_cast %76 : vector<1x16x8xbf16> to vector<16x8xbf16>
    %cst_62 = arith.constant dense<0.000000e+00> : vector<4x8xf32>
    %78 = tpu.matmul %75, %77, %cst_62 {dimension_numbers = #tpu.dot_dimension_numbers<[1], [0], [0], [1], [0, 0, 1, 1], [], []>} : vector<4x16xbf16>, vector<16x8xbf16>, vector<4x8xf32> -> vector<4x8xf32>
    %79 = arith.addf %69, %78 : vector<4x8xf32>
    %c0_i32_63 = arith.constant 0 : i32
    %80 = arith.addi %0, %c0_i32_63 : i32
    %c1_i32_64 = arith.constant 1 : i32
    %81 = arith.addi %80, %c1_i32_64 : i32
    %c0_65 = arith.constant 0 : index
    %82 = arith.index_cast %81 : i32 to index
    %c2_66 = arith.constant 2 : index
    %c0_67 = arith.constant 0 : index
    %83 = vector.load %arg2[%c0_65, %82, %c2_66, %c0_67] : memref<1x6x6x16xbf16, #tpu.memory_space<vmem>>, vector<1x1x4x16xbf16>
    %84 = vector.shape_cast %83 : vector<1x1x4x16xbf16> to vector<1x4x16xbf16>
    %85 = vector.shape_cast %84 : vector<1x4x16xbf16> to vector<4x16xbf16>
    %c7 = arith.constant 7 : index
    %c0_68 = arith.constant 0 : index
    %c0_69 = arith.constant 0 : index
    %86 = vector.load %arg3[%c7, %c0_68, %c0_69] : memref<16x16x8xbf16, #tpu.memory_space<vmem>>, vector<1x16x8xbf16>
    %87 = vector.shape_cast %86 : vector<1x16x8xbf16> to vector<16x8xbf16>
    %cst_70 = arith.constant dense<0.000000e+00> : vector<4x8xf32>
    %88 = tpu.matmul %85, %87, %cst_70 {dimension_numbers = #tpu.dot_dimension_numbers<[1], [0], [0], [1], [0, 0, 1, 1], [], []>} : vector<4x16xbf16>, vector<16x8xbf16>, vector<4x8xf32> -> vector<4x8xf32>
    %89 = arith.addf %79, %88 : vector<4x8xf32>
    %90 = vector.broadcast %1 : vector<1x8xf32> to vector<4x8xf32>
    %91 = arith.mulf %89, %90 : vector<4x8xf32>
    %92 = vector.broadcast %2 : vector<1x8xf32> to vector<4x8xf32>
    %93 = arith.addf %91, %92 : vector<4x8xf32>
    %cst_71 = arith.constant 0.000000e+00 : f32
    %94 = vector.broadcast %cst_71 : f32 to vector<4x8xf32>
    %95 = arith.maximumf %93, %94 : vector<4x8xf32>
    %c0_72 = arith.constant 0 : index
    %c0_73 = arith.constant 0 : index
    %c0_74 = arith.constant 0 : index
    %c0_75 = arith.constant 0 : index
    %c8 = arith.constant 8 : index
    %96 = vector.load %arg6[%c0_72, %c0_73, %c0_74, %c0_75, %c8] : memref<1x4x2x4x16xf32, #tpu.memory_space<vmem>>, vector<1x1x1x4x8xf32>
    %97 = vector.shape_cast %96 : vector<1x1x1x4x8xf32> to vector<4x8xf32>
    %98 = vector.shape_cast %95 : vector<4x8xf32> to vector<1x1x1x4x8xf32>
    tpu.vector_store %arg6[%c0_72, %c0_73, %c0_74, %c0_75, %c8], %98 {strides = array<i32>} : memref<1x4x2x4x16xf32, #tpu.memory_space<vmem>>, vector<1x1x1x4x8xf32>,
    %c0_i32_76 = arith.constant 0 : i32
    %99 = arith.addi %0, %c0_i32_76 : i32
    %c1_i32_77 = arith.constant 1 : i32
    %100 = arith.addi %99, %c1_i32_77 : i32
    %c0_78 = arith.constant 0 : index
    %101 = arith.index_cast %100 : i32 to index
    %c0_79 = arith.constant 0 : index
    %c0_80 = arith.constant 0 : index
    %102 = vector.load %arg2[%c0_78, %101, %c0_79, %c0_80] : memref<1x6x6x16xbf16, #tpu.memory_space<vmem>>, vector<1x1x4x16xbf16>
    %103 = vector.shape_cast %102 : vector<1x1x4x16xbf16> to vector<1x4x16xbf16>
    %104 = vector.shape_cast %103 : vector<1x4x16xbf16> to vector<4x16xbf16>
    %c8_81 = arith.constant 8 : index
    %c0_82 = arith.constant 0 : index
    %c0_83 = arith.constant 0 : index
    %105 = vector.load %arg3[%c8_81, %c0_82, %c0_83] : memref<16x16x8xbf16, #tpu.memory_space<vmem>>, vector<1x16x8xbf16>
    %106 = vector.shape_cast %105 : vector<1x16x8xbf16> to vector<16x8xbf16>
    %cst_84 = arith.constant dense<0.000000e+00> : vector<4x8xf32>
    %107 = tpu.matmul %104, %106, %cst_84 {dimension_numbers = #tpu.dot_dimension_numbers<[1], [0], [0], [1], [0, 0, 1, 1], [], []>} : vector<4x16xbf16>, vector<16x8xbf16>, vector<4x8xf32> -> vector<4x8xf32>
    %c0_i32_85 = arith.constant 0 : i32
    %108 = arith.addi %0, %c0_i32_85 : i32
    %c1_i32_86 = arith.constant 1 : i32
    %109 = arith.addi %108, %c1_i32_86 : i32
    %c0_87 = arith.constant 0 : index
    %110 = arith.index_cast %109 : i32 to index
    %c1_88 = arith.constant 1 : index
    %c0_89 = arith.constant 0 : index
    %111 = vector.load %arg2[%c0_87, %110, %c1_88, %c0_89] : memref<1x6x6x16xbf16, #tpu.memory_space<vmem>>, vector<1x1x4x16xbf16>
    %112 = vector.shape_cast %111 : vector<1x1x4x16xbf16> to vector<1x4x16xbf16>
    %113 = vector.shape_cast %112 : vector<1x4x16xbf16> to vector<4x16xbf16>
    %c9 = arith.constant 9 : index
    %c0_90 = arith.constant 0 : index
    %c0_91 = arith.constant 0 : index
    %114 = vector.load %arg3[%c9, %c0_90, %c0_91] : memref<16x16x8xbf16, #tpu.memory_space<vmem>>, vector<1x16x8xbf16>
    %115 = vector.shape_cast %114 : vector<1x16x8xbf16> to vector<16x8xbf16>
    %cst_92 = arith.constant dense<0.000000e+00> : vector<4x8xf32>
    %116 = tpu.matmul %113, %115, %cst_92 {dimension_numbers = #tpu.dot_dimension_numbers<[1], [0], [0], [1], [0, 0, 1, 1], [], []>} : vector<4x16xbf16>, vector<16x8xbf16>, vector<4x8xf32> -> vector<4x8xf32>
    %117 = arith.addf %107, %116 : vector<4x8xf32>
    %c0_i32_93 = arith.constant 0 : i32
    %118 = arith.addi %0, %c0_i32_93 : i32
    %c2_i32 = arith.constant 2 : i32
    %119 = arith.addi %118, %c2_i32 : i32
    %c0_94 = arith.constant 0 : index
    %120 = arith.index_cast %119 : i32 to index
    %c0_95 = arith.constant 0 : index
    %c0_96 = arith.constant 0 : index
    %121 = vector.load %arg2[%c0_94, %120, %c0_95, %c0_96] : memref<1x6x6x16xbf16, #tpu.memory_space<vmem>>, vector<1x1x4x16xbf16>
    %122 = vector.shape_cast %121 : vector<1x1x4x16xbf16> to vector<1x4x16xbf16>
    %123 = vector.shape_cast %122 : vector<1x4x16xbf16> to vector<4x16xbf16>
    %c10 = arith.constant 10 : index
    %c0_97 = arith.constant 0 : index
    %c0_98 = arith.constant 0 : index
    %124 = vector.load %arg3[%c10, %c0_97, %c0_98] : memref<16x16x8xbf16, #tpu.memory_space<vmem>>, vector<1x16x8xbf16>
    %125 = vector.shape_cast %124 : vector<1x16x8xbf16> to vector<16x8xbf16>
    %cst_99 = arith.constant dense<0.000000e+00> : vector<4x8xf32>
    %126 = tpu.matmul %123, %125, %cst_99 {dimension_numbers = #tpu.dot_dimension_numbers<[1], [0], [0], [1], [0, 0, 1, 1], [], []>} : vector<4x16xbf16>, vector<16x8xbf16>, vector<4x8xf32> -> vector<4x8xf32>
    %127 = arith.addf %117, %126 : vector<4x8xf32>
    %c0_i32_100 = arith.constant 0 : i32
    %128 = arith.addi %0, %c0_i32_100 : i32
    %c2_i32_101 = arith.constant 2 : i32
    %129 = arith.addi %128, %c2_i32_101 : i32
    %c0_102 = arith.constant 0 : index
    %130 = arith.index_cast %129 : i32 to index
    %c1_103 = arith.constant 1 : index
    %c0_104 = arith.constant 0 : index
    %131 = vector.load %arg2[%c0_102, %130, %c1_103, %c0_104] : memref<1x6x6x16xbf16, #tpu.memory_space<vmem>>, vector<1x1x4x16xbf16>
    %132 = vector.shape_cast %131 : vector<1x1x4x16xbf16> to vector<1x4x16xbf16>
    %133 = vector.shape_cast %132 : vector<1x4x16xbf16> to vector<4x16xbf16>
    %c11 = arith.constant 11 : index
    %c0_105 = arith.constant 0 : index
    %c0_106 = arith.constant 0 : index
    %134 = vector.load %arg3[%c11, %c0_105, %c0_106] : memref<16x16x8xbf16, #tpu.memory_space<vmem>>, vector<1x16x8xbf16>
    %135 = vector.shape_cast %134 : vector<1x16x8xbf16> to vector<16x8xbf16>
    %cst_107 = arith.constant dense<0.000000e+00> : vector<4x8xf32>
    %136 = tpu.matmul %133, %135, %cst_107 {dimension_numbers = #tpu.dot_dimension_numbers<[1], [0], [0], [1], [0, 0, 1, 1], [], []>} : vector<4x16xbf16>, vector<16x8xbf16>, vector<4x8xf32> -> vector<4x8xf32>
    %137 = arith.addf %127, %136 : vector<4x8xf32>
    %138 = vector.broadcast %1 : vector<1x8xf32> to vector<4x8xf32>
    %139 = arith.mulf %137, %138 : vector<4x8xf32>
    %140 = vector.broadcast %2 : vector<1x8xf32> to vector<4x8xf32>
    %141 = arith.addf %139, %140 : vector<4x8xf32>
    %cst_108 = arith.constant 0.000000e+00 : f32
    %142 = vector.broadcast %cst_108 : f32 to vector<4x8xf32>
    %143 = arith.maximumf %141, %142 : vector<4x8xf32>
    %c0_109 = arith.constant 0 : index
    %c0_110 = arith.constant 0 : index
    %c1_111 = arith.constant 1 : index
    %c0_112 = arith.constant 0 : index
    %c0_113 = arith.constant 0 : index
    %144 = vector.load %arg6[%c0_109, %c0_110, %c1_111, %c0_112, %c0_113] : memref<1x4x2x4x16xf32, #tpu.memory_space<vmem>>, vector<1x1x1x4x8xf32>
    %145 = vector.shape_cast %144 : vector<1x1x1x4x8xf32> to vector<4x8xf32>
    %146 = vector.shape_cast %143 : vector<4x8xf32> to vector<1x1x1x4x8xf32>
    tpu.vector_store %arg6[%c0_109, %c0_110, %c1_111, %c0_112, %c0_113], %146 {strides = array<i32>} : memref<1x4x2x4x16xf32, #tpu.memory_space<vmem>>, vector<1x1x1x4x8xf32>,
    %c0_i32_114 = arith.constant 0 : i32
    %147 = arith.addi %0, %c0_i32_114 : i32
    %c1_i32_115 = arith.constant 1 : i32
    %148 = arith.addi %147, %c1_i32_115 : i32
    %c0_116 = arith.constant 0 : index
    %149 = arith.index_cast %148 : i32 to index
    %c1_117 = arith.constant 1 : index
    %c0_118 = arith.constant 0 : index
    %150 = vector.load %arg2[%c0_116, %149, %c1_117, %c0_118] : memref<1x6x6x16xbf16, #tpu.memory_space<vmem>>, vector<1x1x4x16xbf16>
    %151 = vector.shape_cast %150 : vector<1x1x4x16xbf16> to vector<1x4x16xbf16>
    %152 = vector.shape_cast %151 : vector<1x4x16xbf16> to vector<4x16xbf16>
    %c12 = arith.constant 12 : index
    %c0_119 = arith.constant 0 : index
    %c0_120 = arith.constant 0 : index
    %153 = vector.load %arg3[%c12, %c0_119, %c0_120] : memref<16x16x8xbf16, #tpu.memory_space<vmem>>, vector<1x16x8xbf16>
    %154 = vector.shape_cast %153 : vector<1x16x8xbf16> to vector<16x8xbf16>
    %cst_121 = arith.constant dense<0.000000e+00> : vector<4x8xf32>
    %155 = tpu.matmul %152, %154, %cst_121 {dimension_numbers = #tpu.dot_dimension_numbers<[1], [0], [0], [1], [0, 0, 1, 1], [], []>} : vector<4x16xbf16>, vector<16x8xbf16>, vector<4x8xf32> -> vector<4x8xf32>
    %c0_i32_122 = arith.constant 0 : i32
    %156 = arith.addi %0, %c0_i32_122 : i32
    %c1_i32_123 = arith.constant 1 : i32
    %157 = arith.addi %156, %c1_i32_123 : i32
    %c0_124 = arith.constant 0 : index
    %158 = arith.index_cast %157 : i32 to index
    %c2_125 = arith.constant 2 : index
    %c0_126 = arith.constant 0 : index
    %159 = vector.load %arg2[%c0_124, %158, %c2_125, %c0_126] : memref<1x6x6x16xbf16, #tpu.memory_space<vmem>>, vector<1x1x4x16xbf16>
    %160 = vector.shape_cast %159 : vector<1x1x4x16xbf16> to vector<1x4x16xbf16>
    %161 = vector.shape_cast %160 : vector<1x4x16xbf16> to vector<4x16xbf16>
    %c13 = arith.constant 13 : index
    %c0_127 = arith.constant 0 : index
    %c0_128 = arith.constant 0 : index
    %162 = vector.load %arg3[%c13, %c0_127, %c0_128] : memref<16x16x8xbf16, #tpu.memory_space<vmem>>, vector<1x16x8xbf16>
    %163 = vector.shape_cast %162 : vector<1x16x8xbf16> to vector<16x8xbf16>
    %cst_129 = arith.constant dense<0.000000e+00> : vector<4x8xf32>
    %164 = tpu.matmul %161, %163, %cst_129 {dimension_numbers = #tpu.dot_dimension_numbers<[1], [0], [0], [1], [0, 0, 1, 1], [], []>} : vector<4x16xbf16>, vector<16x8xbf16>, vector<4x8xf32> -> vector<4x8xf32>
    %165 = arith.addf %155, %164 : vector<4x8xf32>
    %c0_i32_130 = arith.constant 0 : i32
    %166 = arith.addi %0, %c0_i32_130 : i32
    %c2_i32_131 = arith.constant 2 : i32
    %167 = arith.addi %166, %c2_i32_131 : i32
    %c0_132 = arith.constant 0 : index
    %168 = arith.index_cast %167 : i32 to index
    %c1_133 = arith.constant 1 : index
    %c0_134 = arith.constant 0 : index
    %169 = vector.load %arg2[%c0_132, %168, %c1_133, %c0_134] : memref<1x6x6x16xbf16, #tpu.memory_space<vmem>>, vector<1x1x4x16xbf16>
    %170 = vector.shape_cast %169 : vector<1x1x4x16xbf16> to vector<1x4x16xbf16>
    %171 = vector.shape_cast %170 : vector<1x4x16xbf16> to vector<4x16xbf16>
    %c14 = arith.constant 14 : index
    %c0_135 = arith.constant 0 : index
    %c0_136 = arith.constant 0 : index
    %172 = vector.load %arg3[%c14, %c0_135, %c0_136] : memref<16x16x8xbf16, #tpu.memory_space<vmem>>, vector<1x16x8xbf16>
    %173 = vector.shape_cast %172 : vector<1x16x8xbf16> to vector<16x8xbf16>
    %cst_137 = arith.constant dense<0.000000e+00> : vector<4x8xf32>
    %174 = tpu.matmul %171, %173, %cst_137 {dimension_numbers = #tpu.dot_dimension_numbers<[1], [0], [0], [1], [0, 0, 1, 1], [], []>} : vector<4x16xbf16>, vector<16x8xbf16>, vector<4x8xf32> -> vector<4x8xf32>
    %175 = arith.addf %165, %174 : vector<4x8xf32>
    %c0_i32_138 = arith.constant 0 : i32
    %176 = arith.addi %0, %c0_i32_138 : i32
    %c2_i32_139 = arith.constant 2 : i32
    %177 = arith.addi %176, %c2_i32_139 : i32
    %c0_140 = arith.constant 0 : index
    %178 = arith.index_cast %177 : i32 to index
    %c2_141 = arith.constant 2 : index
    %c0_142 = arith.constant 0 : index
    %179 = vector.load %arg2[%c0_140, %178, %c2_141, %c0_142] : memref<1x6x6x16xbf16, #tpu.memory_space<vmem>>, vector<1x1x4x16xbf16>
    %180 = vector.shape_cast %179 : vector<1x1x4x16xbf16> to vector<1x4x16xbf16>
    %181 = vector.shape_cast %180 : vector<1x4x16xbf16> to vector<4x16xbf16>
    %c15 = arith.constant 15 : index
    %c0_143 = arith.constant 0 : index
    %c0_144 = arith.constant 0 : index
    %182 = vector.load %arg3[%c15, %c0_143, %c0_144] : memref<16x16x8xbf16, #tpu.memory_space<vmem>>, vector<1x16x8xbf16>
    %183 = vector.shape_cast %182 : vector<1x16x8xbf16> to vector<16x8xbf16>
    %cst_145 = arith.constant dense<0.000000e+00> : vector<4x8xf32>
    %184 = tpu.matmul %181, %183, %cst_145 {dimension_numbers = #tpu.dot_dimension_numbers<[1], [0], [0], [1], [0, 0, 1, 1], [], []>} : vector<4x16xbf16>, vector<16x8xbf16>, vector<4x8xf32> -> vector<4x8xf32>
    %185 = arith.addf %175, %184 : vector<4x8xf32>
    %186 = vector.broadcast %1 : vector<1x8xf32> to vector<4x8xf32>
    %187 = arith.mulf %185, %186 : vector<4x8xf32>
    %188 = vector.broadcast %2 : vector<1x8xf32> to vector<4x8xf32>
    %189 = arith.addf %187, %188 : vector<4x8xf32>
    %cst_146 = arith.constant 0.000000e+00 : f32
    %190 = vector.broadcast %cst_146 : f32 to vector<4x8xf32>
    %191 = arith.maximumf %189, %190 : vector<4x8xf32>
    %c0_147 = arith.constant 0 : index
    %c0_148 = arith.constant 0 : index
    %c1_149 = arith.constant 1 : index
    %c0_150 = arith.constant 0 : index
    %c8_151 = arith.constant 8 : index
    %192 = vector.load %arg6[%c0_147, %c0_148, %c1_149, %c0_150, %c8_151] : memref<1x4x2x4x16xf32, #tpu.memory_space<vmem>>, vector<1x1x1x4x8xf32>
    %193 = vector.shape_cast %192 : vector<1x1x1x4x8xf32> to vector<4x8xf32>
    %194 = vector.shape_cast %191 : vector<4x8xf32> to vector<1x1x1x4x8xf32>
    tpu.vector_store %arg6[%c0_147, %c0_148, %c1_149, %c0_150, %c8_151], %194 {strides = array<i32>} : memref<1x4x2x4x16xf32, #tpu.memory_space<vmem>>, vector<1x1x1x4x8xf32>,
    %c1_i32_152 = arith.constant 1 : i32
    %195 = arith.addi %0, %c1_i32_152 : i32
    %c0_i32_153 = arith.constant 0 : i32
    %196 = arith.addi %195, %c0_i32_153 : i32
    %c0_154 = arith.constant 0 : index
    %197 = arith.index_cast %196 : i32 to index
    %c0_155 = arith.constant 0 : index
    %c0_156 = arith.constant 0 : index
    %198 = vector.load %arg2[%c0_154, %197, %c0_155, %c0_156] : memref<1x6x6x16xbf16, #tpu.memory_space<vmem>>, vector<1x1x4x16xbf16>
    %199 = vector.shape_cast %198 : vector<1x1x4x16xbf16> to vector<1x4x16xbf16>
    %200 = vector.shape_cast %199 : vector<1x4x16xbf16> to vector<4x16xbf16>
    %c0_157 = arith.constant 0 : index
    %c0_158 = arith.constant 0 : index
    %c0_159 = arith.constant 0 : index
    %201 = vector.load %arg3[%c0_157, %c0_158, %c0_159] : memref<16x16x8xbf16, #tpu.memory_space<vmem>>, vector<1x16x8xbf16>
    %202 = vector.shape_cast %201 : vector<1x16x8xbf16> to vector<16x8xbf16>
    %cst_160 = arith.constant dense<0.000000e+00> : vector<4x8xf32>
    %203 = tpu.matmul %200, %202, %cst_160 {dimension_numbers = #tpu.dot_dimension_numbers<[1], [0], [0], [1], [0, 0, 1, 1], [], []>} : vector<4x16xbf16>, vector<16x8xbf16>, vector<4x8xf32> -> vector<4x8xf32>
    %c1_i32_161 = arith.constant 1 : i32
    %204 = arith.addi %0, %c1_i32_161 : i32
    %c0_i32_162 = arith.constant 0 : i32
    %205 = arith.addi %204, %c0_i32_162 : i32
    %c0_163 = arith.constant 0 : index
    %206 = arith.index_cast %205 : i32 to index
    %c1_164 = arith.constant 1 : index
    %c0_165 = arith.constant 0 : index
    %207 = vector.load %arg2[%c0_163, %206, %c1_164, %c0_165] : memref<1x6x6x16xbf16, #tpu.memory_space<vmem>>, vector<1x1x4x16xbf16>
    %208 = vector.shape_cast %207 : vector<1x1x4x16xbf16> to vector<1x4x16xbf16>
    %209 = vector.shape_cast %208 : vector<1x4x16xbf16> to vector<4x16xbf16>
    %c1_166 = arith.constant 1 : index
    %c0_167 = arith.constant 0 : index
    %c0_168 = arith.constant 0 : index
    %210 = vector.load %arg3[%c1_166, %c0_167, %c0_168] : memref<16x16x8xbf16, #tpu.memory_space<vmem>>, vector<1x16x8xbf16>
    %211 = vector.shape_cast %210 : vector<1x16x8xbf16> to vector<16x8xbf16>
    %cst_169 = arith.constant dense<0.000000e+00> : vector<4x8xf32>
    %212 = tpu.matmul %209, %211, %cst_169 {dimension_numbers = #tpu.dot_dimension_numbers<[1], [0], [0], [1], [0, 0, 1, 1], [], []>} : vector<4x16xbf16>, vector<16x8xbf16>, vector<4x8xf32> -> vector<4x8xf32>
    %213 = arith.addf %203, %212 : vector<4x8xf32>
    %c1_i32_170 = arith.constant 1 : i32
    %214 = arith.addi %0, %c1_i32_170 : i32
    %c1_i32_171 = arith.constant 1 : i32
    %215 = arith.addi %214, %c1_i32_171 : i32
    %c0_172 = arith.constant 0 : index
    %216 = arith.index_cast %215 : i32 to index
    %c0_173 = arith.constant 0 : index
    %c0_174 = arith.constant 0 : index
    %217 = vector.load %arg2[%c0_172, %216, %c0_173, %c0_174] : memref<1x6x6x16xbf16, #tpu.memory_space<vmem>>, vector<1x1x4x16xbf16>
    %218 = vector.shape_cast %217 : vector<1x1x4x16xbf16> to vector<1x4x16xbf16>
    %219 = vector.shape_cast %218 : vector<1x4x16xbf16> to vector<4x16xbf16>
    %c2_175 = arith.constant 2 : index
    %c0_176 = arith.constant 0 : index
    %c0_177 = arith.constant 0 : index
    %220 = vector.load %arg3[%c2_175, %c0_176, %c0_177] : memref<16x16x8xbf16, #tpu.memory_space<vmem>>, vector<1x16x8xbf16>
    %221 = vector.shape_cast %220 : vector<1x16x8xbf16> to vector<16x8xbf16>
    %cst_178 = arith.constant dense<0.000000e+00> : vector<4x8xf32>
    %222 = tpu.matmul %219, %221, %cst_178 {dimension_numbers = #tpu.dot_dimension_numbers<[1], [0], [0], [1], [0, 0, 1, 1], [], []>} : vector<4x16xbf16>, vector<16x8xbf16>, vector<4x8xf32> -> vector<4x8xf32>
    %223 = arith.addf %213, %222 : vector<4x8xf32>
    %c1_i32_179 = arith.constant 1 : i32
    %224 = arith.addi %0, %c1_i32_179 : i32
    %c1_i32_180 = arith.constant 1 : i32
    %225 = arith.addi %224, %c1_i32_180 : i32
    %c0_181 = arith.constant 0 : index
    %226 = arith.index_cast %225 : i32 to index
    %c1_182 = arith.constant 1 : index
    %c0_183 = arith.constant 0 : index
    %227 = vector.load %arg2[%c0_181, %226, %c1_182, %c0_183] : memref<1x6x6x16xbf16, #tpu.memory_space<vmem>>, vector<1x1x4x16xbf16>
    %228 = vector.shape_cast %227 : vector<1x1x4x16xbf16> to vector<1x4x16xbf16>
    %229 = vector.shape_cast %228 : vector<1x4x16xbf16> to vector<4x16xbf16>
    %c3_184 = arith.constant 3 : index
    %c0_185 = arith.constant 0 : index
    %c0_186 = arith.constant 0 : index
    %230 = vector.load %arg3[%c3_184, %c0_185, %c0_186] : memref<16x16x8xbf16, #tpu.memory_space<vmem>>, vector<1x16x8xbf16>
    %231 = vector.shape_cast %230 : vector<1x16x8xbf16> to vector<16x8xbf16>
    %cst_187 = arith.constant dense<0.000000e+00> : vector<4x8xf32>
    %232 = tpu.matmul %229, %231, %cst_187 {dimension_numbers = #tpu.dot_dimension_numbers<[1], [0], [0], [1], [0, 0, 1, 1], [], []>} : vector<4x16xbf16>, vector<16x8xbf16>, vector<4x8xf32> -> vector<4x8xf32>
    %233 = arith.addf %223, %232 : vector<4x8xf32>
    %234 = vector.broadcast %1 : vector<1x8xf32> to vector<4x8xf32>
    %235 = arith.mulf %233, %234 : vector<4x8xf32>
    %236 = vector.broadcast %2 : vector<1x8xf32> to vector<4x8xf32>
    %237 = arith.addf %235, %236 : vector<4x8xf32>
    %cst_188 = arith.constant 0.000000e+00 : f32
    %238 = vector.broadcast %cst_188 : f32 to vector<4x8xf32>
    %239 = arith.maximumf %237, %238 : vector<4x8xf32>
    %c0_189 = arith.constant 0 : index
    %c1_190 = arith.constant 1 : index
    %c0_191 = arith.constant 0 : index
    %c0_192 = arith.constant 0 : index
    %c0_193 = arith.constant 0 : index
    %240 = vector.load %arg6[%c0_189, %c1_190, %c0_191, %c0_192, %c0_193] : memref<1x4x2x4x16xf32, #tpu.memory_space<vmem>>, vector<1x1x1x4x8xf32>
    %241 = vector.shape_cast %240 : vector<1x1x1x4x8xf32> to vector<4x8xf32>
    %242 = vector.shape_cast %239 : vector<4x8xf32> to vector<1x1x1x4x8xf32>
    tpu.vector_store %arg6[%c0_189, %c1_190, %c0_191, %c0_192, %c0_193], %242 {strides = array<i32>} : memref<1x4x2x4x16xf32, #tpu.memory_space<vmem>>, vector<1x1x1x4x8xf32>,
    %c1_i32_194 = arith.constant 1 : i32
    %243 = arith.addi %0, %c1_i32_194 : i32
    %c0_i32_195 = arith.constant 0 : i32
    %244 = arith.addi %243, %c0_i32_195 : i32
    %c0_196 = arith.constant 0 : index
    %245 = arith.index_cast %244 : i32 to index
    %c1_197 = arith.constant 1 : index
    %c0_198 = arith.constant 0 : index
    %246 = vector.load %arg2[%c0_196, %245, %c1_197, %c0_198] : memref<1x6x6x16xbf16, #tpu.memory_space<vmem>>, vector<1x1x4x16xbf16>
    %247 = vector.shape_cast %246 : vector<1x1x4x16xbf16> to vector<1x4x16xbf16>
    %248 = vector.shape_cast %247 : vector<1x4x16xbf16> to vector<4x16xbf16>
    %c4_199 = arith.constant 4 : index
    %c0_200 = arith.constant 0 : index
    %c0_201 = arith.constant 0 : index
    %249 = vector.load %arg3[%c4_199, %c0_200, %c0_201] : memref<16x16x8xbf16, #tpu.memory_space<vmem>>, vector<1x16x8xbf16>
    %250 = vector.shape_cast %249 : vector<1x16x8xbf16> to vector<16x8xbf16>
    %cst_202 = arith.constant dense<0.000000e+00> : vector<4x8xf32>
    %251 = tpu.matmul %248, %250, %cst_202 {dimension_numbers = #tpu.dot_dimension_numbers<[1], [0], [0], [1], [0, 0, 1, 1], [], []>} : vector<4x16xbf16>, vector<16x8xbf16>, vector<4x8xf32> -> vector<4x8xf32>
    %c1_i32_203 = arith.constant 1 : i32
    %252 = arith.addi %0, %c1_i32_203 : i32
    %c0_i32_204 = arith.constant 0 : i32
    %253 = arith.addi %252, %c0_i32_204 : i32
    %c0_205 = arith.constant 0 : index
    %254 = arith.index_cast %253 : i32 to index
    %c2_206 = arith.constant 2 : index
    %c0_207 = arith.constant 0 : index
    %255 = vector.load %arg2[%c0_205, %254, %c2_206, %c0_207] : memref<1x6x6x16xbf16, #tpu.memory_space<vmem>>, vector<1x1x4x16xbf16>
    %256 = vector.shape_cast %255 : vector<1x1x4x16xbf16> to vector<1x4x16xbf16>
    %257 = vector.shape_cast %256 : vector<1x4x16xbf16> to vector<4x16xbf16>
    %c5_208 = arith.constant 5 : index
    %c0_209 = arith.constant 0 : index
    %c0_210 = arith.constant 0 : index
    %258 = vector.load %arg3[%c5_208, %c0_209, %c0_210] : memref<16x16x8xbf16, #tpu.memory_space<vmem>>, vector<1x16x8xbf16>
    %259 = vector.shape_cast %258 : vector<1x16x8xbf16> to vector<16x8xbf16>
    %cst_211 = arith.constant dense<0.000000e+00> : vector<4x8xf32>
    %260 = tpu.matmul %257, %259, %cst_211 {dimension_numbers = #tpu.dot_dimension_numbers<[1], [0], [0], [1], [0, 0, 1, 1], [], []>} : vector<4x16xbf16>, vector<16x8xbf16>, vector<4x8xf32> -> vector<4x8xf32>
    %261 = arith.addf %251, %260 : vector<4x8xf32>
    %c1_i32_212 = arith.constant 1 : i32
    %262 = arith.addi %0, %c1_i32_212 : i32
    %c1_i32_213 = arith.constant 1 : i32
    %263 = arith.addi %262, %c1_i32_213 : i32
    %c0_214 = arith.constant 0 : index
    %264 = arith.index_cast %263 : i32 to index
    %c1_215 = arith.constant 1 : index
    %c0_216 = arith.constant 0 : index
    %265 = vector.load %arg2[%c0_214, %264, %c1_215, %c0_216] : memref<1x6x6x16xbf16, #tpu.memory_space<vmem>>, vector<1x1x4x16xbf16>
    %266 = vector.shape_cast %265 : vector<1x1x4x16xbf16> to vector<1x4x16xbf16>
    %267 = vector.shape_cast %266 : vector<1x4x16xbf16> to vector<4x16xbf16>
    %c6_217 = arith.constant 6 : index
    %c0_218 = arith.constant 0 : index
    %c0_219 = arith.constant 0 : index
    %268 = vector.load %arg3[%c6_217, %c0_218, %c0_219] : memref<16x16x8xbf16, #tpu.memory_space<vmem>>, vector<1x16x8xbf16>
    %269 = vector.shape_cast %268 : vector<1x16x8xbf16> to vector<16x8xbf16>
    %cst_220 = arith.constant dense<0.000000e+00> : vector<4x8xf32>
    %270 = tpu.matmul %267, %269, %cst_220 {dimension_numbers = #tpu.dot_dimension_numbers<[1], [0], [0], [1], [0, 0, 1, 1], [], []>} : vector<4x16xbf16>, vector<16x8xbf16>, vector<4x8xf32> -> vector<4x8xf32>
    %271 = arith.addf %261, %270 : vector<4x8xf32>
    %c1_i32_221 = arith.constant 1 : i32
    %272 = arith.addi %0, %c1_i32_221 : i32
    %c1_i32_222 = arith.constant 1 : i32
    %273 = arith.addi %272, %c1_i32_222 : i32
    %c0_223 = arith.constant 0 : index
    %274 = arith.index_cast %273 : i32 to index
    %c2_224 = arith.constant 2 : index
    %c0_225 = arith.constant 0 : index
    %275 = vector.load %arg2[%c0_223, %274, %c2_224, %c0_225] : memref<1x6x6x16xbf16, #tpu.memory_space<vmem>>, vector<1x1x4x16xbf16>
    %276 = vector.shape_cast %275 : vector<1x1x4x16xbf16> to vector<1x4x16xbf16>
    %277 = vector.shape_cast %276 : vector<1x4x16xbf16> to vector<4x16xbf16>
    %c7_226 = arith.constant 7 : index
    %c0_227 = arith.constant 0 : index
    %c0_228 = arith.constant 0 : index
    %278 = vector.load %arg3[%c7_226, %c0_227, %c0_228] : memref<16x16x8xbf16, #tpu.memory_space<vmem>>, vector<1x16x8xbf16>
    %279 = vector.shape_cast %278 : vector<1x16x8xbf16> to vector<16x8xbf16>
    %cst_229 = arith.constant dense<0.000000e+00> : vector<4x8xf32>
    %280 = tpu.matmul %277, %279, %cst_229 {dimension_numbers = #tpu.dot_dimension_numbers<[1], [0], [0], [1], [0, 0, 1, 1], [], []>} : vector<4x16xbf16>, vector<16x8xbf16>, vector<4x8xf32> -> vector<4x8xf32>
    %281 = arith.addf %271, %280 : vector<4x8xf32>
    %282 = vector.broadcast %1 : vector<1x8xf32> to vector<4x8xf32>
    %283 = arith.mulf %281, %282 : vector<4x8xf32>
    %284 = vector.broadcast %2 : vector<1x8xf32> to vector<4x8xf32>
    %285 = arith.addf %283, %284 : vector<4x8xf32>
    %cst_230 = arith.constant 0.000000e+00 : f32
    %286 = vector.broadcast %cst_230 : f32 to vector<4x8xf32>
    %287 = arith.maximumf %285, %286 : vector<4x8xf32>
    %c0_231 = arith.constant 0 : index
    %c1_232 = arith.constant 1 : index
    %c0_233 = arith.constant 0 : index
    %c0_234 = arith.constant 0 : index
    %c8_235 = arith.constant 8 : index
    %288 = vector.load %arg6[%c0_231, %c1_232, %c0_233, %c0_234, %c8_235] : memref<1x4x2x4x16xf32, #tpu.memory_space<vmem>>, vector<1x1x1x4x8xf32>
    %289 = vector.shape_cast %288 : vector<1x1x1x4x8xf32> to vector<4x8xf32>
    %290 = vector.shape_cast %287 : vector<4x8xf32> to vector<1x1x1x4x8xf32>
    tpu.vector_store %arg6[%c0_231, %c1_232, %c0_233, %c0_234, %c8_235], %290 {strides = array<i32>} : memref<1x4x2x4x16xf32, #tpu.memory_space<vmem>>, vector<1x1x1x4x8xf32>,
    %c1_i32_236 = arith.constant 1 : i32
    %291 = arith.addi %0, %c1_i32_236 : i32
    %c1_i32_237 = arith.constant 1 : i32
    %292 = arith.addi %291, %c1_i32_237 : i32
    %c0_238 = arith.constant 0 : index
    %293 = arith.index_cast %292 : i32 to index
    %c0_239 = arith.constant 0 : index
    %c0_240 = arith.constant 0 : index
    %294 = vector.load %arg2[%c0_238, %293, %c0_239, %c0_240] : memref<1x6x6x16xbf16, #tpu.memory_space<vmem>>, vector<1x1x4x16xbf16>
    %295 = vector.shape_cast %294 : vector<1x1x4x16xbf16> to vector<1x4x16xbf16>
    %296 = vector.shape_cast %295 : vector<1x4x16xbf16> to vector<4x16xbf16>
    %c8_241 = arith.constant 8 : index
    %c0_242 = arith.constant 0 : index
    %c0_243 = arith.constant 0 : index
    %297 = vector.load %arg3[%c8_241, %c0_242, %c0_243] : memref<16x16x8xbf16, #tpu.memory_space<vmem>>, vector<1x16x8xbf16>
    %298 = vector.shape_cast %297 : vector<1x16x8xbf16> to vector<16x8xbf16>
    %cst_244 = arith.constant dense<0.000000e+00> : vector<4x8xf32>
    %299 = tpu.matmul %296, %298, %cst_244 {dimension_numbers = #tpu.dot_dimension_numbers<[1], [0], [0], [1], [0, 0, 1, 1], [], []>} : vector<4x16xbf16>, vector<16x8xbf16>, vector<4x8xf32> -> vector<4x8xf32>
    %c1_i32_245 = arith.constant 1 : i32
    %300 = arith.addi %0, %c1_i32_245 : i32
    %c1_i32_246 = arith.constant 1 : i32
    %301 = arith.addi %300, %c1_i32_246 : i32
    %c0_247 = arith.constant 0 : index
    %302 = arith.index_cast %301 : i32 to index
    %c1_248 = arith.constant 1 : index
    %c0_249 = arith.constant 0 : index
    %303 = vector.load %arg2[%c0_247, %302, %c1_248, %c0_249] : memref<1x6x6x16xbf16, #tpu.memory_space<vmem>>, vector<1x1x4x16xbf16>
    %304 = vector.shape_cast %303 : vector<1x1x4x16xbf16> to vector<1x4x16xbf16>
    %305 = vector.shape_cast %304 : vector<1x4x16xbf16> to vector<4x16xbf16>
    %c9_250 = arith.constant 9 : index
    %c0_251 = arith.constant 0 : index
    %c0_252 = arith.constant 0 : index
    %306 = vector.load %arg3[%c9_250, %c0_251, %c0_252] : memref<16x16x8xbf16, #tpu.memory_space<vmem>>, vector<1x16x8xbf16>
    %307 = vector.shape_cast %306 : vector<1x16x8xbf16> to vector<16x8xbf16>
    %cst_253 = arith.constant dense<0.000000e+00> : vector<4x8xf32>
    %308 = tpu.matmul %305, %307, %cst_253 {dimension_numbers = #tpu.dot_dimension_numbers<[1], [0], [0], [1], [0, 0, 1, 1], [], []>} : vector<4x16xbf16>, vector<16x8xbf16>, vector<4x8xf32> -> vector<4x8xf32>
    %309 = arith.addf %299, %308 : vector<4x8xf32>
    %c1_i32_254 = arith.constant 1 : i32
    %310 = arith.addi %0, %c1_i32_254 : i32
    %c2_i32_255 = arith.constant 2 : i32
    %311 = arith.addi %310, %c2_i32_255 : i32
    %c0_256 = arith.constant 0 : index
    %312 = arith.index_cast %311 : i32 to index
    %c0_257 = arith.constant 0 : index
    %c0_258 = arith.constant 0 : index
    %313 = vector.load %arg2[%c0_256, %312, %c0_257, %c0_258] : memref<1x6x6x16xbf16, #tpu.memory_space<vmem>>, vector<1x1x4x16xbf16>
    %314 = vector.shape_cast %313 : vector<1x1x4x16xbf16> to vector<1x4x16xbf16>
    %315 = vector.shape_cast %314 : vector<1x4x16xbf16> to vector<4x16xbf16>
    %c10_259 = arith.constant 10 : index
    %c0_260 = arith.constant 0 : index
    %c0_261 = arith.constant 0 : index
    %316 = vector.load %arg3[%c10_259, %c0_260, %c0_261] : memref<16x16x8xbf16, #tpu.memory_space<vmem>>, vector<1x16x8xbf16>
    %317 = vector.shape_cast %316 : vector<1x16x8xbf16> to vector<16x8xbf16>
    %cst_262 = arith.constant dense<0.000000e+00> : vector<4x8xf32>
    %318 = tpu.matmul %315, %317, %cst_262 {dimension_numbers = #tpu.dot_dimension_numbers<[1], [0], [0], [1], [0, 0, 1, 1], [], []>} : vector<4x16xbf16>, vector<16x8xbf16>, vector<4x8xf32> -> vector<4x8xf32>
    %319 = arith.addf %309, %318 : vector<4x8xf32>
    %c1_i32_263 = arith.constant 1 : i32
    %320 = arith.addi %0, %c1_i32_263 : i32
    %c2_i32_264 = arith.constant 2 : i32
    %321 = arith.addi %320, %c2_i32_264 : i32
    %c0_265 = arith.constant 0 : index
    %322 = arith.index_cast %321 : i32 to index
    %c1_266 = arith.constant 1 : index
    %c0_267 = arith.constant 0 : index
    %323 = vector.load %arg2[%c0_265, %322, %c1_266, %c0_267] : memref<1x6x6x16xbf16, #tpu.memory_space<vmem>>, vector<1x1x4x16xbf16>
    %324 = vector.shape_cast %323 : vector<1x1x4x16xbf16> to vector<1x4x16xbf16>
    %325 = vector.shape_cast %324 : vector<1x4x16xbf16> to vector<4x16xbf16>
    %c11_268 = arith.constant 11 : index
    %c0_269 = arith.constant 0 : index
    %c0_270 = arith.constant 0 : index
    %326 = vector.load %arg3[%c11_268, %c0_269, %c0_270] : memref<16x16x8xbf16, #tpu.memory_space<vmem>>, vector<1x16x8xbf16>
    %327 = vector.shape_cast %326 : vector<1x16x8xbf16> to vector<16x8xbf16>
    %cst_271 = arith.constant dense<0.000000e+00> : vector<4x8xf32>
    %328 = tpu.matmul %325, %327, %cst_271 {dimension_numbers = #tpu.dot_dimension_numbers<[1], [0], [0], [1], [0, 0, 1, 1], [], []>} : vector<4x16xbf16>, vector<16x8xbf16>, vector<4x8xf32> -> vector<4x8xf32>
    %329 = arith.addf %319, %328 : vector<4x8xf32>
    %330 = vector.broadcast %1 : vector<1x8xf32> to vector<4x8xf32>
    %331 = arith.mulf %329, %330 : vector<4x8xf32>
    %332 = vector.broadcast %2 : vector<1x8xf32> to vector<4x8xf32>
    %333 = arith.addf %331, %332 : vector<4x8xf32>
    %cst_272 = arith.constant 0.000000e+00 : f32
    %334 = vector.broadcast %cst_272 : f32 to vector<4x8xf32>
    %335 = arith.maximumf %333, %334 : vector<4x8xf32>
    %c0_273 = arith.constant 0 : index
    %c1_274 = arith.constant 1 : index
    %c1_275 = arith.constant 1 : index
    %c0_276 = arith.constant 0 : index
    %c0_277 = arith.constant 0 : index
    %336 = vector.load %arg6[%c0_273, %c1_274, %c1_275, %c0_276, %c0_277] : memref<1x4x2x4x16xf32, #tpu.memory_space<vmem>>, vector<1x1x1x4x8xf32>
    %337 = vector.shape_cast %336 : vector<1x1x1x4x8xf32> to vector<4x8xf32>
    %338 = vector.shape_cast %335 : vector<4x8xf32> to vector<1x1x1x4x8xf32>
    tpu.vector_store %arg6[%c0_273, %c1_274, %c1_275, %c0_276, %c0_277], %338 {strides = array<i32>} : memref<1x4x2x4x16xf32, #tpu.memory_space<vmem>>, vector<1x1x1x4x8xf32>,
    %c1_i32_278 = arith.constant 1 : i32
    %339 = arith.addi %0, %c1_i32_278 : i32
    %c1_i32_279 = arith.constant 1 : i32
    %340 = arith.addi %339, %c1_i32_279 : i32
    %c0_280 = arith.constant 0 : index
    %341 = arith.index_cast %340 : i32 to index
    %c1_281 = arith.constant 1 : index
    %c0_282 = arith.constant 0 : index
    %342 = vector.load %arg2[%c0_280, %341, %c1_281, %c0_282] : memref<1x6x6x16xbf16, #tpu.memory_space<vmem>>, vector<1x1x4x16xbf16>
    %343 = vector.shape_cast %342 : vector<1x1x4x16xbf16> to vector<1x4x16xbf16>
    %344 = vector.shape_cast %343 : vector<1x4x16xbf16> to vector<4x16xbf16>
    %c12_283 = arith.constant 12 : index
    %c0_284 = arith.constant 0 : index
    %c0_285 = arith.constant 0 : index
    %345 = vector.load %arg3[%c12_283, %c0_284, %c0_285] : memref<16x16x8xbf16, #tpu.memory_space<vmem>>, vector<1x16x8xbf16>
    %346 = vector.shape_cast %345 : vector<1x16x8xbf16> to vector<16x8xbf16>
    %cst_286 = arith.constant dense<0.000000e+00> : vector<4x8xf32>
    %347 = tpu.matmul %344, %346, %cst_286 {dimension_numbers = #tpu.dot_dimension_numbers<[1], [0], [0], [1], [0, 0, 1, 1], [], []>} : vector<4x16xbf16>, vector<16x8xbf16>, vector<4x8xf32> -> vector<4x8xf32>
    %c1_i32_287 = arith.constant 1 : i32
    %348 = arith.addi %0, %c1_i32_287 : i32
    %c1_i32_288 = arith.constant 1 : i32
    %349 = arith.addi %348, %c1_i32_288 : i32
    %c0_289 = arith.constant 0 : index
    %350 = arith.index_cast %349 : i32 to index
    %c2_290 = arith.constant 2 : index
    %c0_291 = arith.constant 0 : index
    %351 = vector.load %arg2[%c0_289, %350, %c2_290, %c0_291] : memref<1x6x6x16xbf16, #tpu.memory_space<vmem>>, vector<1x1x4x16xbf16>
    %352 = vector.shape_cast %351 : vector<1x1x4x16xbf16> to vector<1x4x16xbf16>
    %353 = vector.shape_cast %352 : vector<1x4x16xbf16> to vector<4x16xbf16>
    %c13_292 = arith.constant 13 : index
    %c0_293 = arith.constant 0 : index
    %c0_294 = arith.constant 0 : index
    %354 = vector.load %arg3[%c13_292, %c0_293, %c0_294] : memref<16x16x8xbf16, #tpu.memory_space<vmem>>, vector<1x16x8xbf16>
    %355 = vector.shape_cast %354 : vector<1x16x8xbf16> to vector<16x8xbf16>
    %cst_295 = arith.constant dense<0.000000e+00> : vector<4x8xf32>
    %356 = tpu.matmul %353, %355, %cst_295 {dimension_numbers = #tpu.dot_dimension_numbers<[1], [0], [0], [1], [0, 0, 1, 1], [], []>} : vector<4x16xbf16>, vector<16x8xbf16>, vector<4x8xf32> -> vector<4x8xf32>
    %357 = arith.addf %347, %356 : vector<4x8xf32>
    %c1_i32_296 = arith.constant 1 : i32
    %358 = arith.addi %0, %c1_i32_296 : i32
    %c2_i32_297 = arith.constant 2 : i32
    %359 = arith.addi %358, %c2_i32_297 : i32
    %c0_298 = arith.constant 0 : index
    %360 = arith.index_cast %359 : i32 to index
    %c1_299 = arith.constant 1 : index
    %c0_300 = arith.constant 0 : index
    %361 = vector.load %arg2[%c0_298, %360, %c1_299, %c0_300] : memref<1x6x6x16xbf16, #tpu.memory_space<vmem>>, vector<1x1x4x16xbf16>
    %362 = vector.shape_cast %361 : vector<1x1x4x16xbf16> to vector<1x4x16xbf16>
    %363 = vector.shape_cast %362 : vector<1x4x16xbf16> to vector<4x16xbf16>
    %c14_301 = arith.constant 14 : index
    %c0_302 = arith.constant 0 : index
    %c0_303 = arith.constant 0 : index
    %364 = vector.load %arg3[%c14_301, %c0_302, %c0_303] : memref<16x16x8xbf16, #tpu.memory_space<vmem>>, vector<1x16x8xbf16>
    %365 = vector.shape_cast %364 : vector<1x16x8xbf16> to vector<16x8xbf16>
    %cst_304 = arith.constant dense<0.000000e+00> : vector<4x8xf32>
    %366 = tpu.matmul %363, %365, %cst_304 {dimension_numbers = #tpu.dot_dimension_numbers<[1], [0], [0], [1], [0, 0, 1, 1], [], []>} : vector<4x16xbf16>, vector<16x8xbf16>, vector<4x8xf32> -> vector<4x8xf32>
    %367 = arith.addf %357, %366 : vector<4x8xf32>
    %c1_i32_305 = arith.constant 1 : i32
    %368 = arith.addi %0, %c1_i32_305 : i32
    %c2_i32_306 = arith.constant 2 : i32
    %369 = arith.addi %368, %c2_i32_306 : i32
    %c0_307 = arith.constant 0 : index
    %370 = arith.index_cast %369 : i32 to index
    %c2_308 = arith.constant 2 : index
    %c0_309 = arith.constant 0 : index
    %371 = vector.load %arg2[%c0_307, %370, %c2_308, %c0_309] : memref<1x6x6x16xbf16, #tpu.memory_space<vmem>>, vector<1x1x4x16xbf16>
    %372 = vector.shape_cast %371 : vector<1x1x4x16xbf16> to vector<1x4x16xbf16>
    %373 = vector.shape_cast %372 : vector<1x4x16xbf16> to vector<4x16xbf16>
    %c15_310 = arith.constant 15 : index
    %c0_311 = arith.constant 0 : index
    %c0_312 = arith.constant 0 : index
    %374 = vector.load %arg3[%c15_310, %c0_311, %c0_312] : memref<16x16x8xbf16, #tpu.memory_space<vmem>>, vector<1x16x8xbf16>
    %375 = vector.shape_cast %374 : vector<1x16x8xbf16> to vector<16x8xbf16>
    %cst_313 = arith.constant dense<0.000000e+00> : vector<4x8xf32>
    %376 = tpu.matmul %373, %375, %cst_313 {dimension_numbers = #tpu.dot_dimension_numbers<[1], [0], [0], [1], [0, 0, 1, 1], [], []>} : vector<4x16xbf16>, vector<16x8xbf16>, vector<4x8xf32> -> vector<4x8xf32>
    %377 = arith.addf %367, %376 : vector<4x8xf32>
    %378 = vector.broadcast %1 : vector<1x8xf32> to vector<4x8xf32>
    %379 = arith.mulf %377, %378 : vector<4x8xf32>
    %380 = vector.broadcast %2 : vector<1x8xf32> to vector<4x8xf32>
    %381 = arith.addf %379, %380 : vector<4x8xf32>
    %cst_314 = arith.constant 0.000000e+00 : f32
    %382 = vector.broadcast %cst_314 : f32 to vector<4x8xf32>
    %383 = arith.maximumf %381, %382 : vector<4x8xf32>
    %c0_315 = arith.constant 0 : index
    %c1_316 = arith.constant 1 : index
    %c1_317 = arith.constant 1 : index
    %c0_318 = arith.constant 0 : index
    %c8_319 = arith.constant 8 : index
    %384 = vector.load %arg6[%c0_315, %c1_316, %c1_317, %c0_318, %c8_319] : memref<1x4x2x4x16xf32, #tpu.memory_space<vmem>>, vector<1x1x1x4x8xf32>
    %385 = vector.shape_cast %384 : vector<1x1x1x4x8xf32> to vector<4x8xf32>
    %386 = vector.shape_cast %383 : vector<4x8xf32> to vector<1x1x1x4x8xf32>
    tpu.vector_store %arg6[%c0_315, %c1_316, %c1_317, %c0_318, %c8_319], %386 {strides = array<i32>} : memref<1x4x2x4x16xf32, #tpu.memory_space<vmem>>, vector<1x1x1x4x8xf32>,
    %c2_i32_320 = arith.constant 2 : i32
    %387 = arith.addi %0, %c2_i32_320 : i32
    %c0_i32_321 = arith.constant 0 : i32
    %388 = arith.addi %387, %c0_i32_321 : i32
    %c0_322 = arith.constant 0 : index
    %389 = arith.index_cast %388 : i32 to index
    %c0_323 = arith.constant 0 : index
    %c0_324 = arith.constant 0 : index
    %390 = vector.load %arg2[%c0_322, %389, %c0_323, %c0_324] : memref<1x6x6x16xbf16, #tpu.memory_space<vmem>>, vector<1x1x4x16xbf16>
    %391 = vector.shape_cast %390 : vector<1x1x4x16xbf16> to vector<1x4x16xbf16>
    %392 = vector.shape_cast %391 : vector<1x4x16xbf16> to vector<4x16xbf16>
    %c0_325 = arith.constant 0 : index
    %c0_326 = arith.constant 0 : index
    %c0_327 = arith.constant 0 : index
    %393 = vector.load %arg3[%c0_325, %c0_326, %c0_327] : memref<16x16x8xbf16, #tpu.memory_space<vmem>>, vector<1x16x8xbf16>
    %394 = vector.shape_cast %393 : vector<1x16x8xbf16> to vector<16x8xbf16>
    %cst_328 = arith.constant dense<0.000000e+00> : vector<4x8xf32>
    %395 = tpu.matmul %392, %394, %cst_328 {dimension_numbers = #tpu.dot_dimension_numbers<[1], [0], [0], [1], [0, 0, 1, 1], [], []>} : vector<4x16xbf16>, vector<16x8xbf16>, vector<4x8xf32> -> vector<4x8xf32>
    %c2_i32_329 = arith.constant 2 : i32
    %396 = arith.addi %0, %c2_i32_329 : i32
    %c0_i32_330 = arith.constant 0 : i32
    %397 = arith.addi %396, %c0_i32_330 : i32
    %c0_331 = arith.constant 0 : index
    %398 = arith.index_cast %397 : i32 to index
    %c1_332 = arith.constant 1 : index
    %c0_333 = arith.constant 0 : index
    %399 = vector.load %arg2[%c0_331, %398, %c1_332, %c0_333] : memref<1x6x6x16xbf16, #tpu.memory_space<vmem>>, vector<1x1x4x16xbf16>
    %400 = vector.shape_cast %399 : vector<1x1x4x16xbf16> to vector<1x4x16xbf16>
    %401 = vector.shape_cast %400 : vector<1x4x16xbf16> to vector<4x16xbf16>
    %c1_334 = arith.constant 1 : index
    %c0_335 = arith.constant 0 : index
    %c0_336 = arith.constant 0 : index
    %402 = vector.load %arg3[%c1_334, %c0_335, %c0_336] : memref<16x16x8xbf16, #tpu.memory_space<vmem>>, vector<1x16x8xbf16>
    %403 = vector.shape_cast %402 : vector<1x16x8xbf16> to vector<16x8xbf16>
    %cst_337 = arith.constant dense<0.000000e+00> : vector<4x8xf32>
    %404 = tpu.matmul %401, %403, %cst_337 {dimension_numbers = #tpu.dot_dimension_numbers<[1], [0], [0], [1], [0, 0, 1, 1], [], []>} : vector<4x16xbf16>, vector<16x8xbf16>, vector<4x8xf32> -> vector<4x8xf32>
    %405 = arith.addf %395, %404 : vector<4x8xf32>
    %c2_i32_338 = arith.constant 2 : i32
    %406 = arith.addi %0, %c2_i32_338 : i32
    %c1_i32_339 = arith.constant 1 : i32
    %407 = arith.addi %406, %c1_i32_339 : i32
    %c0_340 = arith.constant 0 : index
    %408 = arith.index_cast %407 : i32 to index
    %c0_341 = arith.constant 0 : index
    %c0_342 = arith.constant 0 : index
    %409 = vector.load %arg2[%c0_340, %408, %c0_341, %c0_342] : memref<1x6x6x16xbf16, #tpu.memory_space<vmem>>, vector<1x1x4x16xbf16>
    %410 = vector.shape_cast %409 : vector<1x1x4x16xbf16> to vector<1x4x16xbf16>
    %411 = vector.shape_cast %410 : vector<1x4x16xbf16> to vector<4x16xbf16>
    %c2_343 = arith.constant 2 : index
    %c0_344 = arith.constant 0 : index
    %c0_345 = arith.constant 0 : index
    %412 = vector.load %arg3[%c2_343, %c0_344, %c0_345] : memref<16x16x8xbf16, #tpu.memory_space<vmem>>, vector<1x16x8xbf16>
    %413 = vector.shape_cast %412 : vector<1x16x8xbf16> to vector<16x8xbf16>
    %cst_346 = arith.constant dense<0.000000e+00> : vector<4x8xf32>
    %414 = tpu.matmul %411, %413, %cst_346 {dimension_numbers = #tpu.dot_dimension_numbers<[1], [0], [0], [1], [0, 0, 1, 1], [], []>} : vector<4x16xbf16>, vector<16x8xbf16>, vector<4x8xf32> -> vector<4x8xf32>
    %415 = arith.addf %405, %414 : vector<4x8xf32>
    %c2_i32_347 = arith.constant 2 : i32
    %416 = arith.addi %0, %c2_i32_347 : i32
    %c1_i32_348 = arith.constant 1 : i32
    %417 = arith.addi %416, %c1_i32_348 : i32
    %c0_349 = arith.constant 0 : index
    %418 = arith.index_cast %417 : i32 to index
    %c1_350 = arith.constant 1 : index
    %c0_351 = arith.constant 0 : index
    %419 = vector.load %arg2[%c0_349, %418, %c1_350, %c0_351] : memref<1x6x6x16xbf16, #tpu.memory_space<vmem>>, vector<1x1x4x16xbf16>
    %420 = vector.shape_cast %419 : vector<1x1x4x16xbf16> to vector<1x4x16xbf16>
    %421 = vector.shape_cast %420 : vector<1x4x16xbf16> to vector<4x16xbf16>
    %c3_352 = arith.constant 3 : index
    %c0_353 = arith.constant 0 : index
    %c0_354 = arith.constant 0 : index
    %422 = vector.load %arg3[%c3_352, %c0_353, %c0_354] : memref<16x16x8xbf16, #tpu.memory_space<vmem>>, vector<1x16x8xbf16>
    %423 = vector.shape_cast %422 : vector<1x16x8xbf16> to vector<16x8xbf16>
    %cst_355 = arith.constant dense<0.000000e+00> : vector<4x8xf32>
    %424 = tpu.matmul %421, %423, %cst_355 {dimension_numbers = #tpu.dot_dimension_numbers<[1], [0], [0], [1], [0, 0, 1, 1], [], []>} : vector<4x16xbf16>, vector<16x8xbf16>, vector<4x8xf32> -> vector<4x8xf32>
    %425 = arith.addf %415, %424 : vector<4x8xf32>
    %426 = vector.broadcast %1 : vector<1x8xf32> to vector<4x8xf32>
    %427 = arith.mulf %425, %426 : vector<4x8xf32>
    %428 = vector.broadcast %2 : vector<1x8xf32> to vector<4x8xf32>
    %429 = arith.addf %427, %428 : vector<4x8xf32>
    %cst_356 = arith.constant 0.000000e+00 : f32
    %430 = vector.broadcast %cst_356 : f32 to vector<4x8xf32>
    %431 = arith.maximumf %429, %430 : vector<4x8xf32>
    %c0_357 = arith.constant 0 : index
    %c2_358 = arith.constant 2 : index
    %c0_359 = arith.constant 0 : index
    %c0_360 = arith.constant 0 : index
    %c0_361 = arith.constant 0 : index
    %432 = vector.load %arg6[%c0_357, %c2_358, %c0_359, %c0_360, %c0_361] : memref<1x4x2x4x16xf32, #tpu.memory_space<vmem>>, vector<1x1x1x4x8xf32>
    %433 = vector.shape_cast %432 : vector<1x1x1x4x8xf32> to vector<4x8xf32>
    %434 = vector.shape_cast %431 : vector<4x8xf32> to vector<1x1x1x4x8xf32>
    tpu.vector_store %arg6[%c0_357, %c2_358, %c0_359, %c0_360, %c0_361], %434 {strides = array<i32>} : memref<1x4x2x4x16xf32, #tpu.memory_space<vmem>>, vector<1x1x1x4x8xf32>,
    %c2_i32_362 = arith.constant 2 : i32
    %435 = arith.addi %0, %c2_i32_362 : i32
    %c0_i32_363 = arith.constant 0 : i32
    %436 = arith.addi %435, %c0_i32_363 : i32
    %c0_364 = arith.constant 0 : index
    %437 = arith.index_cast %436 : i32 to index
    %c1_365 = arith.constant 1 : index
    %c0_366 = arith.constant 0 : index
    %438 = vector.load %arg2[%c0_364, %437, %c1_365, %c0_366] : memref<1x6x6x16xbf16, #tpu.memory_space<vmem>>, vector<1x1x4x16xbf16>
    %439 = vector.shape_cast %438 : vector<1x1x4x16xbf16> to vector<1x4x16xbf16>
    %440 = vector.shape_cast %439 : vector<1x4x16xbf16> to vector<4x16xbf16>
    %c4_367 = arith.constant 4 : index
    %c0_368 = arith.constant 0 : index
    %c0_369 = arith.constant 0 : index
    %441 = vector.load %arg3[%c4_367, %c0_368, %c0_369] : memref<16x16x8xbf16, #tpu.memory_space<vmem>>, vector<1x16x8xbf16>
    %442 = vector.shape_cast %441 : vector<1x16x8xbf16> to vector<16x8xbf16>
    %cst_370 = arith.constant dense<0.000000e+00> : vector<4x8xf32>
    %443 = tpu.matmul %440, %442, %cst_370 {dimension_numbers = #tpu.dot_dimension_numbers<[1], [0], [0], [1], [0, 0, 1, 1], [], []>} : vector<4x16xbf16>, vector<16x8xbf16>, vector<4x8xf32> -> vector<4x8xf32>
    %c2_i32_371 = arith.constant 2 : i32
    %444 = arith.addi %0, %c2_i32_371 : i32
    %c0_i32_372 = arith.constant 0 : i32
    %445 = arith.addi %444, %c0_i32_372 : i32
    %c0_373 = arith.constant 0 : index
    %446 = arith.index_cast %445 : i32 to index
    %c2_374 = arith.constant 2 : index
    %c0_375 = arith.constant 0 : index
    %447 = vector.load %arg2[%c0_373, %446, %c2_374, %c0_375] : memref<1x6x6x16xbf16, #tpu.memory_space<vmem>>, vector<1x1x4x16xbf16>
    %448 = vector.shape_cast %447 : vector<1x1x4x16xbf16> to vector<1x4x16xbf16>
    %449 = vector.shape_cast %448 : vector<1x4x16xbf16> to vector<4x16xbf16>
    %c5_376 = arith.constant 5 : index
    %c0_377 = arith.constant 0 : index
    %c0_378 = arith.constant 0 : index
    %450 = vector.load %arg3[%c5_376, %c0_377, %c0_378] : memref<16x16x8xbf16, #tpu.memory_space<vmem>>, vector<1x16x8xbf16>
    %451 = vector.shape_cast %450 : vector<1x16x8xbf16> to vector<16x8xbf16>
    %cst_379 = arith.constant dense<0.000000e+00> : vector<4x8xf32>
    %452 = tpu.matmul %449, %451, %cst_379 {dimension_numbers = #tpu.dot_dimension_numbers<[1], [0], [0], [1], [0, 0, 1, 1], [], []>} : vector<4x16xbf16>, vector<16x8xbf16>, vector<4x8xf32> -> vector<4x8xf32>
    %453 = arith.addf %443, %452 : vector<4x8xf32>
    %c2_i32_380 = arith.constant 2 : i32
    %454 = arith.addi %0, %c2_i32_380 : i32
    %c1_i32_381 = arith.constant 1 : i32
    %455 = arith.addi %454, %c1_i32_381 : i32
    %c0_382 = arith.constant 0 : index
    %456 = arith.index_cast %455 : i32 to index
    %c1_383 = arith.constant 1 : index
    %c0_384 = arith.constant 0 : index
    %457 = vector.load %arg2[%c0_382, %456, %c1_383, %c0_384] : memref<1x6x6x16xbf16, #tpu.memory_space<vmem>>, vector<1x1x4x16xbf16>
    %458 = vector.shape_cast %457 : vector<1x1x4x16xbf16> to vector<1x4x16xbf16>
    %459 = vector.shape_cast %458 : vector<1x4x16xbf16> to vector<4x16xbf16>
    %c6_385 = arith.constant 6 : index
    %c0_386 = arith.constant 0 : index
    %c0_387 = arith.constant 0 : index
    %460 = vector.load %arg3[%c6_385, %c0_386, %c0_387] : memref<16x16x8xbf16, #tpu.memory_space<vmem>>, vector<1x16x8xbf16>
    %461 = vector.shape_cast %460 : vector<1x16x8xbf16> to vector<16x8xbf16>
    %cst_388 = arith.constant dense<0.000000e+00> : vector<4x8xf32>
    %462 = tpu.matmul %459, %461, %cst_388 {dimension_numbers = #tpu.dot_dimension_numbers<[1], [0], [0], [1], [0, 0, 1, 1], [], []>} : vector<4x16xbf16>, vector<16x8xbf16>, vector<4x8xf32> -> vector<4x8xf32>
    %463 = arith.addf %453, %462 : vector<4x8xf32>
    %c2_i32_389 = arith.constant 2 : i32
    %464 = arith.addi %0, %c2_i32_389 : i32
    %c1_i32_390 = arith.constant 1 : i32
    %465 = arith.addi %464, %c1_i32_390 : i32
    %c0_391 = arith.constant 0 : index
    %466 = arith.index_cast %465 : i32 to index
    %c2_392 = arith.constant 2 : index
    %c0_393 = arith.constant 0 : index
    %467 = vector.load %arg2[%c0_391, %466, %c2_392, %c0_393] : memref<1x6x6x16xbf16, #tpu.memory_space<vmem>>, vector<1x1x4x16xbf16>
    %468 = vector.shape_cast %467 : vector<1x1x4x16xbf16> to vector<1x4x16xbf16>
    %469 = vector.shape_cast %468 : vector<1x4x16xbf16> to vector<4x16xbf16>
    %c7_394 = arith.constant 7 : index
    %c0_395 = arith.constant 0 : index
    %c0_396 = arith.constant 0 : index
    %470 = vector.load %arg3[%c7_394, %c0_395, %c0_396] : memref<16x16x8xbf16, #tpu.memory_space<vmem>>, vector<1x16x8xbf16>
    %471 = vector.shape_cast %470 : vector<1x16x8xbf16> to vector<16x8xbf16>
    %cst_397 = arith.constant dense<0.000000e+00> : vector<4x8xf32>
    %472 = tpu.matmul %469, %471, %cst_397 {dimension_numbers = #tpu.dot_dimension_numbers<[1], [0], [0], [1], [0, 0, 1, 1], [], []>} : vector<4x16xbf16>, vector<16x8xbf16>, vector<4x8xf32> -> vector<4x8xf32>
    %473 = arith.addf %463, %472 : vector<4x8xf32>
    %474 = vector.broadcast %1 : vector<1x8xf32> to vector<4x8xf32>
    %475 = arith.mulf %473, %474 : vector<4x8xf32>
    %476 = vector.broadcast %2 : vector<1x8xf32> to vector<4x8xf32>
    %477 = arith.addf %475, %476 : vector<4x8xf32>
    %cst_398 = arith.constant 0.000000e+00 : f32
    %478 = vector.broadcast %cst_398 : f32 to vector<4x8xf32>
    %479 = arith.maximumf %477, %478 : vector<4x8xf32>
    %c0_399 = arith.constant 0 : index
    %c2_400 = arith.constant 2 : index
    %c0_401 = arith.constant 0 : index
    %c0_402 = arith.constant 0 : index
    %c8_403 = arith.constant 8 : index
    %480 = vector.load %arg6[%c0_399, %c2_400, %c0_401, %c0_402, %c8_403] : memref<1x4x2x4x16xf32, #tpu.memory_space<vmem>>, vector<1x1x1x4x8xf32>
    %481 = vector.shape_cast %480 : vector<1x1x1x4x8xf32> to vector<4x8xf32>
    %482 = vector.shape_cast %479 : vector<4x8xf32> to vector<1x1x1x4x8xf32>
    tpu.vector_store %arg6[%c0_399, %c2_400, %c0_401, %c0_402, %c8_403], %482 {strides = array<i32>} : memref<1x4x2x4x16xf32, #tpu.memory_space<vmem>>, vector<1x1x1x4x8xf32>,
    %c2_i32_404 = arith.constant 2 : i32
    %483 = arith.addi %0, %c2_i32_404 : i32
    %c1_i32_405 = arith.constant 1 : i32
    %484 = arith.addi %483, %c1_i32_405 : i32
    %c0_406 = arith.constant 0 : index
    %485 = arith.index_cast %484 : i32 to index
    %c0_407 = arith.constant 0 : index
    %c0_408 = arith.constant 0 : index
    %486 = vector.load %arg2[%c0_406, %485, %c0_407, %c0_408] : memref<1x6x6x16xbf16, #tpu.memory_space<vmem>>, vector<1x1x4x16xbf16>
    %487 = vector.shape_cast %486 : vector<1x1x4x16xbf16> to vector<1x4x16xbf16>
    %488 = vector.shape_cast %487 : vector<1x4x16xbf16> to vector<4x16xbf16>
    %c8_409 = arith.constant 8 : index
    %c0_410 = arith.constant 0 : index
    %c0_411 = arith.constant 0 : index
    %489 = vector.load %arg3[%c8_409, %c0_410, %c0_411] : memref<16x16x8xbf16, #tpu.memory_space<vmem>>, vector<1x16x8xbf16>
    %490 = vector.shape_cast %489 : vector<1x16x8xbf16> to vector<16x8xbf16>
    %cst_412 = arith.constant dense<0.000000e+00> : vector<4x8xf32>
    %491 = tpu.matmul %488, %490, %cst_412 {dimension_numbers = #tpu.dot_dimension_numbers<[1], [0], [0], [1], [0, 0, 1, 1], [], []>} : vector<4x16xbf16>, vector<16x8xbf16>, vector<4x8xf32> -> vector<4x8xf32>
    %c2_i32_413 = arith.constant 2 : i32
    %492 = arith.addi %0, %c2_i32_413 : i32
    %c1_i32_414 = arith.constant 1 : i32
    %493 = arith.addi %492, %c1_i32_414 : i32
    %c0_415 = arith.constant 0 : index
    %494 = arith.index_cast %493 : i32 to index
    %c1_416 = arith.constant 1 : index
    %c0_417 = arith.constant 0 : index
    %495 = vector.load %arg2[%c0_415, %494, %c1_416, %c0_417] : memref<1x6x6x16xbf16, #tpu.memory_space<vmem>>, vector<1x1x4x16xbf16>
    %496 = vector.shape_cast %495 : vector<1x1x4x16xbf16> to vector<1x4x16xbf16>
    %497 = vector.shape_cast %496 : vector<1x4x16xbf16> to vector<4x16xbf16>
    %c9_418 = arith.constant 9 : index
    %c0_419 = arith.constant 0 : index
    %c0_420 = arith.constant 0 : index
    %498 = vector.load %arg3[%c9_418, %c0_419, %c0_420] : memref<16x16x8xbf16, #tpu.memory_space<vmem>>, vector<1x16x8xbf16>
    %499 = vector.shape_cast %498 : vector<1x16x8xbf16> to vector<16x8xbf16>
    %cst_421 = arith.constant dense<0.000000e+00> : vector<4x8xf32>
    %500 = tpu.matmul %497, %499, %cst_421 {dimension_numbers = #tpu.dot_dimension_numbers<[1], [0], [0], [1], [0, 0, 1, 1], [], []>} : vector<4x16xbf16>, vector<16x8xbf16>, vector<4x8xf32> -> vector<4x8xf32>
    %501 = arith.addf %491, %500 : vector<4x8xf32>
    %c2_i32_422 = arith.constant 2 : i32
    %502 = arith.addi %0, %c2_i32_422 : i32
    %c2_i32_423 = arith.constant 2 : i32
    %503 = arith.addi %502, %c2_i32_423 : i32
    %c0_424 = arith.constant 0 : index
    %504 = arith.index_cast %503 : i32 to index
    %c0_425 = arith.constant 0 : index
    %c0_426 = arith.constant 0 : index
    %505 = vector.load %arg2[%c0_424, %504, %c0_425, %c0_426] : memref<1x6x6x16xbf16, #tpu.memory_space<vmem>>, vector<1x1x4x16xbf16>
    %506 = vector.shape_cast %505 : vector<1x1x4x16xbf16> to vector<1x4x16xbf16>
    %507 = vector.shape_cast %506 : vector<1x4x16xbf16> to vector<4x16xbf16>
    %c10_427 = arith.constant 10 : index
    %c0_428 = arith.constant 0 : index
    %c0_429 = arith.constant 0 : index
    %508 = vector.load %arg3[%c10_427, %c0_428, %c0_429] : memref<16x16x8xbf16, #tpu.memory_space<vmem>>, vector<1x16x8xbf16>
    %509 = vector.shape_cast %508 : vector<1x16x8xbf16> to vector<16x8xbf16>
    %cst_430 = arith.constant dense<0.000000e+00> : vector<4x8xf32>
    %510 = tpu.matmul %507, %509, %cst_430 {dimension_numbers = #tpu.dot_dimension_numbers<[1], [0], [0], [1], [0, 0, 1, 1], [], []>} : vector<4x16xbf16>, vector<16x8xbf16>, vector<4x8xf32> -> vector<4x8xf32>
    %511 = arith.addf %501, %510 : vector<4x8xf32>
    %c2_i32_431 = arith.constant 2 : i32
    %512 = arith.addi %0, %c2_i32_431 : i32
    %c2_i32_432 = arith.constant 2 : i32
    %513 = arith.addi %512, %c2_i32_432 : i32
    %c0_433 = arith.constant 0 : index
    %514 = arith.index_cast %513 : i32 to index
    %c1_434 = arith.constant 1 : index
    %c0_435 = arith.constant 0 : index
    %515 = vector.load %arg2[%c0_433, %514, %c1_434, %c0_435] : memref<1x6x6x16xbf16, #tpu.memory_space<vmem>>, vector<1x1x4x16xbf16>
    %516 = vector.shape_cast %515 : vector<1x1x4x16xbf16> to vector<1x4x16xbf16>
    %517 = vector.shape_cast %516 : vector<1x4x16xbf16> to vector<4x16xbf16>
    %c11_436 = arith.constant 11 : index
    %c0_437 = arith.constant 0 : index
    %c0_438 = arith.constant 0 : index
    %518 = vector.load %arg3[%c11_436, %c0_437, %c0_438] : memref<16x16x8xbf16, #tpu.memory_space<vmem>>, vector<1x16x8xbf16>
    %519 = vector.shape_cast %518 : vector<1x16x8xbf16> to vector<16x8xbf16>
    %cst_439 = arith.constant dense<0.000000e+00> : vector<4x8xf32>
    %520 = tpu.matmul %517, %519, %cst_439 {dimension_numbers = #tpu.dot_dimension_numbers<[1], [0], [0], [1], [0, 0, 1, 1], [], []>} : vector<4x16xbf16>, vector<16x8xbf16>, vector<4x8xf32> -> vector<4x8xf32>
    %521 = arith.addf %511, %520 : vector<4x8xf32>
    %522 = vector.broadcast %1 : vector<1x8xf32> to vector<4x8xf32>
    %523 = arith.mulf %521, %522 : vector<4x8xf32>
    %524 = vector.broadcast %2 : vector<1x8xf32> to vector<4x8xf32>
    %525 = arith.addf %523, %524 : vector<4x8xf32>
    %cst_440 = arith.constant 0.000000e+00 : f32
    %526 = vector.broadcast %cst_440 : f32 to vector<4x8xf32>
    %527 = arith.maximumf %525, %526 : vector<4x8xf32>
    %c0_441 = arith.constant 0 : index
    %c2_442 = arith.constant 2 : index
    %c1_443 = arith.constant 1 : index
    %c0_444 = arith.constant 0 : index
    %c0_445 = arith.constant 0 : index
    %528 = vector.load %arg6[%c0_441, %c2_442, %c1_443, %c0_444, %c0_445] : memref<1x4x2x4x16xf32, #tpu.memory_space<vmem>>, vector<1x1x1x4x8xf32>
    %529 = vector.shape_cast %528 : vector<1x1x1x4x8xf32> to vector<4x8xf32>
    %530 = vector.shape_cast %527 : vector<4x8xf32> to vector<1x1x1x4x8xf32>
    tpu.vector_store %arg6[%c0_441, %c2_442, %c1_443, %c0_444, %c0_445], %530 {strides = array<i32>} : memref<1x4x2x4x16xf32, #tpu.memory_space<vmem>>, vector<1x1x1x4x8xf32>,
    %c2_i32_446 = arith.constant 2 : i32
    %531 = arith.addi %0, %c2_i32_446 : i32
    %c1_i32_447 = arith.constant 1 : i32
    %532 = arith.addi %531, %c1_i32_447 : i32
    %c0_448 = arith.constant 0 : index
    %533 = arith.index_cast %532 : i32 to index
    %c1_449 = arith.constant 1 : index
    %c0_450 = arith.constant 0 : index
    %534 = vector.load %arg2[%c0_448, %533, %c1_449, %c0_450] : memref<1x6x6x16xbf16, #tpu.memory_space<vmem>>, vector<1x1x4x16xbf16>
    %535 = vector.shape_cast %534 : vector<1x1x4x16xbf16> to vector<1x4x16xbf16>
    %536 = vector.shape_cast %535 : vector<1x4x16xbf16> to vector<4x16xbf16>
    %c12_451 = arith.constant 12 : index
    %c0_452 = arith.constant 0 : index
    %c0_453 = arith.constant 0 : index
    %537 = vector.load %arg3[%c12_451, %c0_452, %c0_453] : memref<16x16x8xbf16, #tpu.memory_space<vmem>>, vector<1x16x8xbf16>
    %538 = vector.shape_cast %537 : vector<1x16x8xbf16> to vector<16x8xbf16>
    %cst_454 = arith.constant dense<0.000000e+00> : vector<4x8xf32>
    %539 = tpu.matmul %536, %538, %cst_454 {dimension_numbers = #tpu.dot_dimension_numbers<[1], [0], [0], [1], [0, 0, 1, 1], [], []>} : vector<4x16xbf16>, vector<16x8xbf16>, vector<4x8xf32> -> vector<4x8xf32>
    %c2_i32_455 = arith.constant 2 : i32
    %540 = arith.addi %0, %c2_i32_455 : i32
    %c1_i32_456 = arith.constant 1 : i32
    %541 = arith.addi %540, %c1_i32_456 : i32
    %c0_457 = arith.constant 0 : index
    %542 = arith.index_cast %541 : i32 to index
    %c2_458 = arith.constant 2 : index
    %c0_459 = arith.constant 0 : index
    %543 = vector.load %arg2[%c0_457, %542, %c2_458, %c0_459] : memref<1x6x6x16xbf16, #tpu.memory_space<vmem>>, vector<1x1x4x16xbf16>
    %544 = vector.shape_cast %543 : vector<1x1x4x16xbf16> to vector<1x4x16xbf16>
    %545 = vector.shape_cast %544 : vector<1x4x16xbf16> to vector<4x16xbf16>
    %c13_460 = arith.constant 13 : index
    %c0_461 = arith.constant 0 : index
    %c0_462 = arith.constant 0 : index
    %546 = vector.load %arg3[%c13_460, %c0_461, %c0_462] : memref<16x16x8xbf16, #tpu.memory_space<vmem>>, vector<1x16x8xbf16>
    %547 = vector.shape_cast %546 : vector<1x16x8xbf16> to vector<16x8xbf16>
    %cst_463 = arith.constant dense<0.000000e+00> : vector<4x8xf32>
    %548 = tpu.matmul %545, %547, %cst_463 {dimension_numbers = #tpu.dot_dimension_numbers<[1], [0], [0], [1], [0, 0, 1, 1], [], []>} : vector<4x16xbf16>, vector<16x8xbf16>, vector<4x8xf32> -> vector<4x8xf32>
    %549 = arith.addf %539, %548 : vector<4x8xf32>
    %c2_i32_464 = arith.constant 2 : i32
    %550 = arith.addi %0, %c2_i32_464 : i32
    %c2_i32_465 = arith.constant 2 : i32
    %551 = arith.addi %550, %c2_i32_465 : i32
    %c0_466 = arith.constant 0 : index
    %552 = arith.index_cast %551 : i32 to index
    %c1_467 = arith.constant 1 : index
    %c0_468 = arith.constant 0 : index
    %553 = vector.load %arg2[%c0_466, %552, %c1_467, %c0_468] : memref<1x6x6x16xbf16, #tpu.memory_space<vmem>>, vector<1x1x4x16xbf16>
    %554 = vector.shape_cast %553 : vector<1x1x4x16xbf16> to vector<1x4x16xbf16>
    %555 = vector.shape_cast %554 : vector<1x4x16xbf16> to vector<4x16xbf16>
    %c14_469 = arith.constant 14 : index
    %c0_470 = arith.constant 0 : index
    %c0_471 = arith.constant 0 : index
    %556 = vector.load %arg3[%c14_469, %c0_470, %c0_471] : memref<16x16x8xbf16, #tpu.memory_space<vmem>>, vector<1x16x8xbf16>
    %557 = vector.shape_cast %556 : vector<1x16x8xbf16> to vector<16x8xbf16>
    %cst_472 = arith.constant dense<0.000000e+00> : vector<4x8xf32>
    %558 = tpu.matmul %555, %557, %cst_472 {dimension_numbers = #tpu.dot_dimension_numbers<[1], [0], [0], [1], [0, 0, 1, 1], [], []>} : vector<4x16xbf16>, vector<16x8xbf16>, vector<4x8xf32> -> vector<4x8xf32>
    %559 = arith.addf %549, %558 : vector<4x8xf32>
    %c2_i32_473 = arith.constant 2 : i32
    %560 = arith.addi %0, %c2_i32_473 : i32
    %c2_i32_474 = arith.constant 2 : i32
    %561 = arith.addi %560, %c2_i32_474 : i32
    %c0_475 = arith.constant 0 : index
    %562 = arith.index_cast %561 : i32 to index
    %c2_476 = arith.constant 2 : index
    %c0_477 = arith.constant 0 : index
    %563 = vector.load %arg2[%c0_475, %562, %c2_476, %c0_477] : memref<1x6x6x16xbf16, #tpu.memory_space<vmem>>, vector<1x1x4x16xbf16>
    %564 = vector.shape_cast %563 : vector<1x1x4x16xbf16> to vector<1x4x16xbf16>
    %565 = vector.shape_cast %564 : vector<1x4x16xbf16> to vector<4x16xbf16>
    %c15_478 = arith.constant 15 : index
    %c0_479 = arith.constant 0 : index
    %c0_480 = arith.constant 0 : index
    %566 = vector.load %arg3[%c15_478, %c0_479, %c0_480] : memref<16x16x8xbf16, #tpu.memory_space<vmem>>, vector<1x16x8xbf16>
    %567 = vector.shape_cast %566 : vector<1x16x8xbf16> to vector<16x8xbf16>
    %cst_481 = arith.constant dense<0.000000e+00> : vector<4x8xf32>
    %568 = tpu.matmul %565, %567, %cst_481 {dimension_numbers = #tpu.dot_dimension_numbers<[1], [0], [0], [1], [0, 0, 1, 1], [], []>} : vector<4x16xbf16>, vector<16x8xbf16>, vector<4x8xf32> -> vector<4x8xf32>
    %569 = arith.addf %559, %568 : vector<4x8xf32>
    %570 = vector.broadcast %1 : vector<1x8xf32> to vector<4x8xf32>
    %571 = arith.mulf %569, %570 : vector<4x8xf32>
    %572 = vector.broadcast %2 : vector<1x8xf32> to vector<4x8xf32>
    %573 = arith.addf %571, %572 : vector<4x8xf32>
    %cst_482 = arith.constant 0.000000e+00 : f32
    %574 = vector.broadcast %cst_482 : f32 to vector<4x8xf32>
    %575 = arith.maximumf %573, %574 : vector<4x8xf32>
    %c0_483 = arith.constant 0 : index
    %c2_484 = arith.constant 2 : index
    %c1_485 = arith.constant 1 : index
    %c0_486 = arith.constant 0 : index
    %c8_487 = arith.constant 8 : index
    %576 = vector.load %arg6[%c0_483, %c2_484, %c1_485, %c0_486, %c8_487] : memref<1x4x2x4x16xf32, #tpu.memory_space<vmem>>, vector<1x1x1x4x8xf32>
    %577 = vector.shape_cast %576 : vector<1x1x1x4x8xf32> to vector<4x8xf32>
    %578 = vector.shape_cast %575 : vector<4x8xf32> to vector<1x1x1x4x8xf32>
    tpu.vector_store %arg6[%c0_483, %c2_484, %c1_485, %c0_486, %c8_487], %578 {strides = array<i32>} : memref<1x4x2x4x16xf32, #tpu.memory_space<vmem>>, vector<1x1x1x4x8xf32>,
    %c3_i32 = arith.constant 3 : i32
    %579 = arith.addi %0, %c3_i32 : i32
    %c0_i32_488 = arith.constant 0 : i32
    %580 = arith.addi %579, %c0_i32_488 : i32
    %c0_489 = arith.constant 0 : index
    %581 = arith.index_cast %580 : i32 to index
    %c0_490 = arith.constant 0 : index
    %c0_491 = arith.constant 0 : index
    %582 = vector.load %arg2[%c0_489, %581, %c0_490, %c0_491] : memref<1x6x6x16xbf16, #tpu.memory_space<vmem>>, vector<1x1x4x16xbf16>
    %583 = vector.shape_cast %582 : vector<1x1x4x16xbf16> to vector<1x4x16xbf16>
    %584 = vector.shape_cast %583 : vector<1x4x16xbf16> to vector<4x16xbf16>
    %c0_492 = arith.constant 0 : index
    %c0_493 = arith.constant 0 : index
    %c0_494 = arith.constant 0 : index
    %585 = vector.load %arg3[%c0_492, %c0_493, %c0_494] : memref<16x16x8xbf16, #tpu.memory_space<vmem>>, vector<1x16x8xbf16>
    %586 = vector.shape_cast %585 : vector<1x16x8xbf16> to vector<16x8xbf16>
    %cst_495 = arith.constant dense<0.000000e+00> : vector<4x8xf32>
    %587 = tpu.matmul %584, %586, %cst_495 {dimension_numbers = #tpu.dot_dimension_numbers<[1], [0], [0], [1], [0, 0, 1, 1], [], []>} : vector<4x16xbf16>, vector<16x8xbf16>, vector<4x8xf32> -> vector<4x8xf32>
    %c3_i32_496 = arith.constant 3 : i32
    %588 = arith.addi %0, %c3_i32_496 : i32
    %c0_i32_497 = arith.constant 0 : i32
    %589 = arith.addi %588, %c0_i32_497 : i32
    %c0_498 = arith.constant 0 : index
    %590 = arith.index_cast %589 : i32 to index
    %c1_499 = arith.constant 1 : index
    %c0_500 = arith.constant 0 : index
    %591 = vector.load %arg2[%c0_498, %590, %c1_499, %c0_500] : memref<1x6x6x16xbf16, #tpu.memory_space<vmem>>, vector<1x1x4x16xbf16>
    %592 = vector.shape_cast %591 : vector<1x1x4x16xbf16> to vector<1x4x16xbf16>
    %593 = vector.shape_cast %592 : vector<1x4x16xbf16> to vector<4x16xbf16>
    %c1_501 = arith.constant 1 : index
    %c0_502 = arith.constant 0 : index
    %c0_503 = arith.constant 0 : index
    %594 = vector.load %arg3[%c1_501, %c0_502, %c0_503] : memref<16x16x8xbf16, #tpu.memory_space<vmem>>, vector<1x16x8xbf16>
    %595 = vector.shape_cast %594 : vector<1x16x8xbf16> to vector<16x8xbf16>
    %cst_504 = arith.constant dense<0.000000e+00> : vector<4x8xf32>
    %596 = tpu.matmul %593, %595, %cst_504 {dimension_numbers = #tpu.dot_dimension_numbers<[1], [0], [0], [1], [0, 0, 1, 1], [], []>} : vector<4x16xbf16>, vector<16x8xbf16>, vector<4x8xf32> -> vector<4x8xf32>
    %597 = arith.addf %587, %596 : vector<4x8xf32>
    %c3_i32_505 = arith.constant 3 : i32
    %598 = arith.addi %0, %c3_i32_505 : i32
    %c1_i32_506 = arith.constant 1 : i32
    %599 = arith.addi %598, %c1_i32_506 : i32
    %c0_507 = arith.constant 0 : index
    %600 = arith.index_cast %599 : i32 to index
    %c0_508 = arith.constant 0 : index
    %c0_509 = arith.constant 0 : index
    %601 = vector.load %arg2[%c0_507, %600, %c0_508, %c0_509] : memref<1x6x6x16xbf16, #tpu.memory_space<vmem>>, vector<1x1x4x16xbf16>
    %602 = vector.shape_cast %601 : vector<1x1x4x16xbf16> to vector<1x4x16xbf16>
    %603 = vector.shape_cast %602 : vector<1x4x16xbf16> to vector<4x16xbf16>
    %c2_510 = arith.constant 2 : index
    %c0_511 = arith.constant 0 : index
    %c0_512 = arith.constant 0 : index
    %604 = vector.load %arg3[%c2_510, %c0_511, %c0_512] : memref<16x16x8xbf16, #tpu.memory_space<vmem>>, vector<1x16x8xbf16>
    %605 = vector.shape_cast %604 : vector<1x16x8xbf16> to vector<16x8xbf16>
    %cst_513 = arith.constant dense<0.000000e+00> : vector<4x8xf32>
    %606 = tpu.matmul %603, %605, %cst_513 {dimension_numbers = #tpu.dot_dimension_numbers<[1], [0], [0], [1], [0, 0, 1, 1], [], []>} : vector<4x16xbf16>, vector<16x8xbf16>, vector<4x8xf32> -> vector<4x8xf32>
    %607 = arith.addf %597, %606 : vector<4x8xf32>
    %c3_i32_514 = arith.constant 3 : i32
    %608 = arith.addi %0, %c3_i32_514 : i32
    %c1_i32_515 = arith.constant 1 : i32
    %609 = arith.addi %608, %c1_i32_515 : i32
    %c0_516 = arith.constant 0 : index
    %610 = arith.index_cast %609 : i32 to index
    %c1_517 = arith.constant 1 : index
    %c0_518 = arith.constant 0 : index
    %611 = vector.load %arg2[%c0_516, %610, %c1_517, %c0_518] : memref<1x6x6x16xbf16, #tpu.memory_space<vmem>>, vector<1x1x4x16xbf16>
    %612 = vector.shape_cast %611 : vector<1x1x4x16xbf16> to vector<1x4x16xbf16>
    %613 = vector.shape_cast %612 : vector<1x4x16xbf16> to vector<4x16xbf16>
    %c3_519 = arith.constant 3 : index
    %c0_520 = arith.constant 0 : index
    %c0_521 = arith.constant 0 : index
    %614 = vector.load %arg3[%c3_519, %c0_520, %c0_521] : memref<16x16x8xbf16, #tpu.memory_space<vmem>>, vector<1x16x8xbf16>
    %615 = vector.shape_cast %614 : vector<1x16x8xbf16> to vector<16x8xbf16>
    %cst_522 = arith.constant dense<0.000000e+00> : vector<4x8xf32>
    %616 = tpu.matmul %613, %615, %cst_522 {dimension_numbers = #tpu.dot_dimension_numbers<[1], [0], [0], [1], [0, 0, 1, 1], [], []>} : vector<4x16xbf16>, vector<16x8xbf16>, vector<4x8xf32> -> vector<4x8xf32>
    %617 = arith.addf %607, %616 : vector<4x8xf32>
    %618 = vector.broadcast %1 : vector<1x8xf32> to vector<4x8xf32>
    %619 = arith.mulf %617, %618 : vector<4x8xf32>
    %620 = vector.broadcast %2 : vector<1x8xf32> to vector<4x8xf32>
    %621 = arith.addf %619, %620 : vector<4x8xf32>
    %cst_523 = arith.constant 0.000000e+00 : f32
    %622 = vector.broadcast %cst_523 : f32 to vector<4x8xf32>
    %623 = arith.maximumf %621, %622 : vector<4x8xf32>
    %c0_524 = arith.constant 0 : index
    %c3_525 = arith.constant 3 : index
    %c0_526 = arith.constant 0 : index
    %c0_527 = arith.constant 0 : index
    %c0_528 = arith.constant 0 : index
    %624 = vector.load %arg6[%c0_524, %c3_525, %c0_526, %c0_527, %c0_528] : memref<1x4x2x4x16xf32, #tpu.memory_space<vmem>>, vector<1x1x1x4x8xf32>
    %625 = vector.shape_cast %624 : vector<1x1x1x4x8xf32> to vector<4x8xf32>
    %626 = vector.shape_cast %623 : vector<4x8xf32> to vector<1x1x1x4x8xf32>
    tpu.vector_store %arg6[%c0_524, %c3_525, %c0_526, %c0_527, %c0_528], %626 {strides = array<i32>} : memref<1x4x2x4x16xf32, #tpu.memory_space<vmem>>, vector<1x1x1x4x8xf32>,
    %c3_i32_529 = arith.constant 3 : i32
    %627 = arith.addi %0, %c3_i32_529 : i32
    %c0_i32_530 = arith.constant 0 : i32
    %628 = arith.addi %627, %c0_i32_530 : i32
    %c0_531 = arith.constant 0 : index
    %629 = arith.index_cast %628 : i32 to index
    %c1_532 = arith.constant 1 : index
    %c0_533 = arith.constant 0 : index
    %630 = vector.load %arg2[%c0_531, %629, %c1_532, %c0_533] : memref<1x6x6x16xbf16, #tpu.memory_space<vmem>>, vector<1x1x4x16xbf16>
    %631 = vector.shape_cast %630 : vector<1x1x4x16xbf16> to vector<1x4x16xbf16>
    %632 = vector.shape_cast %631 : vector<1x4x16xbf16> to vector<4x16xbf16>
    %c4_534 = arith.constant 4 : index
    %c0_535 = arith.constant 0 : index
    %c0_536 = arith.constant 0 : index
    %633 = vector.load %arg3[%c4_534, %c0_535, %c0_536] : memref<16x16x8xbf16, #tpu.memory_space<vmem>>, vector<1x16x8xbf16>
    %634 = vector.shape_cast %633 : vector<1x16x8xbf16> to vector<16x8xbf16>
    %cst_537 = arith.constant dense<0.000000e+00> : vector<4x8xf32>
    %635 = tpu.matmul %632, %634, %cst_537 {dimension_numbers = #tpu.dot_dimension_numbers<[1], [0], [0], [1], [0, 0, 1, 1], [], []>} : vector<4x16xbf16>, vector<16x8xbf16>, vector<4x8xf32> -> vector<4x8xf32>
    %c3_i32_538 = arith.constant 3 : i32
    %636 = arith.addi %0, %c3_i32_538 : i32
    %c0_i32_539 = arith.constant 0 : i32
    %637 = arith.addi %636, %c0_i32_539 : i32
    %c0_540 = arith.constant 0 : index
    %638 = arith.index_cast %637 : i32 to index
    %c2_541 = arith.constant 2 : index
    %c0_542 = arith.constant 0 : index
    %639 = vector.load %arg2[%c0_540, %638, %c2_541, %c0_542] : memref<1x6x6x16xbf16, #tpu.memory_space<vmem>>, vector<1x1x4x16xbf16>
    %640 = vector.shape_cast %639 : vector<1x1x4x16xbf16> to vector<1x4x16xbf16>
    %641 = vector.shape_cast %640 : vector<1x4x16xbf16> to vector<4x16xbf16>
    %c5_543 = arith.constant 5 : index
    %c0_544 = arith.constant 0 : index
    %c0_545 = arith.constant 0 : index
    %642 = vector.load %arg3[%c5_543, %c0_544, %c0_545] : memref<16x16x8xbf16, #tpu.memory_space<vmem>>, vector<1x16x8xbf16>
    %643 = vector.shape_cast %642 : vector<1x16x8xbf16> to vector<16x8xbf16>
    %cst_546 = arith.constant dense<0.000000e+00> : vector<4x8xf32>
    %644 = tpu.matmul %641, %643, %cst_546 {dimension_numbers = #tpu.dot_dimension_numbers<[1], [0], [0], [1], [0, 0, 1, 1], [], []>} : vector<4x16xbf16>, vector<16x8xbf16>, vector<4x8xf32> -> vector<4x8xf32>
    %645 = arith.addf %635, %644 : vector<4x8xf32>
    %c3_i32_547 = arith.constant 3 : i32
    %646 = arith.addi %0, %c3_i32_547 : i32
    %c1_i32_548 = arith.constant 1 : i32
    %647 = arith.addi %646, %c1_i32_548 : i32
    %c0_549 = arith.constant 0 : index
    %648 = arith.index_cast %647 : i32 to index
    %c1_550 = arith.constant 1 : index
    %c0_551 = arith.constant 0 : index
    %649 = vector.load %arg2[%c0_549, %648, %c1_550, %c0_551] : memref<1x6x6x16xbf16, #tpu.memory_space<vmem>>, vector<1x1x4x16xbf16>
    %650 = vector.shape_cast %649 : vector<1x1x4x16xbf16> to vector<1x4x16xbf16>
    %651 = vector.shape_cast %650 : vector<1x4x16xbf16> to vector<4x16xbf16>
    %c6_552 = arith.constant 6 : index
    %c0_553 = arith.constant 0 : index
    %c0_554 = arith.constant 0 : index
    %652 = vector.load %arg3[%c6_552, %c0_553, %c0_554] : memref<16x16x8xbf16, #tpu.memory_space<vmem>>, vector<1x16x8xbf16>
    %653 = vector.shape_cast %652 : vector<1x16x8xbf16> to vector<16x8xbf16>
    %cst_555 = arith.constant dense<0.000000e+00> : vector<4x8xf32>
    %654 = tpu.matmul %651, %653, %cst_555 {dimension_numbers = #tpu.dot_dimension_numbers<[1], [0], [0], [1], [0, 0, 1, 1], [], []>} : vector<4x16xbf16>, vector<16x8xbf16>, vector<4x8xf32> -> vector<4x8xf32>
    %655 = arith.addf %645, %654 : vector<4x8xf32>
    %c3_i32_556 = arith.constant 3 : i32
    %656 = arith.addi %0, %c3_i32_556 : i32
    %c1_i32_557 = arith.constant 1 : i32
    %657 = arith.addi %656, %c1_i32_557 : i32
    %c0_558 = arith.constant 0 : index
    %658 = arith.index_cast %657 : i32 to index
    %c2_559 = arith.constant 2 : index
    %c0_560 = arith.constant 0 : index
    %659 = vector.load %arg2[%c0_558, %658, %c2_559, %c0_560] : memref<1x6x6x16xbf16, #tpu.memory_space<vmem>>, vector<1x1x4x16xbf16>
    %660 = vector.shape_cast %659 : vector<1x1x4x16xbf16> to vector<1x4x16xbf16>
    %661 = vector.shape_cast %660 : vector<1x4x16xbf16> to vector<4x16xbf16>
    %c7_561 = arith.constant 7 : index
    %c0_562 = arith.constant 0 : index
    %c0_563 = arith.constant 0 : index
    %662 = vector.load %arg3[%c7_561, %c0_562, %c0_563] : memref<16x16x8xbf16, #tpu.memory_space<vmem>>, vector<1x16x8xbf16>
    %663 = vector.shape_cast %662 : vector<1x16x8xbf16> to vector<16x8xbf16>
    %cst_564 = arith.constant dense<0.000000e+00> : vector<4x8xf32>
    %664 = tpu.matmul %661, %663, %cst_564 {dimension_numbers = #tpu.dot_dimension_numbers<[1], [0], [0], [1], [0, 0, 1, 1], [], []>} : vector<4x16xbf16>, vector<16x8xbf16>, vector<4x8xf32> -> vector<4x8xf32>
    %665 = arith.addf %655, %664 : vector<4x8xf32>
    %666 = vector.broadcast %1 : vector<1x8xf32> to vector<4x8xf32>
    %667 = arith.mulf %665, %666 : vector<4x8xf32>
    %668 = vector.broadcast %2 : vector<1x8xf32> to vector<4x8xf32>
    %669 = arith.addf %667, %668 : vector<4x8xf32>
    %cst_565 = arith.constant 0.000000e+00 : f32
    %670 = vector.broadcast %cst_565 : f32 to vector<4x8xf32>
    %671 = arith.maximumf %669, %670 : vector<4x8xf32>
    %c0_566 = arith.constant 0 : index
    %c3_567 = arith.constant 3 : index
    %c0_568 = arith.constant 0 : index
    %c0_569 = arith.constant 0 : index
    %c8_570 = arith.constant 8 : index
    %672 = vector.load %arg6[%c0_566, %c3_567, %c0_568, %c0_569, %c8_570] : memref<1x4x2x4x16xf32, #tpu.memory_space<vmem>>, vector<1x1x1x4x8xf32>
    %673 = vector.shape_cast %672 : vector<1x1x1x4x8xf32> to vector<4x8xf32>
    %674 = vector.shape_cast %671 : vector<4x8xf32> to vector<1x1x1x4x8xf32>
    tpu.vector_store %arg6[%c0_566, %c3_567, %c0_568, %c0_569, %c8_570], %674 {strides = array<i32>} : memref<1x4x2x4x16xf32, #tpu.memory_space<vmem>>, vector<1x1x1x4x8xf32>,
    %c3_i32_571 = arith.constant 3 : i32
    %675 = arith.addi %0, %c3_i32_571 : i32
    %c1_i32_572 = arith.constant 1 : i32
    %676 = arith.addi %675, %c1_i32_572 : i32
    %c0_573 = arith.constant 0 : index
    %677 = arith.index_cast %676 : i32 to index
    %c0_574 = arith.constant 0 : index
    %c0_575 = arith.constant 0 : index
    %678 = vector.load %arg2[%c0_573, %677, %c0_574, %c0_575] : memref<1x6x6x16xbf16, #tpu.memory_space<vmem>>, vector<1x1x4x16xbf16>
    %679 = vector.shape_cast %678 : vector<1x1x4x16xbf16> to vector<1x4x16xbf16>
    %680 = vector.shape_cast %679 : vector<1x4x16xbf16> to vector<4x16xbf16>
    %c8_576 = arith.constant 8 : index
    %c0_577 = arith.constant 0 : index
    %c0_578 = arith.constant 0 : index
    %681 = vector.load %arg3[%c8_576, %c0_577, %c0_578] : memref<16x16x8xbf16, #tpu.memory_space<vmem>>, vector<1x16x8xbf16>
    %682 = vector.shape_cast %681 : vector<1x16x8xbf16> to vector<16x8xbf16>
    %cst_579 = arith.constant dense<0.000000e+00> : vector<4x8xf32>
    %683 = tpu.matmul %680, %682, %cst_579 {dimension_numbers = #tpu.dot_dimension_numbers<[1], [0], [0], [1], [0, 0, 1, 1], [], []>} : vector<4x16xbf16>, vector<16x8xbf16>, vector<4x8xf32> -> vector<4x8xf32>
    %c3_i32_580 = arith.constant 3 : i32
    %684 = arith.addi %0, %c3_i32_580 : i32
    %c1_i32_581 = arith.constant 1 : i32
    %685 = arith.addi %684, %c1_i32_581 : i32
    %c0_582 = arith.constant 0 : index
    %686 = arith.index_cast %685 : i32 to index
    %c1_583 = arith.constant 1 : index
    %c0_584 = arith.constant 0 : index
    %687 = vector.load %arg2[%c0_582, %686, %c1_583, %c0_584] : memref<1x6x6x16xbf16, #tpu.memory_space<vmem>>, vector<1x1x4x16xbf16>
    %688 = vector.shape_cast %687 : vector<1x1x4x16xbf16> to vector<1x4x16xbf16>
    %689 = vector.shape_cast %688 : vector<1x4x16xbf16> to vector<4x16xbf16>
    %c9_585 = arith.constant 9 : index
    %c0_586 = arith.constant 0 : index
    %c0_587 = arith.constant 0 : index
    %690 = vector.load %arg3[%c9_585, %c0_586, %c0_587] : memref<16x16x8xbf16, #tpu.memory_space<vmem>>, vector<1x16x8xbf16>
    %691 = vector.shape_cast %690 : vector<1x16x8xbf16> to vector<16x8xbf16>
    %cst_588 = arith.constant dense<0.000000e+00> : vector<4x8xf32>
    %692 = tpu.matmul %689, %691, %cst_588 {dimension_numbers = #tpu.dot_dimension_numbers<[1], [0], [0], [1], [0, 0, 1, 1], [], []>} : vector<4x16xbf16>, vector<16x8xbf16>, vector<4x8xf32> -> vector<4x8xf32>
    %693 = arith.addf %683, %692 : vector<4x8xf32>
    %c3_i32_589 = arith.constant 3 : i32
    %694 = arith.addi %0, %c3_i32_589 : i32
    %c2_i32_590 = arith.constant 2 : i32
    %695 = arith.addi %694, %c2_i32_590 : i32
    %c0_591 = arith.constant 0 : index
    %696 = arith.index_cast %695 : i32 to index
    %c0_592 = arith.constant 0 : index
    %c0_593 = arith.constant 0 : index
    %697 = vector.load %arg2[%c0_591, %696, %c0_592, %c0_593] : memref<1x6x6x16xbf16, #tpu.memory_space<vmem>>, vector<1x1x4x16xbf16>
    %698 = vector.shape_cast %697 : vector<1x1x4x16xbf16> to vector<1x4x16xbf16>
    %699 = vector.shape_cast %698 : vector<1x4x16xbf16> to vector<4x16xbf16>
    %c10_594 = arith.constant 10 : index
    %c0_595 = arith.constant 0 : index
    %c0_596 = arith.constant 0 : index
    %700 = vector.load %arg3[%c10_594, %c0_595, %c0_596] : memref<16x16x8xbf16, #tpu.memory_space<vmem>>, vector<1x16x8xbf16>
    %701 = vector.shape_cast %700 : vector<1x16x8xbf16> to vector<16x8xbf16>
    %cst_597 = arith.constant dense<0.000000e+00> : vector<4x8xf32>
    %702 = tpu.matmul %699, %701, %cst_597 {dimension_numbers = #tpu.dot_dimension_numbers<[1], [0], [0], [1], [0, 0, 1, 1], [], []>} : vector<4x16xbf16>, vector<16x8xbf16>, vector<4x8xf32> -> vector<4x8xf32>
    %703 = arith.addf %693, %702 : vector<4x8xf32>
    %c3_i32_598 = arith.constant 3 : i32
    %704 = arith.addi %0, %c3_i32_598 : i32
    %c2_i32_599 = arith.constant 2 : i32
    %705 = arith.addi %704, %c2_i32_599 : i32
    %c0_600 = arith.constant 0 : index
    %706 = arith.index_cast %705 : i32 to index
    %c1_601 = arith.constant 1 : index
    %c0_602 = arith.constant 0 : index
    %707 = vector.load %arg2[%c0_600, %706, %c1_601, %c0_602] : memref<1x6x6x16xbf16, #tpu.memory_space<vmem>>, vector<1x1x4x16xbf16>
    %708 = vector.shape_cast %707 : vector<1x1x4x16xbf16> to vector<1x4x16xbf16>
    %709 = vector.shape_cast %708 : vector<1x4x16xbf16> to vector<4x16xbf16>
    %c11_603 = arith.constant 11 : index
    %c0_604 = arith.constant 0 : index
    %c0_605 = arith.constant 0 : index
    %710 = vector.load %arg3[%c11_603, %c0_604, %c0_605] : memref<16x16x8xbf16, #tpu.memory_space<vmem>>, vector<1x16x8xbf16>
    %711 = vector.shape_cast %710 : vector<1x16x8xbf16> to vector<16x8xbf16>
    %cst_606 = arith.constant dense<0.000000e+00> : vector<4x8xf32>
    %712 = tpu.matmul %709, %711, %cst_606 {dimension_numbers = #tpu.dot_dimension_numbers<[1], [0], [0], [1], [0, 0, 1, 1], [], []>} : vector<4x16xbf16>, vector<16x8xbf16>, vector<4x8xf32> -> vector<4x8xf32>
    %713 = arith.addf %703, %712 : vector<4x8xf32>
    %714 = vector.broadcast %1 : vector<1x8xf32> to vector<4x8xf32>
    %715 = arith.mulf %713, %714 : vector<4x8xf32>
    %716 = vector.broadcast %2 : vector<1x8xf32> to vector<4x8xf32>
    %717 = arith.addf %715, %716 : vector<4x8xf32>
    %cst_607 = arith.constant 0.000000e+00 : f32
    %718 = vector.broadcast %cst_607 : f32 to vector<4x8xf32>
    %719 = arith.maximumf %717, %718 : vector<4x8xf32>
    %c0_608 = arith.constant 0 : index
    %c3_609 = arith.constant 3 : index
    %c1_610 = arith.constant 1 : index
    %c0_611 = arith.constant 0 : index
    %c0_612 = arith.constant 0 : index
    %720 = vector.load %arg6[%c0_608, %c3_609, %c1_610, %c0_611, %c0_612] : memref<1x4x2x4x16xf32, #tpu.memory_space<vmem>>, vector<1x1x1x4x8xf32>
    %721 = vector.shape_cast %720 : vector<1x1x1x4x8xf32> to vector<4x8xf32>
    %722 = vector.shape_cast %719 : vector<4x8xf32> to vector<1x1x1x4x8xf32>
    tpu.vector_store %arg6[%c0_608, %c3_609, %c1_610, %c0_611, %c0_612], %722 {strides = array<i32>} : memref<1x4x2x4x16xf32, #tpu.memory_space<vmem>>, vector<1x1x1x4x8xf32>,
    %c3_i32_613 = arith.constant 3 : i32
    %723 = arith.addi %0, %c3_i32_613 : i32
    %c1_i32_614 = arith.constant 1 : i32
    %724 = arith.addi %723, %c1_i32_614 : i32
    %c0_615 = arith.constant 0 : index
    %725 = arith.index_cast %724 : i32 to index
    %c1_616 = arith.constant 1 : index
    %c0_617 = arith.constant 0 : index
    %726 = vector.load %arg2[%c0_615, %725, %c1_616, %c0_617] : memref<1x6x6x16xbf16, #tpu.memory_space<vmem>>, vector<1x1x4x16xbf16>
    %727 = vector.shape_cast %726 : vector<1x1x4x16xbf16> to vector<1x4x16xbf16>
    %728 = vector.shape_cast %727 : vector<1x4x16xbf16> to vector<4x16xbf16>
    %c12_618 = arith.constant 12 : index
    %c0_619 = arith.constant 0 : index
    %c0_620 = arith.constant 0 : index
    %729 = vector.load %arg3[%c12_618, %c0_619, %c0_620] : memref<16x16x8xbf16, #tpu.memory_space<vmem>>, vector<1x16x8xbf16>
    %730 = vector.shape_cast %729 : vector<1x16x8xbf16> to vector<16x8xbf16>
    %cst_621 = arith.constant dense<0.000000e+00> : vector<4x8xf32>
    %731 = tpu.matmul %728, %730, %cst_621 {dimension_numbers = #tpu.dot_dimension_numbers<[1], [0], [0], [1], [0, 0, 1, 1], [], []>} : vector<4x16xbf16>, vector<16x8xbf16>, vector<4x8xf32> -> vector<4x8xf32>
    %c3_i32_622 = arith.constant 3 : i32
    %732 = arith.addi %0, %c3_i32_622 : i32
    %c1_i32_623 = arith.constant 1 : i32
    %733 = arith.addi %732, %c1_i32_623 : i32
    %c0_624 = arith.constant 0 : index
    %734 = arith.index_cast %733 : i32 to index
    %c2_625 = arith.constant 2 : index
    %c0_626 = arith.constant 0 : index
    %735 = vector.load %arg2[%c0_624, %734, %c2_625, %c0_626] : memref<1x6x6x16xbf16, #tpu.memory_space<vmem>>, vector<1x1x4x16xbf16>
    %736 = vector.shape_cast %735 : vector<1x1x4x16xbf16> to vector<1x4x16xbf16>
    %737 = vector.shape_cast %736 : vector<1x4x16xbf16> to vector<4x16xbf16>
    %c13_627 = arith.constant 13 : index
    %c0_628 = arith.constant 0 : index
    %c0_629 = arith.constant 0 : index
    %738 = vector.load %arg3[%c13_627, %c0_628, %c0_629] : memref<16x16x8xbf16, #tpu.memory_space<vmem>>, vector<1x16x8xbf16>
    %739 = vector.shape_cast %738 : vector<1x16x8xbf16> to vector<16x8xbf16>
    %cst_630 = arith.constant dense<0.000000e+00> : vector<4x8xf32>
    %740 = tpu.matmul %737, %739, %cst_630 {dimension_numbers = #tpu.dot_dimension_numbers<[1], [0], [0], [1], [0, 0, 1, 1], [], []>} : vector<4x16xbf16>, vector<16x8xbf16>, vector<4x8xf32> -> vector<4x8xf32>
    %741 = arith.addf %731, %740 : vector<4x8xf32>
    %c3_i32_631 = arith.constant 3 : i32
    %742 = arith.addi %0, %c3_i32_631 : i32
    %c2_i32_632 = arith.constant 2 : i32
    %743 = arith.addi %742, %c2_i32_632 : i32
    %c0_633 = arith.constant 0 : index
    %744 = arith.index_cast %743 : i32 to index
    %c1_634 = arith.constant 1 : index
    %c0_635 = arith.constant 0 : index
    %745 = vector.load %arg2[%c0_633, %744, %c1_634, %c0_635] : memref<1x6x6x16xbf16, #tpu.memory_space<vmem>>, vector<1x1x4x16xbf16>
    %746 = vector.shape_cast %745 : vector<1x1x4x16xbf16> to vector<1x4x16xbf16>
    %747 = vector.shape_cast %746 : vector<1x4x16xbf16> to vector<4x16xbf16>
    %c14_636 = arith.constant 14 : index
    %c0_637 = arith.constant 0 : index
    %c0_638 = arith.constant 0 : index
    %748 = vector.load %arg3[%c14_636, %c0_637, %c0_638] : memref<16x16x8xbf16, #tpu.memory_space<vmem>>, vector<1x16x8xbf16>
    %749 = vector.shape_cast %748 : vector<1x16x8xbf16> to vector<16x8xbf16>
    %cst_639 = arith.constant dense<0.000000e+00> : vector<4x8xf32>
    %750 = tpu.matmul %747, %749, %cst_639 {dimension_numbers = #tpu.dot_dimension_numbers<[1], [0], [0], [1], [0, 0, 1, 1], [], []>} : vector<4x16xbf16>, vector<16x8xbf16>, vector<4x8xf32> -> vector<4x8xf32>
    %751 = arith.addf %741, %750 : vector<4x8xf32>
    %c3_i32_640 = arith.constant 3 : i32
    %752 = arith.addi %0, %c3_i32_640 : i32
    %c2_i32_641 = arith.constant 2 : i32
    %753 = arith.addi %752, %c2_i32_641 : i32
    %c0_642 = arith.constant 0 : index
    %754 = arith.index_cast %753 : i32 to index
    %c2_643 = arith.constant 2 : index
    %c0_644 = arith.constant 0 : index
    %755 = vector.load %arg2[%c0_642, %754, %c2_643, %c0_644] : memref<1x6x6x16xbf16, #tpu.memory_space<vmem>>, vector<1x1x4x16xbf16>
    %756 = vector.shape_cast %755 : vector<1x1x4x16xbf16> to vector<1x4x16xbf16>
    %757 = vector.shape_cast %756 : vector<1x4x16xbf16> to vector<4x16xbf16>
    %c15_645 = arith.constant 15 : index
    %c0_646 = arith.constant 0 : index
    %c0_647 = arith.constant 0 : index
    %758 = vector.load %arg3[%c15_645, %c0_646, %c0_647] : memref<16x16x8xbf16, #tpu.memory_space<vmem>>, vector<1x16x8xbf16>
    %759 = vector.shape_cast %758 : vector<1x16x8xbf16> to vector<16x8xbf16>
    %cst_648 = arith.constant dense<0.000000e+00> : vector<4x8xf32>
    %760 = tpu.matmul %757, %759, %cst_648 {dimension_numbers = #tpu.dot_dimension_numbers<[1], [0], [0], [1], [0, 0, 1, 1], [], []>} : vector<4x16xbf16>, vector<16x8xbf16>, vector<4x8xf32> -> vector<4x8xf32>
    %761 = arith.addf %751, %760 : vector<4x8xf32>
    %762 = vector.broadcast %1 : vector<1x8xf32> to vector<4x8xf32>
    %763 = arith.mulf %761, %762 : vector<4x8xf32>
    %764 = vector.broadcast %2 : vector<1x8xf32> to vector<4x8xf32>
    %765 = arith.addf %763, %764 : vector<4x8xf32>
    %cst_649 = arith.constant 0.000000e+00 : f32
    %766 = vector.broadcast %cst_649 : f32 to vector<4x8xf32>
    %767 = arith.maximumf %765, %766 : vector<4x8xf32>
    %c0_650 = arith.constant 0 : index
    %c3_651 = arith.constant 3 : index
    %c1_652 = arith.constant 1 : index
    %c0_653 = arith.constant 0 : index
    %c8_654 = arith.constant 8 : index
    %768 = vector.load %arg6[%c0_650, %c3_651, %c1_652, %c0_653, %c8_654] : memref<1x4x2x4x16xf32, #tpu.memory_space<vmem>>, vector<1x1x1x4x8xf32>
    %769 = vector.shape_cast %768 : vector<1x1x1x4x8xf32> to vector<4x8xf32>
    %770 = vector.shape_cast %767 : vector<4x8xf32> to vector<1x1x1x4x8xf32>
    tpu.vector_store %arg6[%c0_650, %c3_651, %c1_652, %c0_653, %c8_654], %770 {strides = array<i32>} : memref<1x4x2x4x16xf32, #tpu.memory_space<vmem>>, vector<1x1x1x4x8xf32>,
    return
  }
  func.func @transform_0(%arg0: i32, %arg1: i32) -> (i32, i32, i32, i32) {
    %c0_i32 = arith.constant 0 : i32
    %c0_i32_0 = arith.constant 0 : i32
    %c0_i32_1 = arith.constant 0 : i32
    %c0_i32_2 = arith.constant 0 : i32
    return %arg0, %c0_i32, %c0_i32_0, %c0_i32_1 : i32, i32, i32, i32
  }
  func.func @transform_1(%arg0: i32, %arg1: i32) -> (i32, i32, i32) {
    %c0_i32 = arith.constant 0 : i32
    %c0_i32_0 = arith.constant 0 : i32
    %c0_i32_1 = arith.constant 0 : i32
    %c0_i32_2 = arith.constant 0 : i32
    return %c0_i32, %c0_i32_0, %c0_i32_1 : i32, i32, i32
  }
  func.func @transform_2(%arg0: i32, %arg1: i32) -> (i32, i32) {
    %c0_i32 = arith.constant 0 : i32
    %c0_i32_0 = arith.constant 0 : i32
    %c0_i32_1 = arith.constant 0 : i32
    return %c0_i32, %c0_i32_0 : i32, i32
  }
  func.func @transform_3(%arg0: i32, %arg1: i32) -> (i32, i32) {
    %c0_i32 = arith.constant 0 : i32
    %c0_i32_0 = arith.constant 0 : i32
    %c0_i32_1 = arith.constant 0 : i32
    return %c0_i32, %c0_i32_0 : i32, i32
  }
  func.func @transform_4(%arg0: i32, %arg1: i32) -> (i32, i32, i32, i32, i32) {
    %c0_i32 = arith.constant 0 : i32
    %c0_i32_0 = arith.constant 0 : i32
    %c0_i32_1 = arith.constant 0 : i32
    %c0_i32_2 = arith.constant 0 : i32
    return %arg0, %arg1, %c0_i32, %c0_i32_0, %c0_i32_1 : i32, i32, i32, i32, i32
  }
}

</mosaic_0001>

<bundles_post_ra>
// kernel: tpu_custom_call.1
= control target key start
LH: loop header
LB: loop body
LE: loop exit
PB: predicated region body
PF: predicated region fallthrough
CT: control target
= control target key end

     0   :  { %9 = vsyncpa [#allocation3], 0  ;;  %s3757_s0 = inlined_call_operand.vmem [shape: bf16[2,6,6,16], index: 0, kind: input, shape index: {}]   ;;  %s3758_s1 = inlined_call_operand.vmem [shape: bf16[16,16,8], index: 1, kind: input, shape index: {}]   ;;  %s3759_s2 = inlined_call_operand.vmem [shape: f32[1,8], index: 2, kind: input, shape index: {}]   ;;  %s3760_s3 = inlined_call_operand.vmem [shape: f32[1,8], index: 3, kind: input, shape index: {}]   ;;  %s3761_s4 = inlined_call_operand.hbm [shape: f32[2,4,2,4,16], index: 4, kind: output, shape index: {}]  }
   0x1   :  { %11 = vsyncpa [#allocation3 + $0x1], 0  ;;  %s3249_s15 = smov 0   ;;  %s3251_s16 = smov 0  }
   0x2   :  { %s3253_s17 = smov 0   ;;  %s3255_s18 = smov 0  }
   0x3   :  { %s3257_s19 = smov 0   ;;  %s3259_s20 = smov 0  }
   0x4 LB: > { %s2489_s21 = sadd.s32 4294967295, %s3219_s20   ;;  %s2490_s22 = sadd.s32 4294967294, %s3219_s20   ;;  %s3219_s20 = sphi %s3259_s20, %s17_s20   ;;  %s3215_s19 = sphi %s3257_s19, %s3768_s19   ;;  %s3211_s18 = sphi %s3255_s18, %s3767_s18   ;;  %s3207_s17 = sphi %s3253_s17, %s3766_s17   ;;  %s3203_s16 = sphi %s3251_s16, %s3765_s16   ;;  %s3199_s15 = sphi %s3249_s15, %s3764_s15  }
   0x5   : > { %s29_s23 = sadd.s32 1, %s3215_s19  ;;  %s127_s24 = sadd.s32 1, %s3207_s17 }
   0x6   : > { %p31_p0 = scmp.ge.s32.totalorder %s29_s23, 2  ;;  %p137_p1 = scmp.ne.s32.totalorder %s3207_s17, %s3203_s16 }
   0x7   : > { %p138_p2 = scmp.eq.s32.totalorder %s2489_s21, 1  ;;  %p143_p3 = scmp.ne.s32.totalorder %s3203_s16, %s3199_s15 }
   0x8   : > { %s3770_s23 = smov (%p31_p0, %s29_s23), 0  ;;  %p144_p5 = scmp.eq.s32.totalorder %s2490_s22, 1 }
   0x9   : > { %p3289_p4 = por %p138_p2, %p137_p1  ;;  %s122_s26 = ssub.s32 %s3215_s19, %s3770_s23 }
   0xa   : > { %p2493_p6 = scmp.ge.s32.totalorder %s3219_s20, 1  ;;  %p125_p7 = scmp.eq.s32.totalorder %s122_s26, 0 }
   0xb   : > { %p3296_p8 = por %p144_p5, %p143_p3  ;;  %p179_p9 = scmp.lt.s32.totalorder %s3219_s20, 3 }
   0xc   : > { %s3302_s28 = scalar_select %p125_p7, %s3207_s17, %s127_s24  }
   0xd   : > { %p180_p10 = pnand %p2493_p6, %p179_p9 }
   0xe   : > { %p205_p11 = scmp.lt.s32.totalorder (!%p180_p10), %s3211_s18, 1  ;;  %s202_s10 = sand.u32 (!%p180_p10), 1, %s3203_s16  }
   0xf   : > { %183 = sbr.rel (%p180_p10) target bundleno = 536 (0x218), region = 36  ;;  %s2494_s14 = sshll.u32 (!%p180_p10), %s202_s10, 5 }
  0x10   : > { %s3547_s24 = scalar_lea.vmem (!%p180_p10), [#allocation2], %s2494_s14  ;;  %s3221_s8 = smov (!%p180_p10), 8  }
  0x11   : > { %s2391_s29 = sshll.u32 (!%p180_p10), %s3547_s24, 4  ;;  %s3161_s9 = scalar_lea.hbm (!%p180_p10), %s3761_s4, 64  ;;  %s2392_s29 = int_to_ptr.vmem [resolvable:$true] %s2391_s29 }
  0x14   : > { %v3017_v0 = vld [vmem:[%s3758_s1 + $0x10] sm:$0xff]  ;;  %v3015_v1 = vld [vmem:[%s3758_s1] sm:$0xff]  ;;  %v3016_v2 = vld [vmem:[%s3758_s1 + $0x8] sm:$0xff]  ;;  %s206_s21 = scalar_select %p205_p11, %s3211_s18, 1  ;;  %vm240_vm0 = vcmask 130048   ;;  %vm355_vm1 = vcmask 60416  }
  0x15   : > { %v3018_v3 = vld [vmem:[%s3758_s1 + $0x18] sm:$0xff]  ;;  %v3021_v4 = vld [vmem:[%s3758_s1 + $0x30] sm:$0xff]  ;;  %302 = vmatpush.bf16.msra.mxu2 %v3017_v0  ;;  %273 = vmatpush.bf16.msra.mxu1 %v3015_v1  ;;  %v3020_v6 = vld [vmem:[%s3758_s1 + $0x28] sm:$0xff]  ;;  %vm498_vm2 = vcmask 126016  }
  0x16   : > { %v3022_v5 = vld [vmem:[%s3758_s1 + $0x38] sm:$0xff]  ;;  %v3019_v7 = vld [vmem:[%s3758_s1 + $0x20] sm:$0xff]  ;;  %251 = vmatpush.bf16.msra.mxu0 %v3016_v2  ;;  %339 = vmatpush.bf16.msra.mxu3 %v3018_v3  ;;  %s3080_s30 = smul.u32 24, %s206_s21  ;;  %v3025_v8 = vld [vmem:[%s3758_s1 + $0x50] sm:$0xff] }
  0x17   : > { %v3023_v9 = vld [vmem:[%s3758_s1 + $0x40] sm:$0xff]  ;;  %v3024_v33 = vld [vmem:[%s3758_s1 + $0x48] sm:$0xff]  ;;  %v3026_v38 = vld [vmem:[%s3758_s1 + $0x58] sm:$0xff] }
  0x18   : > { %s3339_s11 = scalar_lea.vmem %s3757_s0, %s3080_s30  ;;  %v3029_v44 = vld [vmem:[%s3758_s1 + $0x70] sm:$0xff]  ;;  %v3027_v45 = vld [vmem:[%s3758_s1 + $0x60] sm:$0xff]  ;;  %v3028_v56 = vld [vmem:[%s3758_s1 + $0x68] sm:$0xff] }
  0x19   : > { %453 = vmatpush.bf16.msrb.mxu2 %v3021_v4  ;;  %417 = vmatpush.bf16.msrb.mxu1 %v3019_v7  ;;  %v2508_v10 = vld [vmem:[%s3339_s11 + $0x4] sm:$0x3]  ;;  %v217_v11 = vld [vmem:[%s3339_s11] sm:$0x3]  ;;  %v2578_v51 = vld [vmem:[%s3339_s11 + $0x8] sm:$0x7] }
  0x1a   : > { %484 = vmatpush.bf16.msrb.mxu3 %v3022_v5  ;;  %385 = vmatpush.bf16.msrb.mxu0 %v3020_v6  ;;  %v220_v12 = vld [vmem:[%s3339_s11] sm:$0x7]  ;;  %v2516_v14 = vld [vmem:[%s3339_s11 + $0x4] sm:$0x7]  ;;  %v597_v55 = vunpack.c.l.b16 %v2578_v51  ;;  %v3030_v57 = vld [vmem:[%s3758_s1 + $0x78] sm:$0xff] }
  0x1b   : > { %2515 = vmatmul.msk.bf16.vlgmr.msra.gmra.mxu2 %vm240_vm0, %v2508_v10  ;;  %2507 = vmatmul.msk.bf16.vlgmr.msra.gmra.mxu1 %vm240_vm0, %v217_v11  ;;  %v225_v13 = vunpack.c.l.b16 %v220_v12  ;;  %v2538_v15 = vld [vmem:[%s3339_s11 + $0x4] sm:$0x7]  ;;  %v357_v16 = vld [vmem:[%s3339_s11] sm:$0x7]  ;;  %v314_v17 = vunpack.c.l.b16 %v2516_v14  ;;  %v2603_v58 = vld [vmem:[%s3339_s11 + $0x8] sm:$0x7] }
  0x1c   : > { %v428_v18 = vunpack.c.l.b16 %v2538_v15  ;;  %v392_v19 = vunpack.c.l.b16 %v357_v16  ;;  %v361_v40 = vld [vmem:[%s3339_s11] sm:$0x6]  ;;  %v2546_v43 = vld [vmem:[%s3339_s11 + $0x4] sm:$0x6]  ;;  %v598_v61 = vpack.c.b16 %v597_v55, %v597_v55  ;;  %v2570_v62 = vld [vmem:[%s3339_s11 + $0x8] sm:$0x3]  ;;  %v705_v63 = vunpack.c.l.b16 %v2603_v58 }
  0x1d   : > { %585 = vmatpush.bf16.msra.mxu2 %v3025_v8  ;;  %556 = vmatpush.bf16.msra.mxu1 %v3023_v9  ;;  %v226_v20 = vpack.c.b16 %v225_v13, %v225_v13  ;;  %v315_v21 = vpack.c.b16 %v314_v17, %v314_v17  ;;  %v366_v46 = vunpack.c.l.b16 %v361_v40  ;;  %v465_v47 = vunpack.c.l.b16 %v2546_v43  ;;  %v2557_v50 = vld [vmem:[%s3339_s11 + $0x4] sm:$0x7]  ;;  %v3033_v2 = vld [vmem:[%s3758_s1 + $0x10] sm:$0xff]  ;;  %v3032_v16 = vld [vmem:[%s3758_s1 + $0x8] sm:$0xff] }
  0x1e   : > { %v429_v22 = vpack.c.b16 %v428_v18, %v428_v18  ;;  %v393_v23 = vpack.c.b16 %v392_v19, %v392_v19  ;;  %v509_v53 = vunpack.c.l.b16 %v2557_v50  ;;  %v2587_v59 = vld [vmem:[%s3339_s11 + $0x4] sm:$0x7]  ;;  %v602_v5 = vshll.u32 %v598_v61, 16  ;;  %v2667_v40 = vld [vmem:[%s3339_s11 + $0x8] sm:$0x7] }
  0x1f   : > { %v228_v24 = vshrl.u32 %v226_v20, 16  ;;  %v230_v25 = vshll.u32 %v226_v20, 16  ;;  %v317_v26 = vshrl.u32 %v315_v21, 16  ;;  %v319_v27 = vshll.u32 %v315_v21, 16  ;;  %v2554_v1 = vld [vmem:[%s3339_s11 + $0x4] sm:$0x3] }
  0x20   : > { %v433_v28 = vshll.u32 %v429_v22, 16  ;;  %v397_v30 = vshll.u32 %v393_v23, 16  ;;  %v431_v32 = vshrl.u32 %v429_v22, 16  ;;  %v395_v36 = vshrl.u32 %v393_v23, 16  ;;  %v3031_v3 = vld [vmem:[%s3758_s1] sm:$0xff]  ;;  %v3034_v21 = vld [vmem:[%s3758_s1 + $0x18] sm:$0xff] }
  0x21   : > { %v232_v29 = vrot.slane %v230_v25, 1  ;;  %v321_v31 = vrot.slane %v319_v27, 1  ;;  %v367_v48 = vpack.c.b16 %v366_v46, %v366_v46  ;;  %v466_v49 = vpack.c.b16 %v465_v47, %v465_v47  ;;  %v2590_v22 = vld [vmem:[%s3339_s11 + $0x4] sm:$0x6]  ;;  %v2611_v25 = vld [vmem:[%s3339_s11 + $0x8] sm:$0x6] }
  0x22   : > { %v435_v35 = vrot.slane %v433_v28, 1  ;;  %v399_v37 = vrot.slane %v397_v30, 1  ;;  %v510_v60 = vpack.c.b16 %v509_v53, %v509_v53  ;;  %v669_v0 = vunpack.c.l.b16 %v2587_v59  ;;  %v3035_v27 = vld [vmem:[%s3758_s1 + $0x20] sm:$0xff] }
  0x23   : > { %v233_v34 = vor.u32 %v232_v29, %v228_v24  ;;  %v322_v39 = vor.u32 %v321_v31, %v317_v26  ;;  %v368_v52 = vrot.slane %v367_v48, 1  ;;  %v467_v54 = vrot.slane %v466_v49, 1  ;;  %v3037_v26 = vld [vmem:[%s3758_s1 + $0x30] sm:$0xff]  ;;  %v2620_v47 = vld [vmem:[%s3339_s11 + $0x4] sm:$0x3] }
  0x24   : > { %v436_v41 = vor.u32 %v435_v35, %v431_v32  ;;  %v400_v42 = vor.u32 %v399_v37, %v395_v36  ;;  %v514_v4 = vshll.u32 %v510_v60, 16  ;;  %v706_v6 = vpack.c.b16 %v705_v63, %v705_v63  ;;  %v2621_v32 = vld [vmem:[%s3339_s11 + $0x4] sm:$0x7]  ;;  %v3041_v48 = vld [vmem:[%s3758_s1 + $0x50] sm:$0xff] }
  0x25   : > { %2502 = vmatmul.msk.bf16.vlgmr.msra.gmra.mxu0 %vm240_vm0, %v233_v34  ;;  %2523 = vmatmul.msk.bf16.vlgmr.msra.gmra.mxu3 %vm240_vm0, %v322_v39  ;;  %v670_v7 = vpack.c.b16 %v669_v0, %v669_v0  ;;  %v512_v8 = vshrl.u32 %v510_v60, 16  ;;  %v600_v10 = vshrl.u32 %v598_v61, 16  ;;  %v604_v11 = vrot.slane %v602_v5, 1  ;;  %v3038_v39 = vld [vmem:[%s3758_s1 + $0x38] sm:$0xff]  ;;  %v3039_v49 = vld [vmem:[%s3758_s1 + $0x40] sm:$0xff] }
  0x26   : > { %534 = vmatpush.bf16.msra.mxu0 %v3024_v33  ;;  %622 = vmatpush.bf16.msra.mxu3 %v3026_v38  ;;  %v516_v9 = vrot.slane %v514_v4, 1  ;;  %v710_v12 = vshll.u32 %v706_v6, 16  ;;  %v708_v17 = vshrl.u32 %v706_v6, 16  ;;  %v643_v28 = vunpack.c.l.b16 %v2590_v22  ;;  %v2642_v33 = vld [vmem:[%s3339_s11 + $0x8] sm:$0x7] }
  0x27   : > { %v674_v13 = vshll.u32 %v670_v7, 16  ;;  %v605_v15 = vor.u32 %v604_v11, %v600_v10  ;;  %v672_v19 = vshrl.u32 %v670_v7, 16  ;;  %v742_v29 = vunpack.c.l.b16 %v2611_v25  ;;  %v3036_v38 = vld [vmem:[%s3758_s1 + $0x28] sm:$0xff]  ;;  %v2654_v4 = vld [vmem:[%s3339_s11 + $0x4] sm:$0x6] }
  0x28   : > { %v517_v14 = vor.u32 %v516_v9, %v512_v8  ;;  %v712_v18 = vrot.slane %v710_v12, 1  ;;  %v644_v30 = vpack.c.b16 %v643_v28, %v643_v28  ;;  %v783_v35 = vunpack.c.l.b16 %v2621_v32  ;;  %v2675_v7 = vld [vmem:[%s3339_s11 + $0x8] sm:$0x6]  ;;  %v3045_v8 = vld [vmem:[%s3758_s1 + $0x70] sm:$0xff]  ;;  %v3043_v9 = vld [vmem:[%s3758_s1 + $0x60] sm:$0xff] }
  0x29   : > { %v676_v20 = vrot.slane %v674_v13, 1  ;;  %v743_v31 = vpack.c.b16 %v742_v29, %v742_v29  ;;  %v866_v37 = vunpack.c.l.b16 %v2642_v33  ;;  %v910_v10 = vunpack.c.l.b16 %v2654_v4  ;;  %v2733_v22 = vld [vmem:[%s3339_s11 + $0xc] sm:$0x7]  ;;  %v2684_v29 = vld [vmem:[%s3339_s11 + $0x8] sm:$0x3] }
  0x2a   : > { %v713_v23 = vor.u32 %v712_v18, %v708_v17  ;;  %v645_v34 = vrot.slane %v644_v30, 1  ;;  %v1007_v11 = vunpack.c.l.b16 %v2675_v7  ;;  %v3049_v30 = vld [vmem:[%s3758_s1 + $0x10] sm:$0xff]  ;;  %v2797_v4 = vld [vmem:[%s3339_s11 + $0xc] sm:$0x7] }
  0x2b   : > { %2545 = vmatmul.msk.bf16.vlgmr.msrb.gmra.mxu2 %vm240_vm0, %v436_v41  ;;  %2537 = vmatmul.msk.bf16.vlgmr.msrb.gmra.mxu1 %vm240_vm0, %v400_v42  ;;  %v677_v24 = vor.u32 %v676_v20, %v672_v19  ;;  %v744_v36 = vrot.slane %v743_v31, 1  ;;  %v2651_v41 = vld [vmem:[%s3339_s11 + $0x4] sm:$0x7]  ;;  %v784_v42 = vpack.c.b16 %v783_v35, %v783_v35  ;;  %v867_v43 = vpack.c.b16 %v866_v37, %v866_v37  ;;  %v3044_v20 = vld [vmem:[%s3758_s1 + $0x68] sm:$0xff] }
  0x2c   : > { %730 = vmatpush.bf16.msrb.mxu2 %v3029_v44  ;;  %694 = vmatpush.bf16.msrb.mxu1 %v3027_v45  ;;  %v2634_v44 = vld [vmem:[%s3339_s11 + $0x8] sm:$0x3]  ;;  %v971_v45 = vunpack.c.l.b16 %v2667_v40  ;;  %v936_v46 = vunpack.c.l.b16 %v2651_v41  ;;  %v911_v12 = vpack.c.b16 %v910_v10, %v910_v10  ;;  %v1008_v13 = vpack.c.b16 %v1007_v11, %v1007_v11  ;;  %v3047_v31 = vld [vmem:[%s3758_s1] sm:$0xff] }
  0x2d   : > { %v788_v50 = vshll.u32 %v784_v42, 16  ;;  %v871_v51 = vshll.u32 %v867_v43, 16 }
  0x2e   : > { %v937_v53 = vpack.c.b16 %v936_v46, %v936_v46  ;;  %v1009_v18 = vrot.slane %v1008_v13, 1  ;;  %v3057_v13 = vld [vmem:[%s3758_s1 + $0x50] sm:$0xff] }
  0x2f   : > { %v790_v55 = vrot.slane %v788_v50, 1  ;;  %v2720_v50 = vld [vmem:[%s3339_s11 + $0x8] sm:$0x6] }
  0x30   : > { %v941_v59 = vshll.u32 %v937_v53, 16 }
  0x35   : > { %2532 = vmatmul.msk.bf16.vlgmr.msrb.gmra.mxu0 %vm240_vm0, %v368_v52  ;;  %2553 = vmatmul.msk.bf16.vlgmr.msrb.gmra.mxu3 %vm240_vm0, %v467_v54  ;;  %v972_v52 = vpack.c.b16 %v971_v45, %v971_v45  ;;  %v786_v54 = vshrl.u32 %v784_v42, 16 }
  0x36   : > { %662 = vmatpush.bf16.msrb.mxu0 %v3028_v56  ;;  %761 = vmatpush.bf16.msrb.mxu3 %v3030_v57  ;;  %v869_v56 = vshrl.u32 %v867_v43, 16  ;;  %v873_v57 = vrot.slane %v871_v51, 1 }
  0x37   : > { %v976_v58 = vshll.u32 %v972_v52, 16  ;;  %v791_v60 = vor.u32 %v790_v55, %v786_v54  ;;  %v974_v63 = vshrl.u32 %v972_v52, 16  ;;  %v3053_v54 = vld [vmem:[%s3758_s1 + $0x30] sm:$0xff]  ;;  %v3051_v55 = vld [vmem:[%s3758_s1 + $0x20] sm:$0xff] }
  0x38   : > { %v874_v61 = vor.u32 %v873_v57, %v869_v56  ;;  %v1178_v56 = vunpack.c.l.b16 %v2720_v50  ;;  %v3534_v50 = vld [vmem:[%s3760_s3] ss:$0 sm:$0xff] }
  0x39   : > { %v978_v0 = vrot.slane %v976_v58, 1 }
  0x3a   : > { %v1179_v58 = vpack.c.b16 %v1178_v56, %v1178_v56 }
  0x3b   : > { %2577 = vmatmul.msk.bf16.vlgmr.msra.gmra.mxu2 %vm240_vm0, %v2570_v62  ;;  %2569 = vmatmul.msk.bf16.vlgmr.msra.gmra.mxu1 %vm240_vm0, %v2554_v1  ;;  %v3040_v62 = vld [vmem:[%s3758_s1 + $0x48] sm:$0xff]  ;;  %v939_v1 = vshrl.u32 %v937_v53, 16  ;;  %v979_v5 = vor.u32 %v978_v0, %v974_v63 }
  0x3c   : > { %855 = vmatpush.bf16.msra.mxu2 %v3033_v2  ;;  %830 = vmatpush.bf16.msra.mxu1 %v3031_v3  ;;  %v943_v2 = vrot.slane %v941_v59, 1  ;;  %v3042_v3 = vld [vmem:[%s3758_s1 + $0x58] sm:$0xff]  ;;  %v2741_v53 = vld [vmem:[%s3339_s11 + $0xc] sm:$0x6] }
  0x3d   : > { %v1275_v57 = vunpack.c.l.b16 %v2741_v53 }
  0x3e   : > { %v944_v6 = vor.u32 %v943_v2, %v939_v1  ;;  %v3052_v2 = vld [vmem:[%s3758_s1 + $0x28] sm:$0xff] }
  0x3f   : > { %v1276_v59 = vpack.c.b16 %v1275_v57, %v1275_v57 }
  0x41   : > { %v1277_v0 = vrot.slane %v1276_v59, 1  ;;  %v2838_v59 = vld [vmem:[%s3339_s11 + $0x10] sm:$0x7] }
  0x45   : > { %2564 = vmatmul.msk.bf16.vlgmr.msra.gmra.mxu0 %vm240_vm0, %v517_v14  ;;  %2585 = vmatmul.msk.bf16.vlgmr.msra.gmra.mxu3 %vm240_vm0, %v605_v15  ;;  %v2687_v14 = vld [vmem:[%s3339_s11 + $0x8] sm:$0x7]  ;;  %v2708_v15 = vld [vmem:[%s3339_s11 + $0xc] sm:$0x7] }
  0x46   : > { %808 = vmatpush.bf16.msra.mxu0 %v3032_v16  ;;  %891 = vmatpush.bf16.msra.mxu3 %v3034_v21  ;;  %v912_v16 = vrot.slane %v911_v12, 1  ;;  %v1048_v17 = vunpack.c.l.b16 %v2687_v14  ;;  %v1134_v19 = vunpack.c.l.b16 %v2708_v15  ;;  %v3046_v21 = vld [vmem:[%s3758_s1 + $0x78] sm:$0xff]  ;;  %v2750_v12 = vld [vmem:[%s3339_s11 + $0x8] sm:$0x3]  ;;  %v3055_v14 = vld [vmem:[%s3758_s1 + $0x40] sm:$0xff] }
  0x48   : > { %v1135_v25 = vpack.c.b16 %v1134_v19, %v1134_v19 }
  0x4a   : > { %v1139_v33 = vshll.u32 %v1135_v25, 16 }
  0x4b   : > { %2610 = vmatmul.msk.bf16.vlgmr.msrb.gmra.mxu2 %vm240_vm0, %v713_v23  ;;  %2602 = vmatmul.msk.bf16.vlgmr.msrb.gmra.mxu1 %vm240_vm0, %v677_v24  ;;  %v2717_v23 = vld [vmem:[%s3339_s11 + $0x8] sm:$0x7]  ;;  %v1049_v24 = vpack.c.b16 %v1048_v17, %v1048_v17 }
  0x4c   : > { %996 = vmatpush.bf16.msrb.mxu2 %v3037_v26  ;;  %961 = vmatpush.bf16.msrb.mxu1 %v3035_v27  ;;  %v2700_v26 = vld [vmem:[%s3339_s11 + $0xc] sm:$0x3]  ;;  %v1239_v27 = vunpack.c.l.b16 %v2733_v22  ;;  %v1204_v28 = vunpack.c.l.b16 %v2717_v23 }
  0x4d   : > { %v1053_v32 = vshll.u32 %v1049_v24, 16 }
  0x4e   : > { %v1205_v35 = vpack.c.b16 %v1204_v28, %v1204_v28 }
  0x4f   : > { %v1055_v37 = vrot.slane %v1053_v32, 1 }
  0x50   : > { %v1209_v41 = vshll.u32 %v1205_v35, 16 }
  0x55   : > { %2597 = vmatmul.msk.bf16.vlgmr.msrb.gmra.mxu0 %vm240_vm0, %v645_v34  ;;  %2618 = vmatmul.msk.bf16.vlgmr.msrb.gmra.mxu3 %vm240_vm0, %v744_v36  ;;  %v1240_v34 = vpack.c.b16 %v1239_v27, %v1239_v27  ;;  %v1051_v36 = vshrl.u32 %v1049_v24, 16 }
  0x56   : > { %929 = vmatpush.bf16.msrb.mxu0 %v3036_v38  ;;  %1026 = vmatpush.bf16.msrb.mxu3 %v3038_v39  ;;  %v1137_v38 = vshrl.u32 %v1135_v25, 16  ;;  %v1141_v39 = vrot.slane %v1139_v33, 1 }
  0x57   : > { %v1244_v40 = vshll.u32 %v1240_v34, 16  ;;  %v1056_v42 = vor.u32 %v1055_v37, %v1051_v36  ;;  %v1242_v45 = vshrl.u32 %v1240_v34, 16  ;;  %v3058_v36 = vld [vmem:[%s3758_s1 + $0x58] sm:$0xff] }
  0x58   : > { %v1142_v43 = vor.u32 %v1141_v39, %v1137_v38  ;;  %v2784_v39 = vld [vmem:[%s3339_s11 + $0x8] sm:$0x6] }
  0x59   : > { %v1246_v46 = vrot.slane %v1244_v40, 1 }
  0x5b   : > { %2641 = vmatmul.msk.bf16.vlgmr.msra.gmra.mxu2 %vm240_vm0, %v2634_v44  ;;  %2633 = vmatmul.msk.bf16.vlgmr.msra.gmra.mxu1 %vm240_vm0, %v2620_v47  ;;  %v3048_v44 = vld [vmem:[%s3758_s1 + $0x8] sm:$0xff]  ;;  %v1207_v47 = vshrl.u32 %v1205_v35, 16  ;;  %v1247_v51 = vor.u32 %v1246_v46, %v1242_v45  ;;  %v3061_v45 = vld [vmem:[%s3758_s1 + $0x70] sm:$0xff]  ;;  %v3059_v46 = vld [vmem:[%s3758_s1 + $0x60] sm:$0xff] }
  0x5c   : > { %1123 = vmatpush.bf16.msra.mxu2 %v3041_v48  ;;  %1095 = vmatpush.bf16.msra.mxu1 %v3039_v49  ;;  %v1211_v48 = vrot.slane %v1209_v41, 1  ;;  %v3050_v49 = vld [vmem:[%s3758_s1 + $0x18] sm:$0xff] }
  0x5e   : > { %v1212_v52 = vor.u32 %v1211_v48, %v1207_v47  ;;  %v1443_v48 = vunpack.c.l.b16 %v2784_v39 }
  0x65   : > { %2628 = vmatmul.msk.bf16.vlgmr.msra.gmra.mxu0 %vm240_vm0, %v791_v60  ;;  %2649 = vmatmul.msk.bf16.vlgmr.msra.gmra.mxu3 %vm240_vm0, %v874_v61  ;;  %v2751_v60 = vld [vmem:[%s3339_s11 + $0x8] sm:$0x7]  ;;  %v2772_v61 = vld [vmem:[%s3339_s11 + $0xc] sm:$0x7] }
  0x66   : > { %1073 = vmatpush.bf16.msra.mxu0 %v3040_v62  ;;  %1159 = vmatpush.bf16.msra.mxu3 %v3042_v3  ;;  %v1180_v62 = vrot.slane %v1179_v58, 1  ;;  %v1316_v63 = vunpack.c.l.b16 %v2751_v60  ;;  %v1399_v1 = vunpack.c.l.b16 %v2772_v61  ;;  %v3054_v3 = vld [vmem:[%s3758_s1 + $0x38] sm:$0xff]  ;;  %v2817_v58 = vld [vmem:[%s3339_s11 + $0xc] sm:$0x7] }
  0x68   : > { %v1400_v7 = vpack.c.b16 %v1399_v1, %v1399_v1 }
  0x6a   : > { %v1402_v22 = vshrl.u32 %v1400_v7, 16 }
  0x6b   : > { %2674 = vmatmul.msk.bf16.vlgmr.msrb.gmra.mxu2 %vm240_vm0, %v979_v5  ;;  %2666 = vmatmul.msk.bf16.vlgmr.msrb.gmra.mxu1 %vm240_vm0, %v944_v6  ;;  %v2781_v5 = vld [vmem:[%s3339_s11 + $0x8] sm:$0x7]  ;;  %v1317_v6 = vpack.c.b16 %v1316_v63, %v1316_v63 }
  0x6c   : > { %1264 = vmatpush.bf16.msrb.mxu2 %v3045_v8  ;;  %1229 = vmatpush.bf16.msrb.mxu1 %v3043_v9  ;;  %v2764_v8 = vld [vmem:[%s3339_s11 + $0xc] sm:$0x3]  ;;  %v1504_v9 = vunpack.c.l.b16 %v2797_v4  ;;  %v1469_v10 = vunpack.c.l.b16 %v2781_v5 }
  0x6d   : > { %v1321_v15 = vshll.u32 %v1317_v6, 16  ;;  %v1319_v19 = vshrl.u32 %v1317_v6, 16  ;;  %v3060_v4 = vld [vmem:[%s3758_s1 + $0x68] sm:$0xff]  ;;  %v3062_v6 = vld [vmem:[%s3758_s1 + $0x78] sm:$0xff] }
  0x6e   : > { %v1505_v17 = vpack.c.b16 %v1504_v9, %v1504_v9 }
  0x70   : > { %v1509_v24 = vshll.u32 %v1505_v17, 16 }
  0x72   : > { %v1511_v33 = vrot.slane %v1509_v24, 1 }
  0x75   : > { %2661 = vmatmul.msk.bf16.vlgmr.msrb.gmra.mxu0 %vm240_vm0, %v912_v16  ;;  %2682 = vmatmul.msk.bf16.vlgmr.msrb.gmra.mxu3 %vm240_vm0, %v1009_v18  ;;  %v1404_v16 = vshll.u32 %v1400_v7, 16  ;;  %v1470_v18 = vpack.c.b16 %v1469_v10, %v1469_v10  ;;  %v2863_v7 = vld [vmem:[%s3339_s11 + $0x10] sm:$0x7] }
  0x76   : > { %1197 = vmatpush.bf16.msrb.mxu0 %v3044_v20  ;;  %1294 = vmatpush.bf16.msrb.mxu3 %v3046_v21  ;;  %v1323_v20 = vrot.slane %v1321_v15, 1 }
  0x77   : > { %v1406_v23 = vrot.slane %v1404_v16, 1  ;;  %v1474_v25 = vshll.u32 %v1470_v18, 16  ;;  %v1472_v34 = vshrl.u32 %v1470_v18, 16  ;;  %v3065_v18 = vld [vmem:[%s3758_s1 + $0x10] sm:$0xff] }
  0x78   : > { %v1324_v27 = vor.u32 %v1323_v20, %v1319_v19  ;;  %v3063_v19 = vld [vmem:[%s3758_s1] sm:$0xff] }
  0x79   : > { %v1476_v35 = vrot.slane %v1474_v25, 1 }
  0x7b   : > { %2707 = vmatmul.msk.bf16.vlgmr.msra.gmra.mxu2 %vm240_vm0, %v2700_v26  ;;  %2699 = vmatmul.msk.bf16.vlgmr.msra.gmra.mxu1 %vm240_vm0, %v2684_v29  ;;  %v1407_v29 = vor.u32 %v1406_v23, %v1402_v22  ;;  %v1477_v41 = vor.u32 %v1476_v35, %v1472_v34 }
  0x7c   : > { %1388 = vmatpush.bf16.msra.mxu2 %v3049_v30  ;;  %1363 = vmatpush.bf16.msra.mxu1 %v3047_v31  ;;  %v1507_v30 = vshrl.u32 %v1505_v17, 16  ;;  %v3056_v31 = vld [vmem:[%s3758_s1 + $0x48] sm:$0xff] }
  0x7d   : > { %v2814_v17 = vld [vmem:[%s3339_s11 + $0xc] sm:$0x3] }
  0x7e   : > { %v1512_v40 = vor.u32 %v1511_v33, %v1507_v30 }
  0x85   : > { %2694 = vmatmul.msk.bf16.vlgmr.msra.gmra.mxu0 %vm240_vm0, %v1056_v42  ;;  %2715 = vmatmul.msk.bf16.vlgmr.msra.gmra.mxu3 %vm240_vm0, %v1142_v43  ;;  %v2805_v42 = vld [vmem:[%s3339_s11 + $0xc] sm:$0x6]  ;;  %v3522_v43 = vld [vmem:[%s3759_s2] ss:$0 sm:$0xff] }
  0x86   : > { %1341 = vmatpush.bf16.msra.mxu0 %v3048_v44  ;;  %1424 = vmatpush.bf16.msra.mxu3 %v3050_v49 }
  0x8b   : > { %2740 = vmatmul.msk.bf16.vlgmr.msrb.gmra.mxu2 %vm240_vm0, %v1247_v51  ;;  %2732 = vmatmul.msk.bf16.vlgmr.msrb.gmra.mxu1 %vm240_vm0, %v1212_v52  ;;  %v1540_v52 = vunpack.c.l.b16 %v2805_v42 }
  0x8c   : > { %1529 = vmatpush.bf16.msrb.mxu2 %v3053_v54  ;;  %1494 = vmatpush.bf16.msrb.mxu1 %v3051_v55  ;;  %v1444_v54 = vpack.c.b16 %v1443_v48, %v1443_v48 }
  0x8d   : > { %v1541_v57 = vpack.c.b16 %v1540_v52, %v1540_v52 }
  0x8e   : > { %v1445_v63 = vrot.slane %v1444_v54, 1 }
  0x95   : > { %2727 = vmatmul.msk.bf16.vlgmr.msrb.gmra.mxu0 %vm240_vm0, %v1180_v62  ;;  %2748 = vmatmul.msk.bf16.vlgmr.msrb.gmra.mxu3 %vm240_vm0, %v1277_v0  ;;  %v1581_v0 = vunpack.c.l.b16 %v2817_v58  ;;  %v3069_v58 = vld [vmem:[%s3758_s1 + $0x30] sm:$0xff] }
  0x96   : > { %1462 = vmatpush.bf16.msrb.mxu0 %v3052_v2  ;;  %1559 = vmatpush.bf16.msrb.mxu3 %v3054_v3  ;;  %v1542_v2 = vrot.slane %v1541_v57, 1  ;;  %v1667_v3 = vunpack.c.l.b16 %v2838_v59  ;;  %v3067_v59 = vld [vmem:[%s3758_s1 + $0x20] sm:$0xff] }
  0x97   : > { %v1582_v9 = vpack.c.b16 %v1581_v0, %v1581_v0 }
  0x98   : > { %v275_v11 = vpop.f32.mrf.mxu1 }
  0x9b   : > { %2771 = vmatmul.msk.bf16.vlgmr.msra.gmra.mxu2 %vm240_vm0, %v2764_v8  ;;  %2763 = vmatmul.msk.bf16.vlgmr.msra.gmra.mxu1 %vm240_vm0, %v2750_v12  ;;  %v2847_v8 = vld [vmem:[%s3339_s11 + $0xc] sm:$0x7]  ;;  %v1668_v12 = vpack.c.b16 %v1667_v3, %v1667_v3 }
  0x9c   : > { %1656 = vmatpush.bf16.msra.mxu2 %v3057_v13  ;;  %1628 = vmatpush.bf16.msra.mxu1 %v3055_v14  ;;  %v2830_v13 = vld [vmem:[%s3339_s11 + $0x10] sm:$0x3]  ;;  %v1772_v14 = vunpack.c.l.b16 %v2863_v7  ;;  %v1737_v15 = vunpack.c.l.b16 %v2847_v8 }
  0x9d   : > { %v1672_v24 = vshll.u32 %v1668_v12, 16  ;;  %v2902_v7 = vld [vmem:[%s3339_s11 + $0x10] sm:$0x7] }
  0x9e   : > { %v304_v21 = vpop.f32.mrf.mxu2  ;;  %v1773_v25 = vpack.c.b16 %v1772_v14, %v1772_v14 }
  0x9f   : > { %v1674_v33 = vrot.slane %v1672_v24, 1 }
  0xa0   : > { %v277_v26 = vpop.f32.mrf.mxu1  ;;  %v1777_v34 = vshll.u32 %v1773_v25, 16  ;;  %v1775_v42 = vshrl.u32 %v1773_v25, 16  ;;  %v2894_v25 = vld [vmem:[%s3339_s11 + $0x10] sm:$0x3] }
  0xa1   : > { %v1738_v26 = vpack.c.b16 %v1737_v15, %v1737_v15  ;;  %v1932_v15 = vunpack.c.l.b16 %v2902_v7  ;;  %v3075_v7 = vld [vmem:[%s3758_s1 + $0x60] sm:$0xff] }
  0xa2   : > { %v253_v28 = vpop.f32.mrf.mxu0 }
  0xa3   : > { %v276_v32 = vadd.f32 %v275_v11, %v253_v28  ;;  %v1584_v28 = vshrl.u32 %v1582_v9, 16  ;;  %v1742_v35 = vshll.u32 %v1738_v26, 16  ;;  %v1933_v24 = vpack.c.b16 %v1932_v15, %v1932_v15 }
  0xa5   : > { %2758 = vmatmul.msk.bf16.vlgmr.msra.gmra.mxu0 %vm240_vm0, %v1324_v27  ;;  %2779 = vmatmul.msk.bf16.vlgmr.msra.gmra.mxu3 %vm240_vm0, %v1407_v29  ;;  %v308_v38 = vadd.f32 %v304_v21, %v276_v32  ;;  %v1586_v21 = vshll.u32 %v1582_v9, 16  ;;  %v1670_v32 = vshrl.u32 %v1668_v12, 16  ;;  %v1744_v48 = vrot.slane %v1742_v35, 1 }
  0xa6   : > { %v306_v37 = vpop.f32.mrf.mxu2  ;;  %1606 = vmatpush.bf16.msra.mxu0 %v3056_v31  ;;  %1692 = vmatpush.bf16.msra.mxu3 %v3058_v36 }
  0xa7   : > { %v1588_v29 = vrot.slane %v1586_v21, 1 }
  0xa8   : > { %v419_v44 = vpop.f32.mrf.mxu1  ;;  %v341_v47 = vpop.f32.mrf.mxu3 }
  0xa9   : > { %v345_v49 = vadd.f32 %v341_v47, %v308_v38  ;;  %v1589_v39 = vor.u32 %v1588_v29, %v1584_v28  ;;  %v1740_v47 = vshrl.u32 %v1738_v26, 16  ;;  %v2880_v29 = vld [vmem:[%s3339_s11 + $0xc] sm:$0x3] }
  0xaa   : > { %v255_v51 = vpop.f32.mrf.mxu0 }
  0xab   : > { %2804 = vmatmul.msk.bf16.vlgmr.msrb.gmra.mxu2 %vm240_vm0, %v1512_v40  ;;  %2796 = vmatmul.msk.bf16.vlgmr.msrb.gmra.mxu1 %vm240_vm0, %v1477_v41  ;;  %v349_v53 = vmul.f32 %v3522_v43, %v345_v49  ;;  %v1675_v41 = vor.u32 %v1674_v33, %v1670_v32  ;;  %v3066_v49 = vld [vmem:[%s3758_s1 + $0x18] sm:$0xff] }
  0xac   : > { %1797 = vmatpush.bf16.msrb.mxu2 %v3061_v45  ;;  %1762 = vmatpush.bf16.msrb.mxu1 %v3059_v46  ;;  %v1779_v46 = vrot.slane %v1777_v34, 1 }
  0xad   : > { %v353_v55 = vadd.f32 %v3534_v50, %v349_v53  ;;  %v2850_v53 = vld [vmem:[%s3339_s11 + $0xc] sm:$0x6] }
  0xae   : > { %v455_v56 = vpop.f32.mrf.mxu2  ;;  %v1780_v54 = vor.u32 %v1779_v46, %v1775_v42 }
  0xaf   : > { %v354_v60 = vmax.f32 %v353_v55, 0.0  ;;  %v1745_v55 = vor.u32 %v1744_v48, %v1740_v47 }
  0xb0   : > { %v421_v61 = vpop.f32.mrf.mxu1  ;;  %v343_v62 = vpop.f32.mrf.mxu3 }
  0xb1   : > { %356 = vst.msk [vmem:[%s3547_s24] sm:$0xf] %vm355_vm1, %v354_v60  ;;  %v1711_v61 = vunpack.c.l.b16 %v2850_v53 }
  0xb2   : > { %v387_v1 = vpop.f32.mrf.mxu0 }
  0xb3   : > { %v420_v5 = vadd.f32 %v419_v44, %v387_v1  ;;  %v3064_v44 = vld [vmem:[%s3758_s1 + $0x8] sm:$0xff] }
  0xb5   : > { %2791 = vmatmul.msk.bf16.vlgmr.msrb.gmra.mxu0 %vm240_vm0, %v1445_v63  ;;  %2812 = vmatmul.msk.bf16.vlgmr.msrb.gmra.mxu3 %vm240_vm0, %v1542_v2  ;;  %v459_v11 = vadd.f32 %v455_v56, %v420_v5  ;;  %v2871_v56 = vld [vmem:[%s3339_s11 + $0x10] sm:$0x6]  ;;  %v1712_v2 = vpack.c.b16 %v1711_v61, %v1711_v61 }
  0xb6   : > { %v457_v10 = vpop.f32.mrf.mxu2  ;;  %1730 = vmatpush.bf16.msrb.mxu0 %v3060_v4  ;;  %1827 = vmatpush.bf16.msrb.mxu3 %v3062_v6  ;;  %v1808_v0 = vunpack.c.l.b16 %v2871_v56  ;;  %v2881_v6 = vld [vmem:[%s3339_s11 + $0xc] sm:$0x7] }
  0xb7   : > { %v1849_v12 = vunpack.c.l.b16 %v2881_v6  ;;  %v3077_v6 = vld [vmem:[%s3758_s1 + $0x70] sm:$0xff] }
  0xb8   : > { %v558_v16 = vpop.f32.mrf.mxu1  ;;  %v486_v20 = vpop.f32.mrf.mxu3  ;;  %v1809_v5 = vpack.c.b16 %v1808_v0, %v1808_v0 }
  0xb9   : > { %v490_v22 = vadd.f32 %v486_v20, %v459_v11  ;;  %v1713_v11 = vrot.slane %v1712_v2, 1  ;;  %v2911_v20 = vld [vmem:[%s3339_s11 + $0xc] sm:$0x7]  ;;  %v1850_v21 = vpack.c.b16 %v1849_v12, %v1849_v12 }
  0xba   : > { %v389_v23 = vpop.f32.mrf.mxu0  ;;  %v1810_v14 = vrot.slane %v1809_v5, 1 }
  0xbb   : > { %2837 = vmatmul.msk.bf16.vlgmr.msra.gmra.mxu2 %vm240_vm0, %v2830_v13  ;;  %2829 = vmatmul.msk.bf16.vlgmr.msra.gmra.mxu1 %vm240_vm0, %v2814_v17  ;;  %v491_v27 = vmul.f32 %v3522_v43, %v490_v22  ;;  %v1854_v33 = vshll.u32 %v1850_v21, 16 }
  0xbc   : > { %1921 = vmatpush.bf16.msra.mxu2 %v3065_v18  ;;  %1896 = vmatpush.bf16.msra.mxu1 %v3063_v19  ;;  %v3070_v18 = vld [vmem:[%s3758_s1 + $0x38] sm:$0xff]  ;;  %v2927_v19 = vld [vmem:[%s3339_s11 + $0x10] sm:$0x7] }
  0xbd   : > { %v492_v31 = vadd.f32 %v3534_v50, %v491_v27  ;;  %v2037_v26 = vunpack.c.l.b16 %v2927_v19  ;;  %v2002_v27 = vunpack.c.l.b16 %v2911_v20  ;;  %v2968_v19 = vld [vmem:[%s3339_s11 + $0x14] sm:$0x7] }
  0xbe   : > { %v587_v30 = vpop.f32.mrf.mxu2 }
  0xbf   : > { %v493_v36 = vmax.f32 %v492_v31, 0.0  ;;  %v3071_v31 = vld [vmem:[%s3758_s1 + $0x40] sm:$0xff] }
  0xc0   : > { %v560_v37 = vpop.f32.mrf.mxu1  ;;  %v488_v38 = vpop.f32.mrf.mxu3 }
  0xc1   : > { %495 = vrot.lane.b32.xlu0 %v493_v36, %s3221_s8  ;;  %v1937_v36 = vshll.u32 %v1933_v24, 16  ;;  %v2038_v37 = vpack.c.b16 %v2037_v26, %v2037_v26  ;;  %v2003_v38 = vpack.c.b16 %v2002_v27, %v2002_v27  ;;  %v2200_v27 = vunpack.c.l.b16 %v2968_v19 }
  0xc2   : > { %v536_v40 = vpop.f32.mrf.mxu0 }
  0xc3   : > { %v559_v45 = vadd.f32 %v558_v16, %v536_v40  ;;  %v3068_v16 = vld [vmem:[%s3758_s1 + $0x28] sm:$0xff]  ;;  %v1852_v40 = vshrl.u32 %v1850_v21, 16  ;;  %v1939_v46 = vrot.slane %v1937_v36, 1  ;;  %v2042_v47 = vshll.u32 %v2038_v37, 16 }
  0xc4   : > { %v2007_v48 = vshll.u32 %v2003_v38, 16  ;;  %v2040_v56 = vshrl.u32 %v2038_v37, 16  ;;  %v2201_v36 = vpack.c.b16 %v2200_v27, %v2200_v27 }
  0xc5   : > { %2824 = vmatmul.msk.bf16.vlgmr.msra.gmra.mxu0 %vm240_vm0, %v1589_v39  ;;  %2845 = vmatmul.msk.bf16.vlgmr.msra.gmra.mxu3 %vm240_vm0, %v1675_v41  ;;  %v591_v52 = vadd.f32 %v587_v30, %v559_v45  ;;  %v3073_v30 = vld [vmem:[%s3758_s1 + $0x50] sm:$0xff]  ;;  %v1856_v41 = vrot.slane %v1854_v33, 1  ;;  %v1935_v45 = vshrl.u32 %v1933_v24, 16 }
  0xc6   : > { %v589_v51 = vpop.f32.mrf.mxu2  ;;  %1874 = vmatpush.bf16.msra.mxu0 %v3064_v44  ;;  %1957 = vmatpush.bf16.msra.mxu3 %v3066_v49  ;;  %v2009_v61 = vrot.slane %v2007_v48, 1 }
  0xc7   : > { %v1857_v53 = vor.u32 %v1856_v41, %v1852_v40  ;;  %v2944_v41 = vld [vmem:[%s3339_s11 + $0x10] sm:$0x3] }
  0xc8   : > { %v696_v57 = vpop.f32.mrf.mxu1  ;;  %v624_v60 = vpop.f32.mrf.mxu3 }
  0xc9   : > { %v628_v62 = vadd.f32 %v624_v60, %v591_v52  ;;  %v2005_v60 = vshrl.u32 %v2003_v38, 16 }
  0xca   : > { %v538_v63 = vpop.f32.mrf.mxu0 }
  0xcb   : > { %2870 = vmatmul.msk.bf16.vlgmr.msrb.gmra.mxu2 %vm240_vm0, %v1780_v54  ;;  %2862 = vmatmul.msk.bf16.vlgmr.msrb.gmra.mxu1 %vm240_vm0, %v1745_v55  ;;  %v629_v1 = vmul.f32 %v3522_v43, %v628_v62  ;;  %v1940_v55 = vor.u32 %v1939_v46, %v1935_v45  ;;  %v3074_v62 = vld [vmem:[%s3758_s1 + $0x58] sm:$0xff] }
  0xcc   : > { %2062 = vmatpush.bf16.msrb.mxu2 %v3069_v58  ;;  %2027 = vmatpush.bf16.msrb.mxu1 %v3067_v59  ;;  %v2044_v59 = vrot.slane %v2042_v47, 1  ;;  %v2205_v47 = vshll.u32 %v2201_v36, 16 }
  0xcd   : > { %v630_v3 = vadd.f32 %v3534_v50, %v629_v1  ;;  %v2914_v1 = vld [vmem:[%s3339_s11 + $0xc] sm:$0x6] }
  0xce   : > { %v732_v4 = vpop.f32.mrf.mxu2  ;;  %v2045_v2 = vor.u32 %v2044_v59, %v2040_v56  ;;  %v2203_v56 = vshrl.u32 %v2201_v36, 16 }
  0xcf   : > { %v631_v8 = vmax.f32 %v630_v3, 0.0  ;;  %v2010_v3 = vor.u32 %v2009_v61, %v2005_v60 }
  0xd0   : > { %v698_v9 = vpop.f32.mrf.mxu1  ;;  %v626_v10 = vpop.f32.mrf.mxu3 }
  0xd1   : > { %2586 = vst.msk [vmem:[%s3547_s24 + $0x4] sm:$0xf] %vm355_vm1, %v631_v8  ;;  %v1976_v9 = vunpack.c.l.b16 %v2914_v1 }
  0xd2   : > { %v664_v13 = vpop.f32.mrf.mxu0 }
  0xd3   : > { %v697_v17 = vadd.f32 %v696_v57, %v664_v13  ;;  %v3072_v57 = vld [vmem:[%s3758_s1 + $0x48] sm:$0xff] }
  0xd5   : > { %2857 = vmatmul.msk.bf16.vlgmr.msrb.gmra.mxu0 %vm240_vm0, %v1713_v11  ;;  %2878 = vmatmul.msk.bf16.vlgmr.msrb.gmra.mxu3 %vm240_vm0, %v1810_v14  ;;  %v736_v23 = vadd.f32 %v732_v4, %v697_v17  ;;  %v2935_v4 = vld [vmem:[%s3339_s11 + $0x10] sm:$0x6]  ;;  %v1977_v14 = vpack.c.b16 %v1976_v9, %v1976_v9 }
  0xd6   : > { %v734_v22 = vpop.f32.mrf.mxu2  ;;  %1995 = vmatpush.bf16.msrb.mxu0 %v3068_v16  ;;  %2092 = vmatpush.bf16.msrb.mxu3 %v3070_v18  ;;  %v2073_v12 = vunpack.c.l.b16 %v2935_v4  ;;  %v2947_v18 = vld [vmem:[%s3339_s11 + $0x10] sm:$0x7] }
  0xd7   : > { %v2114_v24 = vunpack.c.l.b16 %v2947_v18  ;;  %v2980_v9 = vld [vmem:[%s3339_s11 + $0x10] sm:$0x6] }
  0xd8   : > { %v832_v28 = vpop.f32.mrf.mxu1  ;;  %v763_v32 = vpop.f32.mrf.mxu3  ;;  %v2074_v17 = vpack.c.b16 %v2073_v12, %v2073_v12  ;;  %v3001_v12 = vld [vmem:[%s3339_s11 + $0x14] sm:$0x6] }
  0xd9   : > { %v767_v34 = vadd.f32 %v763_v32, %v736_v23  ;;  %v1978_v23 = vrot.slane %v1977_v14, 1  ;;  %v2977_v32 = vld [vmem:[%s3339_s11 + $0x10] sm:$0x7]  ;;  %v2115_v33 = vpack.c.b16 %v2114_v24, %v2114_v24  ;;  %v2341_v18 = vunpack.c.l.b16 %v3001_v12 }
  0xda   : > { %v666_v35 = vpop.f32.mrf.mxu0  ;;  %v2075_v26 = vrot.slane %v2074_v17, 1  ;;  %v2270_v38 = vunpack.c.l.b16 %v2977_v32 }
  0xdb   : > { %2901 = vmatmul.msk.bf16.vlgmr.msra.gmra.mxu2 %vm240_vm0, %v2894_v25  ;;  %2893 = vmatmul.msk.bf16.vlgmr.msra.gmra.mxu1 %vm240_vm0, %v2880_v29  ;;  %v768_v39 = vmul.f32 %v3522_v43, %v767_v34 }
  0xdc   : > { %2189 = vmatpush.bf16.msra.mxu2 %v3073_v30  ;;  %2161 = vmatpush.bf16.msra.mxu1 %v3071_v31  ;;  %v3078_v30 = vld [vmem:[%s3758_s1 + $0x78] sm:$0xff]  ;;  %v2993_v31 = vld [vmem:[%s3339_s11 + $0x14] sm:$0x7] }
  0xdd   : > { %v769_v44 = vadd.f32 %v3534_v50, %v768_v39  ;;  %v2305_v37 = vunpack.c.l.b16 %v2993_v31  ;;  %v2960_v39 = vld [vmem:[%s3339_s11 + $0x14] sm:$0x3]  ;;  %s3079_s11 = sshll.u32 %s3211_s18, 5 }
  0xde   : > { %v857_v42 = vpop.f32.mrf.mxu2  ;;  %s2390_s26 = scalar_lea.hbm %s3761_s4, %s3079_s11 }
  0xdf   : > { %v770_v49 = vmax.f32 %v769_v44, 0.0  ;;  %v2119_v44 = vshll.u32 %v2115_v33, 16  ;;  %v2306_v48 = vpack.c.b16 %v2305_v37, %v2305_v37  ;;  %s2393_s30 = sshll.u32 %s2390_s26, 4  ;;  %s2394_s30 = int_to_ptr.hbm [resolvable:$true] %s2393_s30 }
  0xe0   : > { %v834_v51 = vpop.f32.mrf.mxu1  ;;  %v765_v52 = vpop.f32.mrf.mxu3  ;;  %s3155_s5 = sshra.s32 %s2394_s30, 4  ;;  %s3156_s5 = int_to_ptr.hbm [resolvable:$true] %s3155_s5 }
  0xe1   : > { %772 = vrot.lane.b32.xlu0 %v770_v49, %s3221_s8  ;;  %v2271_v49 = vpack.c.b16 %v2270_v38, %v2270_v38  ;;  %v2117_v52 = vshrl.u32 %v2115_v33, 16  ;;  %s3157_s6 = scalar_lea.hbm %s3156_s5, 32  ;;  %p3162_p1 = scmp.lt.s32.totalorder %s3156_s5, %s3761_s4 }
  0xe2   : > { %v810_v54 = vpop.f32.mrf.mxu0  ;;  %p3158_p12 = scmp.ne.s32.totalorder %s3156_s5, %s3157_s6  ;;  %p3163_p2 = scmp.lt.s32.totalorder %s3161_s9, %s3157_s6 }
  0xe3   : > { %v833_v58 = vadd.f32 %v832_v28, %v810_v54  ;;  %v3076_v28 = vld [vmem:[%s3758_s1 + $0x68] sm:$0xff]  ;;  %v2275_v59 = vshll.u32 %v2271_v49, 16 }
  0xe4   : > { %p3159_p13 = pnand %p3158_p12, %p3289_p4  ;;  %p3164_p3 = por %p3163_p2, %p3162_p1 }
  0xe5   : > { %2888 = vmatmul.msk.bf16.vlgmr.msra.gmra.mxu0 %vm240_vm0, %v1857_v53  ;;  %2909 = vmatmul.msk.bf16.vlgmr.msra.gmra.mxu3 %vm240_vm0, %v1940_v55  ;;  %v861_v0 = vadd.f32 %v857_v42, %v833_v58  ;;  %v2121_v53 = vrot.slane %v2119_v44, 1  ;;  %v2310_v58 = vshll.u32 %v2306_v48, 16 }
  0xe6   : > { %v859_v63 = vpop.f32.mrf.mxu2  ;;  %2139 = vmatpush.bf16.msra.mxu0 %v3072_v57  ;;  %2225 = vmatpush.bf16.msra.mxu3 %v3074_v62  ;;  %v2207_v57 = vrot.slane %v2205_v47, 1  ;;  %p3160_p0 = pneg %p3159_p13 }
  0xe7   : > { %v2122_v63 = vor.u32 %v2121_v53, %v2117_v52  ;;  %v2312_v4 = vrot.slane %v2310_v58, 1 }
  0xe8   : > { %v963_v5 = vpop.f32.mrf.mxu1  ;;  %v893_v8 = vpop.f32.mrf.mxu3  ;;  %v2208_v1 = vor.u32 %v2207_v57, %v2203_v56  ;;  %p3165_p5 = pnand %p3164_p3, %p3160_p0 }
  0xe9   : > { %v897_v10 = vadd.f32 %v893_v8, %v861_v0 }
  0xea   : > { %v812_v11 = vpop.f32.mrf.mxu0 }
  0xeb   : > { %2934 = vmatmul.msk.bf16.vlgmr.msrb.gmra.mxu2 %vm240_vm0, %v2045_v2  ;;  %2926 = vmatmul.msk.bf16.vlgmr.msrb.gmra.mxu1 %vm240_vm0, %v2010_v3  ;;  %v898_v13 = vmul.f32 %v3522_v43, %v897_v10  ;;  %v2308_v2 = vshrl.u32 %v2306_v48, 16 }
  0xec   : > { %2330 = vmatpush.bf16.msrb.mxu2 %v3077_v6  ;;  %2295 = vmatpush.bf16.msrb.mxu1 %v3075_v7  ;;  %v2277_v6 = vrot.slane %v2275_v59, 1 }
  0xed   : > { %v899_v15 = vadd.f32 %v3534_v50, %v898_v13  ;;  %v2313_v10 = vor.u32 %v2312_v4, %v2308_v2 }
  0xee   : > { %v998_v16 = vpop.f32.mrf.mxu2 }
  0xef   : > { %v900_v20 = vmax.f32 %v899_v15, 0.0  ;;  %v2244_v15 = vunpack.c.l.b16 %v2980_v9 }
  0xf0   : > { %v965_v21 = vpop.f32.mrf.mxu1  ;;  %v895_v22 = vpop.f32.mrf.mxu3 }
  0xf1   : > { %2650 = vst.msk [vmem:[%s3547_s24 + $0x8] sm:$0xf] %vm355_vm1, %v900_v20  ;;  %v2245_v20 = vpack.c.b16 %v2244_v15, %v2244_v15 }
  0xf2   : > { %v931_v25 = vpop.f32.mrf.mxu0 }
  0xf3   : > { %v964_v29 = vadd.f32 %v963_v5, %v931_v25  ;;  %v2273_v5 = vshrl.u32 %v2271_v49, 16  ;;  %v2246_v27 = vrot.slane %v2245_v20, 1 }
  0xf5   : > { %2921 = vmatmul.msk.bf16.vlgmr.msrb.gmra.mxu0 %vm240_vm0, %v1978_v23  ;;  %2942 = vmatmul.msk.bf16.vlgmr.msrb.gmra.mxu3 %vm240_vm0, %v2075_v26  ;;  %v1002_v35 = vadd.f32 %v998_v16, %v964_v29  ;;  %v2278_v11 = vor.u32 %v2277_v6, %v2273_v5  ;;  %v2342_v23 = vpack.c.b16 %v2341_v18, %v2341_v18 }
  0xf6   : > { %v1000_v34 = vpop.f32.mrf.mxu2  ;;  %2263 = vmatpush.bf16.msrb.mxu0 %v3076_v28  ;;  %2360 = vmatpush.bf16.msrb.mxu3 %v3078_v30 }
  0xf7   : > { %v2343_v29 = vrot.slane %v2342_v23, 1 }
  0xf8   : > { %v1097_v40 = vpop.f32.mrf.mxu1  ;;  %v1028_v42 = vpop.f32.mrf.mxu3 }
  0xf9   : > { %v1032_v45 = vadd.f32 %v1028_v42, %v1002_v35 }
  0xfa   : > { %v933_v46 = vpop.f32.mrf.mxu0 }
  0xfb   : > { %2967 = vmatmul.msk.bf16.vlgmr.msra.gmra.mxu2 %vm240_vm0, %v2960_v39  ;;  %2959 = vmatmul.msk.bf16.vlgmr.msra.gmra.mxu1 %vm240_vm0, %v2944_v41  ;;  %v1033_v51 = vmul.f32 %v3522_v43, %v1032_v45 }
  0xfd   : > { %v1034_v55 = vadd.f32 %v3534_v50, %v1033_v51 }
  0xfe   : > { %v1125_v54 = vpop.f32.mrf.mxu2 }
  0xff   : > { %v1035_v60 = vmax.f32 %v1034_v55, 0.0 }
 0x100   : > { %v1099_v61 = vpop.f32.mrf.mxu1  ;;  %v1030_v62 = vpop.f32.mrf.mxu3 }
 0x101   : > { %1037 = vrot.lane.b32.xlu1 %v1035_v60, %s3221_s8 }
 0x102   : > { %v1075_v0 = vpop.f32.mrf.mxu0 }
 0x103   : > { %v1098_v3 = vadd.f32 %v1097_v40, %v1075_v0 }
 0x105   : > { %2954 = vmatmul.msk.bf16.vlgmr.msra.gmra.mxu0 %vm240_vm0, %v2122_v63  ;;  %2975 = vmatmul.msk.bf16.vlgmr.msra.gmra.mxu3 %vm240_vm0, %v2208_v1  ;;  %v1129_v8 = vadd.f32 %v1125_v54, %v1098_v3 }
 0x106   : > { %v1127_v7 = vpop.f32.mrf.mxu2 }
 0x108   : > { %v1231_v13 = vpop.f32.mrf.mxu1  ;;  %v1161_v14 = vpop.f32.mrf.mxu3 }
 0x109   : > { %v1165_v16 = vadd.f32 %v1161_v14, %v1129_v8 }
 0x10a   : > { %v1077_v17 = vpop.f32.mrf.mxu0 }
 0x10b   : > { %3000 = vmatmul.msk.bf16.vlgmr.msrb.gmra.mxu2 %vm240_vm0, %v2313_v10  ;;  %2992 = vmatmul.msk.bf16.vlgmr.msrb.gmra.mxu1 %vm240_vm0, %v2278_v11  ;;  %v1166_v19 = vmul.f32 %v3522_v43, %v1165_v16 }
 0x10d   : > { %v1167_v21 = vadd.f32 %v3534_v50, %v1166_v19 }
 0x10e   : > { %v1266_v22 = vpop.f32.mrf.mxu2 }
 0x10f   : > { %v1168_v24 = vmax.f32 %v1167_v21, 0.0 }
 0x110   : > { %v1233_v25 = vpop.f32.mrf.mxu1  ;;  %v1163_v26 = vpop.f32.mrf.mxu3 }
 0x111   : > { %2716 = vst.msk [vmem:[%s3547_s24 + $0xc] sm:$0xf] %vm355_vm1, %v1168_v24 }
 0x112   : > { %v1199_v28 = vpop.f32.mrf.mxu0 }
 0x113   : > { %v1232_v30 = vadd.f32 %v1231_v13, %v1199_v28 }
 0x115   : > { %2987 = vmatmul.msk.bf16.vlgmr.msrb.gmra.mxu0 %vm240_vm0, %v2246_v27  ;;  %3008 = vmatmul.msk.bf16.vlgmr.msrb.gmra.mxu3 %vm240_vm0, %v2343_v29  ;;  %v1270_v32 = vadd.f32 %v1266_v22, %v1232_v30 }
 0x116   : > { %v1268_v31 = vpop.f32.mrf.mxu2 }
 0x118   : > { %v1365_v33 = vpop.f32.mrf.mxu1  ;;  %v1296_v34 = vpop.f32.mrf.mxu3 }
 0x119   : > { %v1300_v35 = vadd.f32 %v1296_v34, %v1270_v32 }
 0x11a   : > { %v1201_v36 = vpop.f32.mrf.mxu0 }
 0x11b   : > { %v1301_v37 = vmul.f32 %v3522_v43, %v1300_v35 }
 0x11d   : > { %v1302_v39 = vadd.f32 %v3534_v50, %v1301_v37 }
 0x11e   : > { %v1390_v38 = vpop.f32.mrf.mxu2 }
 0x11f   : > { %v1303_v40 = vmax.f32 %v1302_v39, 0.0 }
 0x120   : > { %v1367_v41 = vpop.f32.mrf.mxu1  ;;  %v1298_v42 = vpop.f32.mrf.mxu3 }
 0x121   : > { %1305 = vrot.lane.b32.xlu1 %v1303_v40, %s3221_s8 }
 0x122   : > { %v1343_v44 = vpop.f32.mrf.mxu0 }
 0x123   : > { %v1366_v45 = vadd.f32 %v1365_v33, %v1343_v44 }
 0x125   : > { %v1394_v47 = vadd.f32 %v1390_v38, %v1366_v45 }
 0x126   : > { %v1392_v46 = vpop.f32.mrf.mxu2 }
 0x128   : > { %v1496_v48 = vpop.f32.mrf.mxu1  ;;  %v1426_v49 = vpop.f32.mrf.mxu3 }
 0x129   : > { %v1430_v51 = vadd.f32 %v1426_v49, %v1394_v47 }
 0x12a   : > { %v1345_v52 = vpop.f32.mrf.mxu0 }
 0x12b   : > { %v1431_v53 = vmul.f32 %v3522_v43, %v1430_v51 }
 0x12d   : > { %v1432_v54 = vadd.f32 %v3534_v50, %v1431_v53 }
 0x12e   : > { %v1531_v55 = vpop.f32.mrf.mxu2 }
 0x12f   : > { %v1433_v56 = vmax.f32 %v1432_v54, 0.0 }
 0x130   : > { %v1498_v57 = vpop.f32.mrf.mxu1  ;;  %v1428_v58 = vpop.f32.mrf.mxu3 }
 0x131   : > { %2780 = vst.msk [vmem:[%s3547_s24 + $0x10] sm:$0xf] %vm355_vm1, %v1433_v56 }
 0x132   : > { %v1464_v59 = vpop.f32.mrf.mxu0 }
 0x133   : > { %v1497_v60 = vadd.f32 %v1496_v48, %v1464_v59  ;;  %v496_v61 = vpop.permute.xlu0 %495 }
 0x134   : > { %499 = vst.msk [vmem:[%s3547_s24] sm:$0xf] %vm498_vm2, %v496_v61 }
 0x135   : > { %v1535_v63 = vadd.f32 %v1531_v55, %v1497_v60 }
 0x136   : > { %v1533_v62 = vpop.f32.mrf.mxu2 }
 0x138   : > { %v1630_v0 = vpop.f32.mrf.mxu1  ;;  %v1561_v1 = vpop.f32.mrf.mxu3 }
 0x139   : > { %v1565_v2 = vadd.f32 %v1561_v1, %v1535_v63 }
 0x13a   : > { %v1466_v3 = vpop.f32.mrf.mxu0 }
 0x13b   : > { %v1566_v4 = vmul.f32 %v3522_v43, %v1565_v2 }
 0x13d   : > { %v1567_v6 = vadd.f32 %v3534_v50, %v1566_v4 }
 0x13e   : > { %v1658_v5 = vpop.f32.mrf.mxu2 }
 0x13f   : > { %v1568_v7 = vmax.f32 %v1567_v6, 0.0 }
 0x140   : > { %v1632_v8 = vpop.f32.mrf.mxu1  ;;  %v1563_v9 = vpop.f32.mrf.mxu3 }
 0x141   : > { %1570 = vrot.lane.b32.xlu2 %v1568_v7, %s3221_s8 }
 0x142   : > { %v1608_v10 = vpop.f32.mrf.mxu0 }
 0x143   : > { %v1631_v11 = vadd.f32 %v1630_v0, %v1608_v10 }
 0x145   : > { %v1662_v13 = vadd.f32 %v1658_v5, %v1631_v11 }
 0x146   : > { %v1660_v12 = vpop.f32.mrf.mxu2 }
 0x148   : > { %v1764_v14 = vpop.f32.mrf.mxu1  ;;  %v1694_v15 = vpop.f32.mrf.mxu3 }
 0x149   : > { %v1698_v16 = vadd.f32 %v1694_v15, %v1662_v13 }
 0x14a   : > { %v1610_v17 = vpop.f32.mrf.mxu0 }
 0x14b   : > { %v1699_v18 = vmul.f32 %v3522_v43, %v1698_v16 }
 0x14d   : > { %v1700_v19 = vadd.f32 %v3534_v50, %v1699_v18 }
 0x14e   : > { %v1799_v20 = vpop.f32.mrf.mxu2 }
 0x14f   : > { %v1701_v21 = vmax.f32 %v1700_v19, 0.0 }
 0x150   : > { %v1766_v22 = vpop.f32.mrf.mxu1  ;;  %v1696_v23 = vpop.f32.mrf.mxu3 }
 0x151   : > { %2846 = vst.msk [vmem:[%s3547_s24 + $0x14] sm:$0xf] %vm355_vm1, %v1701_v21 }
 0x152   : > { %v1732_v24 = vpop.f32.mrf.mxu0 }
 0x153   : > { %v1765_v25 = vadd.f32 %v1764_v14, %v1732_v24  ;;  %v773_v26 = vpop.permute.xlu0 %772 }
 0x154   : > { %2619 = vst.msk [vmem:[%s3547_s24 + $0x4] sm:$0xf] %vm498_vm2, %v773_v26 }
 0x155   : > { %v1803_v28 = vadd.f32 %v1799_v20, %v1765_v25 }
 0x156   : > { %v1801_v27 = vpop.f32.mrf.mxu2 }
 0x158   : > { %v1898_v29 = vpop.f32.mrf.mxu1  ;;  %v1829_v30 = vpop.f32.mrf.mxu3 }
 0x159   : > { %v1833_v31 = vadd.f32 %v1829_v30, %v1803_v28 }
 0x15a   : > { %v1734_v32 = vpop.f32.mrf.mxu0 }
 0x15b   : > { %v1834_v33 = vmul.f32 %v3522_v43, %v1833_v31 }
 0x15d   : > { %v1835_v35 = vadd.f32 %v3534_v50, %v1834_v33 }
 0x15e   : > { %v1923_v34 = vpop.f32.mrf.mxu2 }
 0x15f   : > { %v1836_v36 = vmax.f32 %v1835_v35, 0.0 }
 0x160   : > { %v1900_v37 = vpop.f32.mrf.mxu1  ;;  %v1831_v38 = vpop.f32.mrf.mxu3 }
 0x161   : > { %1838 = vrot.lane.b32.xlu2 %v1836_v36, %s3221_s8 }
 0x162   : > { %v1876_v39 = vpop.f32.mrf.mxu0 }
 0x163   : > { %v1899_v40 = vadd.f32 %v1898_v29, %v1876_v39 }
 0x165   : > { %v1927_v42 = vadd.f32 %v1923_v34, %v1899_v40 }
 0x166   : > { %v1925_v41 = vpop.f32.mrf.mxu2 }
 0x168   : > { %v2029_v44 = vpop.f32.mrf.mxu1  ;;  %v1959_v45 = vpop.f32.mrf.mxu3 }
 0x169   : > { %v1963_v46 = vadd.f32 %v1959_v45, %v1927_v42 }
 0x16a   : > { %v1878_v47 = vpop.f32.mrf.mxu0 }
 0x16b   : > { %v1964_v48 = vmul.f32 %v3522_v43, %v1963_v46 }
 0x16d   : > { %v1965_v49 = vadd.f32 %v3534_v50, %v1964_v48 }
 0x16e   : > { %v2064_v51 = vpop.f32.mrf.mxu2 }
 0x16f   : > { %v1966_v52 = vmax.f32 %v1965_v49, 0.0 }
 0x170   : > { %v2031_v53 = vpop.f32.mrf.mxu1  ;;  %v1961_v54 = vpop.f32.mrf.mxu3 }
 0x171   : > { %2910 = vst.msk [vmem:[%s3547_s24 + $0x18] sm:$0xf] %vm355_vm1, %v1966_v52 }
 0x172   : > { %v1997_v55 = vpop.f32.mrf.mxu0 }
 0x173   : > { %v2030_v56 = vadd.f32 %v2029_v44, %v1997_v55  ;;  %v1038_v57 = vpop.permute.xlu1 %1037 }
 0x174   : > { %2683 = vst.msk [vmem:[%s3547_s24 + $0x8] sm:$0xf] %vm498_vm2, %v1038_v57 }
 0x175   : > { %v2068_v59 = vadd.f32 %v2064_v51, %v2030_v56 }
 0x176   : > { %v2066_v58 = vpop.f32.mrf.mxu2 }
 0x178   : > { %v2163_v60 = vpop.f32.mrf.mxu1  ;;  %v2094_v61 = vpop.f32.mrf.mxu3 }
 0x179   : > { %v2098_v62 = vadd.f32 %v2094_v61, %v2068_v59 }
 0x17a   : > { %v1999_v63 = vpop.f32.mrf.mxu0 }
 0x17b   : > { %v2099_v0 = vmul.f32 %v3522_v43, %v2098_v62 }
 0x17d   : > { %v2100_v2 = vadd.f32 %v3534_v50, %v2099_v0 }
 0x17e   : > { %v2191_v1 = vpop.f32.mrf.mxu2 }
 0x17f   : > { %v2101_v3 = vmax.f32 %v2100_v2, 0.0 }
 0x180   : > { %v2165_v4 = vpop.f32.mrf.mxu1  ;;  %v2096_v5 = vpop.f32.mrf.mxu3 }
 0x181   : > { %2103 = vrot.lane.b32.xlu0 %v2101_v3, %s3221_s8 }
 0x182   : > { %v2141_v6 = vpop.f32.mrf.mxu0 }
 0x183   : > { %v2164_v7 = vadd.f32 %v2163_v60, %v2141_v6 }
 0x185   : > { %v2195_v9 = vadd.f32 %v2191_v1, %v2164_v7 }
 0x186   : > { %v2193_v8 = vpop.f32.mrf.mxu2 }
 0x188   : > { %v2297_v10 = vpop.f32.mrf.mxu1  ;;  %v2227_v11 = vpop.f32.mrf.mxu3 }
 0x189   : > { %v2231_v12 = vadd.f32 %v2227_v11, %v2195_v9 }
 0x18a   : > { %v2143_v13 = vpop.f32.mrf.mxu0 }
 0x18b   : > { %v2232_v14 = vmul.f32 %v3522_v43, %v2231_v12 }
 0x18d   : > { %v2233_v15 = vadd.f32 %v3534_v50, %v2232_v14 }
 0x18e   : > { %v2332_v16 = vpop.f32.mrf.mxu2 }
 0x18f   : > { %v2234_v17 = vmax.f32 %v2233_v15, 0.0 }
 0x190   : > { %v2299_v18 = vpop.f32.mrf.mxu1  ;;  %v2229_v19 = vpop.f32.mrf.mxu3 }
 0x191   : > { %2976 = vst.msk [vmem:[%s3547_s24 + $0x1c] sm:$0xf] %vm355_vm1, %v2234_v17 }
 0x192   : > { %v2265_v20 = vpop.f32.mrf.mxu0 }
 0x193   : > { %v2298_v21 = vadd.f32 %v2297_v10, %v2265_v20  ;;  %v1306_v22 = vpop.permute.xlu1 %1305 }
 0x194   : > { %2749 = vst.msk [vmem:[%s3547_s24 + $0xc] sm:$0xf] %vm498_vm2, %v1306_v22 }
 0x195   : > { %v2336_v24 = vadd.f32 %v2332_v16, %v2298_v21 }
 0x196   : > { %v2334_v23 = vpop.f32.mrf.mxu2 }
 0x198   : > { %v2362_v25 = vpop.f32.mrf.mxu3 }
 0x199   : > { %v2366_v26 = vadd.f32 %v2362_v25, %v2336_v24 }
 0x19a   : > { %v2267_v27 = vpop.f32.mrf.mxu0 }
 0x19b   : > { %v2367_v28 = vmul.f32 %v3522_v43, %v2366_v26  ;;  %v1571_v29 = vpop.permute.xlu2 %1570 }
 0x19c   : > { %2813 = vst.msk [vmem:[%s3547_s24 + $0x10] sm:$0xf] %vm498_vm2, %v1571_v29 }
 0x19d   : > { %v2368_v30 = vadd.f32 %v3534_v50, %v2367_v28 }
 0x19f   : > { %v2369_v31 = vmax.f32 %v2368_v30, 0.0 }
 0x1a0   : > { %v2364_v32 = vpop.f32.mrf.mxu3 }
 0x1a1   : > { %2371 = vrot.lane.b32.xlu1 %v2369_v31, %s3221_s8  ;;  %s2376_s8 = scalar_lea.sflag [#allocation3], %s202_s10 }
 0x1bb   : > { %v1839_v33 = vpop.permute.xlu2 %1838 }
 0x1bc   : > { %2879 = vst.msk [vmem:[%s3547_s24 + $0x14] sm:$0xf] %vm498_vm2, %v1839_v33 }
 0x1f3   : > { %v2104_v34 = vpop.permute.xlu0 %2103 }
 0x1f4   : > { %2943 = vst.msk [vmem:[%s3547_s24 + $0x18] sm:$0xf] %vm498_vm2, %v2104_v34 }
 0x213   : > { %v2372_v43 = vpop.permute.xlu1 %2371 }
 0x214   : > { %3009 = vst.msk [vmem:[%s3547_s24 + $0x1c] sm:$0xf] %vm498_vm2, %v2372_v43 }
 0x215   : > { %3168 = shalt.err (!%p3165_p5)
}
 0x216   : > { %s3222_s10 = smov 64   ;;  %s3223_s24 = smov 4  }
 0x217   : > { %3081 = dma.vmem_to_hbm [thread:$0]  (%p3289_p4), %s2392_s29, 512, %s2394_s30, %s2376_s8, %s3222_s10, %s3222_s10, %s3223_s24  }
 0x218 PF: > { %p3087_p6 = scmp.ge.s32.totalorder %s3219_s20, 2  ;;  %s2408_s14 = sand.u32 1, %s3199_s15  }
 0x219   : > { %s2409_s11 = scalar_lea.sflag [#allocation3], %s2408_s14 }
 0x21a   : > { %p3084_p7 = pnand %p3087_p6, %p3296_p8 }
 0x21c   : > { %p3085_p9 = pneg %p3084_p7 }
 0x21e   : > { %3194 = dma.done.wait (%p3085_p9), %s2409_s11, 512  }
 0x21f   : > { %3196 = vsyncadd (%p3085_p9), %s2409_s11, 4294966784  ;;  %s17_s20 = sadd.s32 1, %s3219_s20   ;;  %s3764_s15 = smov %s3203_s16 }
 0x220   : > { %p14_p10 = scmp.ge.s32.totalorder %s17_s20, 4   ;;  %s3765_s16 = smov %s3207_s17 }
 0x221   : > { %s3766_s17 = smov %s3302_s28  ;;  %s3767_s18 = smov %s3215_s19 }
 0x222   : > { %s3768_s19 = smov %s3770_s23  ;;  %16 = sbr.rel (!%p14_p10) target bundleno = 4 (0x4), region = 99 }
 0x227   :  { %2415 = vsyncpa [#allocation3], 1 }
 0x228   :  { %2417 = vsyncpa [#allocation3 + $0x1], 1 }

</bundles_post_ra>
